<compile_context>
chip_gen: v5e
topology: v5e:2x2
jax: 0.10.0
libtpu: 0.0.40
codegen_flags: <defaults>
</compile_context>

<pallas_src>
import functools

import jax
import jax.numpy as jnp
from jax.experimental import pallas as pl
from jax.experimental.pallas import tpu as pltpu


C1 = 32      # conv1 out channels (no lane padding carried through the kernel)
C2 = 64      # conv2 out channels
OPAD = 128   # fc2 out classes (3) padded to 128 lanes for an unmasked store


# ------------------------------ fused kernel --------------------------------

def _fused_forward_kernel(xcol_ref, w1_ref, b1_ref, w2_ref, b2_ref,
                          w3_ref, b3_ref, w4_ref, b4_ref, out_ref,
                          p1pad_ref, hx1_ref, hx2_ref, lhs2_ref, flat_ref):
    f32, bf16 = jnp.float32, jnp.bfloat16
    Ho1, W, c1 = hx1_ref.shape           # (H/2, W, 32)
    Ho2, Wo1, c2 = hx2_ref.shape         # (H/4, W/2, 64)
    Wo2 = Wo1 // 2

    # ---- conv1 + ReLU: one MXU GEMM over the wrapper-built im2col (K=9) ----
    xcol = xcol_ref[0]                                             # (H*W, 9) f32
    a1 = jnp.dot(xcol, w1_ref[...], preferred_element_type=f32)    # (H*W, 32)
    a1 = jnp.maximum(a1 + b1_ref[...], 0.0)

    # ---- pool1 2x2/2: H-halving on the value, W-halving via one strided read
    a1r = a1.reshape(Ho1, 2, W, c1)                  # leading regroup only
    hx1_ref[...] = jnp.maximum(a1r[:, 0], a1r[:, 1])
    p1 = jnp.maximum(hx1_ref[:, pl.ds(0, Wo1, stride=2), :],
                     hx1_ref[:, pl.ds(1, Wo1, stride=2), :])       # (Ho1, Wo1, 32)

    # ---- conv2 + ReLU: build im2col LHS (M2, 288) in bf16 VMEM, ONE GEMM ---
    # border-only zeroing of the padded activation (no full-buffer fill)
    p1pad_ref[0, :, :] = jnp.zeros((Wo1 + 2, c1), f32)
    p1pad_ref[Ho1 + 1, :, :] = jnp.zeros((Wo1 + 2, c1), f32)
    p1pad_ref[:, 0, :] = jnp.zeros((Ho1 + 2, c1), f32)
    p1pad_ref[:, Wo1 + 1, :] = jnp.zeros((Ho1 + 2, c1), f32)
    p1pad_ref[1:Ho1 + 1, 1:Wo1 + 1, :] = p1

    for dy in range(3):
        for dx in range(3):
            t = 3 * dy + dx
            tap = p1pad_ref[dy:dy + Ho1, dx:dx + Wo1, :]           # (Ho1,Wo1,32)
            lhs2_ref[:, c1 * t:c1 * (t + 1)] = (
                tap.reshape(Ho1 * Wo1, c1).astype(bf16))
    a2 = jnp.dot(lhs2_ref[...], w2_ref[...],
                 preferred_element_type=f32)                       # (M2, 64)
    a2 = jnp.maximum(a2 + b2_ref[...], 0.0)

    # ---- pool2 --------------------------------------------------------------
    a2r = a2.reshape(Ho2, 2, Wo1, c2)
    hx2_ref[...] = jnp.maximum(a2r[:, 0], a2r[:, 1])
    p2 = jnp.maximum(hx2_ref[:, pl.ds(0, Wo2, stride=2), :],
                     hx2_ref[:, pl.ds(1, Wo2, stride=2), :])       # (Ho2, Wo2, 64)

    # ---- fc1 + ReLU: lane-dense (1, Ho2*Wo2*64) LHS, ONE GEMM ---------------
    # manual (h, w, c)-order flatten via masked lane-window stores (a direct
    # lane-merging reshape of the value is not a safe Mosaic relayout)
    for h in range(Ho2):
        for w in range(Wo2):
            off = (h * Wo2 + w) * c2
            flat_ref[:, pl.ds(off, c2)] = p2[h:h + 1, w, :].astype(bf16)
    h1 = jnp.dot(flat_ref[...], w3_ref[...],
                 preferred_element_type=f32)                       # (1, hidden)
    h1 = jnp.maximum(h1 + b3_ref[...], 0.0)

    # ---- fc2 (classes lane-padded to 128; sliced in the wrapper) ------------
    y = jnp.dot(h1.astype(bf16), w4_ref[...],
                preferred_element_type=f32) + b4_ref[...]
    out_ref[0, :, :] = y.astype(out_ref.dtype)


def _fused_pallas_call(B, H, W, hidden):
    Ho1, Wo1 = H // 2, W // 2
    Ho2, Wo2 = Ho1 // 2, Wo1 // 2
    K2 = 9 * C1                 # conv2 GEMM K
    KF = Ho2 * Wo2 * C2         # fc1 GEMM K

    def per_batch(shape):
        block = (1,) + tuple(shape[1:])

        def imap(b):
            return (b,) + (0,) * (len(shape) - 1)

        return pl.BlockSpec(block, imap)

    def resident(shape):
        def imap(b):
            return (0,) * len(shape)

        return pl.BlockSpec(tuple(shape), imap)

    flops = int(B * (H * W * 9 * C1 * 2
                     + Ho1 * Wo1 * K2 * C2 * 2
                     + KF * hidden * 2
                     + hidden * OPAD * 2))
    bytes_accessed = int(B * H * W * 9 * 4 + 9 * C1 * 4 + C1 * 4
                         + K2 * C2 * 2 + C2 * 4
                         + KF * hidden * 2 + hidden * 4
                         + hidden * OPAD * 2 + OPAD * 4
                         + B * OPAD * 4)

    return pl.pallas_call(
        _fused_forward_kernel,
        out_shape=jax.ShapeDtypeStruct((B, 1, OPAD), jnp.float32),
        grid=(B,),
        in_specs=[
            per_batch((B, H * W, 9)),     # conv1 im2col input
            resident((9, C1)),            # conv1 weight (tap, cout) f32
            resident((1, C1)),            # conv1 bias
            resident((K2, C2)),           # conv2 weight packed (tap*cin, cout) bf16
            resident((1, C2)),            # conv2 bias
            resident((KF, hidden)),       # fc1 weight packed ((h,w,c), hidden) bf16
            resident((1, hidden)),        # fc1 bias
            resident((hidden, OPAD)),     # fc2 weight (padded classes) bf16
            resident((1, OPAD)),          # fc2 bias
        ],
        out_specs=per_batch((B, 1, OPAD)),
        scratch_shapes=[
            pltpu.VMEM((Ho1 + 2, Wo1 + 2, C1), jnp.float32),   # padded pooled1
            pltpu.VMEM((Ho1, W, C1), jnp.float32),             # pool1 H-max staging
            pltpu.VMEM((Ho2, Wo1, C2), jnp.float32),           # pool2 H-max staging
            pltpu.VMEM((Ho1 * Wo1, K2), jnp.bfloat16),         # conv2 im2col LHS
            pltpu.VMEM((1, KF), jnp.bfloat16),                 # fc1 LHS (flattened)
        ],
        compiler_params=pltpu.CompilerParams(
            dimension_semantics=("parallel",),
            vmem_limit_bytes=32 * 1024 * 1024),
        cost_estimate=pl.CostEstimate(flops=flops, transcendentals=0,
                                      bytes_accessed=bytes_accessed),
    )


# --------------------------- param preprocessing ----------------------------

def prepare_params(params, hidden, num_classes, spatial):
    """One-time repacking of the PyTorch-shaped params into unpadded,
    kernel-friendly layouts (bf16 for MXU RHS operands)."""
    f32, bf16 = jnp.float32, jnp.bfloat16
    s = spatial // 4   # spatial size after the two 2x2 pools

    # conv1: (32,1,3,3) -> (9, 32), row = tap = dy*3+dx (kept f32, K=9 GEMM)
    w1 = jnp.transpose(params["conv1_w"][:, 0], (1, 2, 0)).reshape(9, 32).astype(f32)
    b1 = params["conv1_b"].reshape(1, 32).astype(f32)

    # conv2: (64,32,3,3) -> (9*32, 64), row = tap*32 + cin (matches im2col)
    w2 = jnp.transpose(params["conv2_w"], (2, 3, 1, 0)).reshape(9 * 32, 64).astype(bf16)
    b2 = params["conv2_b"].reshape(1, 64).astype(f32)

    # fc1: PyTorch flattens NCHW (c, h, w); the kernel flattens (h, w, c).
    w3 = params["fc1_w"].reshape(64, s, s, hidden)
    w3 = jnp.transpose(w3, (1, 2, 0, 3)).reshape(s * s * 64, hidden).astype(bf16)
    b3 = params["fc1_b"].reshape(1, hidden).astype(f32)

    # fc2: pad classes to 128 lanes so the final store is lane-dense.
    w4 = jnp.zeros((hidden, OPAD), f32).at[:, :num_classes].set(
        params["fc2_w"]).astype(bf16)
    b4 = jnp.zeros((1, OPAD), f32).at[0, :num_classes].set(params["fc2_b"])

    return dict(w1=w1, b1=b1, w2=w2, b2=b2, w3=w3, b3=b3, w4=w4, b4=b4)


@functools.partial(jax.jit, static_argnames=("num_classes",))
def xray_classifier_forward(x_nchw, prep, num_classes):
    B, _, H, W = x_nchw.shape
    # conv1 im2col (Cin=1): zero-pad + 9 shifted copies, taps in the last dim.
    # Pure layout plumbing (no arithmetic) so the kernel's conv1 is one GEMM.
    xp = jnp.pad(x_nchw[:, 0], ((0, 0), (1, 1), (1, 1)))
    xcol = jnp.stack([xp[:, dy:dy + H, dx:dx + W]
                      for dy in range(3) for dx in range(3)], axis=-1)
    xcol = xcol.reshape(B, H * W, 9)

    hidden = prep["b3"].shape[1]
    out = _fused_pallas_call(B, H, W, hidden)(
        xcol, prep["w1"], prep["b1"], prep["w2"], prep["b2"],
        prep["w3"], prep["b3"], prep["w4"], prep["b4"])
    return out.reshape(B, OPAD)[:, :num_classes]


# ----------------------------- params & reference ---------------------------

def init_params(key, num_classes, hidden_units, spatial):
    feat = 64 * (spatial // 4) * (spatial // 4)
    ks = jax.random.split(key, 8)

    def rnd(k, shape, fan_in):
        return (jax.random.normal(k, shape, jnp.float32) /
                jnp.sqrt(fan_in)).astype(jnp.float32)

    return {
        "conv1_w": rnd(ks[0], (32, 1, 3, 3), 9.0),
        "conv1_b": 0.1 * rnd(ks[1], (32,), 1.0),
        "conv2_w": rnd(ks[2], (64, 32, 3, 3), 9.0 * 32),
        "conv2_b": 0.1 * rnd(ks[3], (64,), 1.0),
        "fc1_w": rnd(ks[4], (feat, hidden_units), float(feat)),   # stored (in, out)
        "fc1_b": 0.1 * rnd(ks[5], (hidden_units,), 1.0),
        "fc2_w": rnd(ks[6], (hidden_units, num_classes), float(hidden_units)),
        "fc2_b": 0.1 * rnd(ks[7], (num_classes,), 1.0),
    }


def reference_forward(x_nchw, params):
    """Pure-JAX reference mirroring the PyTorch module."""
    hi = jax.lax.Precision.HIGHEST

    def conv(x, w, b):
        y = jax.lax.conv_general_dilated(
            x, w, window_strides=(1, 1), padding=((1, 1), (1, 1)),
            dimension_numbers=("NCHW", "OIHW", "NCHW"), precision=hi)
        return jax.nn.relu(y + b[None, :, None, None])

    def pool(x):
        return jax.lax.reduce_window(x, -jnp.inf, jax.lax.max,
                                     (1, 1, 2, 2), (1, 1, 2, 2), "VALID")

    x = pool(conv(x_nchw, params["conv1_w"], params["conv1_b"]))
    x = pool(conv(x, params["conv2_w"], params["conv2_b"]))
    x = x.reshape(x.shape[0], -1)
    x = jax.nn.relu(jnp.dot(x, params["fc1_w"], precision=hi) + params["fc1_b"])
    x = jnp.dot(x, params["fc2_w"], precision=hi) + params["fc2_b"]
    return x


# --------------------------------- main --------------------------------------

if __name__ == "__main__":
    B, H, W = 2, 16, 16
    num_classes, hidden_units = 3, 256

    key = jax.random.PRNGKey(0)
    pkey, xkey = jax.random.split(key)
    params = init_params(pkey, num_classes, hidden_units, spatial=H)
    prep = prepare_params(params, hidden_units, num_classes, spatial=H)
    x = jax.random.normal(xkey, (B, 1, H, W), jnp.float32)   # NCHW, like PyTorch

    out = jax.block_until_ready(
        xray_classifier_forward(x, prep, num_classes=num_classes))
    ref = jax.block_until_ready(reference_forward(x, params))

    assert out.shape == (B, num_classes), out.shape
    err = float(jnp.max(jnp.abs(out - ref)))
    scale = max(1.0, float(jnp.max(jnp.abs(ref))))
    assert err <= 5e-2 * scale, f"max abs error {err} vs reference (scale {scale})"
    print("KERNEL_OK")
</pallas_src>

<mosaic_0001>
module attributes {stable_mosaic.version = 11 : i64} {
  func.func @_fused_forward_kernel(%arg0: i32, %arg1: memref<1x256x9xf32, #tpu.memory_space<vmem>>, %arg2: memref<9x32xf32, #tpu.memory_space<vmem>>, %arg3: memref<1x32xf32, #tpu.memory_space<vmem>>, %arg4: memref<288x64xbf16, #tpu.memory_space<vmem>>, %arg5: memref<1x64xf32, #tpu.memory_space<vmem>>, %arg6: memref<1024x256xbf16, #tpu.memory_space<vmem>>, %arg7: memref<1x256xf32, #tpu.memory_space<vmem>>, %arg8: memref<256x128xbf16, #tpu.memory_space<vmem>>, %arg9: memref<1x128xf32, #tpu.memory_space<vmem>>, %arg10: memref<1x1x128xf32, #tpu.memory_space<vmem>>, %arg11: memref<10x10x32xf32, #tpu.memory_space<vmem>>, %arg12: memref<8x16x32xf32, #tpu.memory_space<vmem>>, %arg13: memref<4x8x64xf32, #tpu.memory_space<vmem>>, %arg14: memref<64x288xbf16, #tpu.memory_space<vmem>>, %arg15: memref<1x1024xbf16, #tpu.memory_space<vmem>>) attributes {dimension_semantics = [#tpu.dimension_semantics<parallel>], iteration_bounds = array<i64: 2>, scalar_prefetch = 0 : i64, scratch_operands = 5 : i64, tpu.core_type = #tpu.core_type<tc>, window_params = [{transform_indices = @transform_0, window_bounds = array<i64: 1, 256, 9>}, {pipeline_mode = #tpu.pipeline_mode<synchronous>, transform_indices = @transform_1, window_bounds = array<i64: 9, 32>}, {pipeline_mode = #tpu.pipeline_mode<synchronous>, transform_indices = @transform_2, window_bounds = array<i64: 1, 32>}, {pipeline_mode = #tpu.pipeline_mode<synchronous>, transform_indices = @transform_3, window_bounds = array<i64: 288, 64>}, {pipeline_mode = #tpu.pipeline_mode<synchronous>, transform_indices = @transform_4, window_bounds = array<i64: 1, 64>}, {pipeline_mode = #tpu.pipeline_mode<synchronous>, transform_indices = @transform_5, window_bounds = array<i64: 1024, 256>}, {pipeline_mode = #tpu.pipeline_mode<synchronous>, transform_indices = @transform_6, window_bounds = array<i64: 1, 256>}, {pipeline_mode = #tpu.pipeline_mode<synchronous>, transform_indices = @transform_7, window_bounds = array<i64: 256, 128>}, {pipeline_mode = #tpu.pipeline_mode<synchronous>, transform_indices = @transform_8, window_bounds = array<i64: 1, 128>}, {transform_indices = @transform_9, window_bounds = array<i64: 1, 1, 128>}]} {
    %c0 = arith.constant 0 : index
    %c0_0 = arith.constant 0 : index
    %c0_1 = arith.constant 0 : index
    %0 = vector.load %arg1[%c0, %c0_0, %c0_1] : memref<1x256x9xf32, #tpu.memory_space<vmem>>, vector<1x256x9xf32>
    %1 = vector.shape_cast %0 : vector<1x256x9xf32> to vector<256x9xf32>
    %c0_2 = arith.constant 0 : index
    %c0_3 = arith.constant 0 : index
    %2 = vector.load %arg2[%c0_2, %c0_3] : memref<9x32xf32, #tpu.memory_space<vmem>>, vector<9x32xf32>
    %cst = arith.constant dense<0.000000e+00> : vector<256x32xf32>
    %3 = tpu.matmul %1, %2, %cst {dimension_numbers = #tpu.dot_dimension_numbers<[1], [0], [0], [1], [0, 0, 1, 1], [], []>} : vector<256x9xf32>, vector<9x32xf32>, vector<256x32xf32> -> vector<256x32xf32>
    %c0_4 = arith.constant 0 : index
    %c0_5 = arith.constant 0 : index
    %4 = vector.load %arg3[%c0_4, %c0_5] : memref<1x32xf32, #tpu.memory_space<vmem>>, vector<1x32xf32>
    %5 = vector.broadcast %4 : vector<1x32xf32> to vector<256x32xf32>
    %6 = arith.addf %3, %5 : vector<256x32xf32>
    %cst_6 = arith.constant 0.000000e+00 : f32
    %7 = vector.broadcast %cst_6 : f32 to vector<256x32xf32>
    %8 = arith.maximumf %6, %7 : vector<256x32xf32>
    %9 = vector.shape_cast %8 : vector<256x32xf32> to vector<8x2x16x32xf32>
    %10 = vector.extract_strided_slice %9 {offsets = [0, 0, 0, 0], sizes = [8, 1, 16, 32], strides = [1, 1, 1, 1]} : vector<8x2x16x32xf32> to vector<8x1x16x32xf32>
    %11 = vector.shape_cast %10 : vector<8x1x16x32xf32> to vector<8x16x32xf32>
    %12 = vector.extract_strided_slice %9 {offsets = [0, 1, 0, 0], sizes = [8, 1, 16, 32], strides = [1, 1, 1, 1]} : vector<8x2x16x32xf32> to vector<8x1x16x32xf32>
    %13 = vector.shape_cast %12 : vector<8x1x16x32xf32> to vector<8x16x32xf32>
    %14 = arith.maximumf %11, %13 : vector<8x16x32xf32>
    %c0_7 = arith.constant 0 : index
    %c0_8 = arith.constant 0 : index
    %c0_9 = arith.constant 0 : index
    %15 = vector.load %arg12[%c0_7, %c0_8, %c0_9] : memref<8x16x32xf32, #tpu.memory_space<vmem>>, vector<8x16x32xf32>
    tpu.vector_store %arg12[%c0_7, %c0_8, %c0_9], %14 {strides = array<i32>} : memref<8x16x32xf32, #tpu.memory_space<vmem>>, vector<8x16x32xf32>,
    %c0_10 = arith.constant 0 : index
    %c0_11 = arith.constant 0 : index
    %c0_12 = arith.constant 0 : index
    %16 = tpu.strided_load %arg12[%c0_10, %c0_11, %c0_12] {strides = array<i32: 1, 2, 1>} : memref<8x16x32xf32, #tpu.memory_space<vmem>>, vector<8x8x32xf32>
    %c0_13 = arith.constant 0 : index
    %c1 = arith.constant 1 : index
    %c0_14 = arith.constant 0 : index
    %17 = tpu.strided_load %arg12[%c0_13, %c1, %c0_14] {strides = array<i32: 1, 2, 1>} : memref<8x16x32xf32, #tpu.memory_space<vmem>>, vector<8x8x32xf32>
    %18 = arith.maximumf %16, %17 : vector<8x8x32xf32>
    %cst_15 = arith.constant 0.000000e+00 : f32
    %19 = vector.broadcast %cst_15 : f32 to vector<10x32xf32>
    %c0_16 = arith.constant 0 : index
    %c0_17 = arith.constant 0 : index
    %c0_18 = arith.constant 0 : index
    %20 = vector.load %arg11[%c0_16, %c0_17, %c0_18] : memref<10x10x32xf32, #tpu.memory_space<vmem>>, vector<1x10x32xf32>
    %21 = vector.shape_cast %20 : vector<1x10x32xf32> to vector<10x32xf32>
    %22 = vector.shape_cast %19 : vector<10x32xf32> to vector<1x10x32xf32>
    tpu.vector_store %arg11[%c0_16, %c0_17, %c0_18], %22 {strides = array<i32>} : memref<10x10x32xf32, #tpu.memory_space<vmem>>, vector<1x10x32xf32>,
    %cst_19 = arith.constant 0.000000e+00 : f32
    %23 = vector.broadcast %cst_19 : f32 to vector<10x32xf32>
    %c9 = arith.constant 9 : index
    %c0_20 = arith.constant 0 : index
    %c0_21 = arith.constant 0 : index
    %24 = vector.load %arg11[%c9, %c0_20, %c0_21] : memref<10x10x32xf32, #tpu.memory_space<vmem>>, vector<1x10x32xf32>
    %25 = vector.shape_cast %24 : vector<1x10x32xf32> to vector<10x32xf32>
    %26 = vector.shape_cast %23 : vector<10x32xf32> to vector<1x10x32xf32>
    tpu.vector_store %arg11[%c9, %c0_20, %c0_21], %26 {strides = array<i32>} : memref<10x10x32xf32, #tpu.memory_space<vmem>>, vector<1x10x32xf32>,
    %cst_22 = arith.constant 0.000000e+00 : f32
    %27 = vector.broadcast %cst_22 : f32 to vector<10x32xf32>
    %c0_23 = arith.constant 0 : index
    %c0_24 = arith.constant 0 : index
    %c0_25 = arith.constant 0 : index
    %28 = vector.load %arg11[%c0_23, %c0_24, %c0_25] : memref<10x10x32xf32, #tpu.memory_space<vmem>>, vector<10x1x32xf32>
    %29 = vector.shape_cast %28 : vector<10x1x32xf32> to vector<10x32xf32>
    %30 = vector.shape_cast %27 : vector<10x32xf32> to vector<10x1x32xf32>
    tpu.vector_store %arg11[%c0_23, %c0_24, %c0_25], %30 {strides = array<i32>} : memref<10x10x32xf32, #tpu.memory_space<vmem>>, vector<10x1x32xf32>,
    %cst_26 = arith.constant 0.000000e+00 : f32
    %31 = vector.broadcast %cst_26 : f32 to vector<10x32xf32>
    %c0_27 = arith.constant 0 : index
    %c9_28 = arith.constant 9 : index
    %c0_29 = arith.constant 0 : index
    %32 = vector.load %arg11[%c0_27, %c9_28, %c0_29] : memref<10x10x32xf32, #tpu.memory_space<vmem>>, vector<10x1x32xf32>
    %33 = vector.shape_cast %32 : vector<10x1x32xf32> to vector<10x32xf32>
    %34 = vector.shape_cast %31 : vector<10x32xf32> to vector<10x1x32xf32>
    tpu.vector_store %arg11[%c0_27, %c9_28, %c0_29], %34 {strides = array<i32>} : memref<10x10x32xf32, #tpu.memory_space<vmem>>, vector<10x1x32xf32>,
    %c1_30 = arith.constant 1 : index
    %c1_31 = arith.constant 1 : index
    %c0_32 = arith.constant 0 : index
    %35 = vector.load %arg11[%c1_30, %c1_31, %c0_32] : memref<10x10x32xf32, #tpu.memory_space<vmem>>, vector<8x8x32xf32>
    tpu.vector_store %arg11[%c1_30, %c1_31, %c0_32], %18 {strides = array<i32>} : memref<10x10x32xf32, #tpu.memory_space<vmem>>, vector<8x8x32xf32>,
    %c0_33 = arith.constant 0 : index
    %c0_34 = arith.constant 0 : index
    %c0_35 = arith.constant 0 : index
    %36 = vector.load %arg11[%c0_33, %c0_34, %c0_35] : memref<10x10x32xf32, #tpu.memory_space<vmem>>, vector<8x8x32xf32>
    %37 = vector.shape_cast %36 : vector<8x8x32xf32> to vector<64x32xf32>
    %38 = arith.truncf %37 : vector<64x32xf32> to vector<64x32xbf16>
    %c0_36 = arith.constant 0 : index
    %c0_37 = arith.constant 0 : index
    %39 = vector.load %arg14[%c0_36, %c0_37] : memref<64x288xbf16, #tpu.memory_space<vmem>>, vector<64x32xbf16>
    tpu.vector_store %arg14[%c0_36, %c0_37], %38 {strides = array<i32>} : memref<64x288xbf16, #tpu.memory_space<vmem>>, vector<64x32xbf16>,
    %c0_38 = arith.constant 0 : index
    %c1_39 = arith.constant 1 : index
    %c0_40 = arith.constant 0 : index
    %40 = vector.load %arg11[%c0_38, %c1_39, %c0_40] : memref<10x10x32xf32, #tpu.memory_space<vmem>>, vector<8x8x32xf32>
    %41 = vector.shape_cast %40 : vector<8x8x32xf32> to vector<64x32xf32>
    %42 = arith.truncf %41 : vector<64x32xf32> to vector<64x32xbf16>
    %c0_41 = arith.constant 0 : index
    %c32 = arith.constant 32 : index
    %43 = vector.load %arg14[%c0_41, %c32] : memref<64x288xbf16, #tpu.memory_space<vmem>>, vector<64x32xbf16>
    tpu.vector_store %arg14[%c0_41, %c32], %42 {strides = array<i32>} : memref<64x288xbf16, #tpu.memory_space<vmem>>, vector<64x32xbf16>,
    %c0_42 = arith.constant 0 : index
    %c2 = arith.constant 2 : index
    %c0_43 = arith.constant 0 : index
    %44 = vector.load %arg11[%c0_42, %c2, %c0_43] : memref<10x10x32xf32, #tpu.memory_space<vmem>>, vector<8x8x32xf32>
    %45 = vector.shape_cast %44 : vector<8x8x32xf32> to vector<64x32xf32>
    %46 = arith.truncf %45 : vector<64x32xf32> to vector<64x32xbf16>
    %c0_44 = arith.constant 0 : index
    %c64 = arith.constant 64 : index
    %47 = vector.load %arg14[%c0_44, %c64] : memref<64x288xbf16, #tpu.memory_space<vmem>>, vector<64x32xbf16>
    tpu.vector_store %arg14[%c0_44, %c64], %46 {strides = array<i32>} : memref<64x288xbf16, #tpu.memory_space<vmem>>, vector<64x32xbf16>,
    %c1_45 = arith.constant 1 : index
    %c0_46 = arith.constant 0 : index
    %c0_47 = arith.constant 0 : index
    %48 = vector.load %arg11[%c1_45, %c0_46, %c0_47] : memref<10x10x32xf32, #tpu.memory_space<vmem>>, vector<8x8x32xf32>
    %49 = vector.shape_cast %48 : vector<8x8x32xf32> to vector<64x32xf32>
    %50 = arith.truncf %49 : vector<64x32xf32> to vector<64x32xbf16>
    %c0_48 = arith.constant 0 : index
    %c96 = arith.constant 96 : index
    %51 = vector.load %arg14[%c0_48, %c96] : memref<64x288xbf16, #tpu.memory_space<vmem>>, vector<64x32xbf16>
    tpu.vector_store %arg14[%c0_48, %c96], %50 {strides = array<i32>} : memref<64x288xbf16, #tpu.memory_space<vmem>>, vector<64x32xbf16>,
    %c1_49 = arith.constant 1 : index
    %c1_50 = arith.constant 1 : index
    %c0_51 = arith.constant 0 : index
    %52 = vector.load %arg11[%c1_49, %c1_50, %c0_51] : memref<10x10x32xf32, #tpu.memory_space<vmem>>, vector<8x8x32xf32>
    %53 = vector.shape_cast %52 : vector<8x8x32xf32> to vector<64x32xf32>
    %54 = arith.truncf %53 : vector<64x32xf32> to vector<64x32xbf16>
    %c0_52 = arith.constant 0 : index
    %c128 = arith.constant 128 : index
    %55 = vector.load %arg14[%c0_52, %c128] : memref<64x288xbf16, #tpu.memory_space<vmem>>, vector<64x32xbf16>
    tpu.vector_store %arg14[%c0_52, %c128], %54 {strides = array<i32>} : memref<64x288xbf16, #tpu.memory_space<vmem>>, vector<64x32xbf16>,
    %c1_53 = arith.constant 1 : index
    %c2_54 = arith.constant 2 : index
    %c0_55 = arith.constant 0 : index
    %56 = vector.load %arg11[%c1_53, %c2_54, %c0_55] : memref<10x10x32xf32, #tpu.memory_space<vmem>>, vector<8x8x32xf32>
    %57 = vector.shape_cast %56 : vector<8x8x32xf32> to vector<64x32xf32>
    %58 = arith.truncf %57 : vector<64x32xf32> to vector<64x32xbf16>
    %c0_56 = arith.constant 0 : index
    %c160 = arith.constant 160 : index
    %59 = vector.load %arg14[%c0_56, %c160] : memref<64x288xbf16, #tpu.memory_space<vmem>>, vector<64x32xbf16>
    tpu.vector_store %arg14[%c0_56, %c160], %58 {strides = array<i32>} : memref<64x288xbf16, #tpu.memory_space<vmem>>, vector<64x32xbf16>,
    %c2_57 = arith.constant 2 : index
    %c0_58 = arith.constant 0 : index
    %c0_59 = arith.constant 0 : index
    %60 = vector.load %arg11[%c2_57, %c0_58, %c0_59] : memref<10x10x32xf32, #tpu.memory_space<vmem>>, vector<8x8x32xf32>
    %61 = vector.shape_cast %60 : vector<8x8x32xf32> to vector<64x32xf32>
    %62 = arith.truncf %61 : vector<64x32xf32> to vector<64x32xbf16>
    %c0_60 = arith.constant 0 : index
    %c192 = arith.constant 192 : index
    %63 = vector.load %arg14[%c0_60, %c192] : memref<64x288xbf16, #tpu.memory_space<vmem>>, vector<64x32xbf16>
    tpu.vector_store %arg14[%c0_60, %c192], %62 {strides = array<i32>} : memref<64x288xbf16, #tpu.memory_space<vmem>>, vector<64x32xbf16>,
    %c2_61 = arith.constant 2 : index
    %c1_62 = arith.constant 1 : index
    %c0_63 = arith.constant 0 : index
    %64 = vector.load %arg11[%c2_61, %c1_62, %c0_63] : memref<10x10x32xf32, #tpu.memory_space<vmem>>, vector<8x8x32xf32>
    %65 = vector.shape_cast %64 : vector<8x8x32xf32> to vector<64x32xf32>
    %66 = arith.truncf %65 : vector<64x32xf32> to vector<64x32xbf16>
    %c0_64 = arith.constant 0 : index
    %c224 = arith.constant 224 : index
    %67 = vector.load %arg14[%c0_64, %c224] : memref<64x288xbf16, #tpu.memory_space<vmem>>, vector<64x32xbf16>
    tpu.vector_store %arg14[%c0_64, %c224], %66 {strides = array<i32>} : memref<64x288xbf16, #tpu.memory_space<vmem>>, vector<64x32xbf16>,
    %c2_65 = arith.constant 2 : index
    %c2_66 = arith.constant 2 : index
    %c0_67 = arith.constant 0 : index
    %68 = vector.load %arg11[%c2_65, %c2_66, %c0_67] : memref<10x10x32xf32, #tpu.memory_space<vmem>>, vector<8x8x32xf32>
    %69 = vector.shape_cast %68 : vector<8x8x32xf32> to vector<64x32xf32>
    %70 = arith.truncf %69 : vector<64x32xf32> to vector<64x32xbf16>
    %c0_68 = arith.constant 0 : index
    %c256 = arith.constant 256 : index
    %71 = vector.load %arg14[%c0_68, %c256] : memref<64x288xbf16, #tpu.memory_space<vmem>>, vector<64x32xbf16>
    tpu.vector_store %arg14[%c0_68, %c256], %70 {strides = array<i32>} : memref<64x288xbf16, #tpu.memory_space<vmem>>, vector<64x32xbf16>,
    %c0_69 = arith.constant 0 : index
    %c0_70 = arith.constant 0 : index
    %72 = vector.load %arg14[%c0_69, %c0_70] : memref<64x288xbf16, #tpu.memory_space<vmem>>, vector<64x288xbf16>
    %c0_71 = arith.constant 0 : index
    %c0_72 = arith.constant 0 : index
    %73 = vector.load %arg4[%c0_71, %c0_72] : memref<288x64xbf16, #tpu.memory_space<vmem>>, vector<288x64xbf16>
    %cst_73 = arith.constant dense<0.000000e+00> : vector<64x64xf32>
    %74 = tpu.matmul %72, %73, %cst_73 {dimension_numbers = #tpu.dot_dimension_numbers<[1], [0], [0], [1], [0, 0, 1, 1], [], []>} : vector<64x288xbf16>, vector<288x64xbf16>, vector<64x64xf32> -> vector<64x64xf32>
    %c0_74 = arith.constant 0 : index
    %c0_75 = arith.constant 0 : index
    %75 = vector.load %arg5[%c0_74, %c0_75] : memref<1x64xf32, #tpu.memory_space<vmem>>, vector<1x64xf32>
    %76 = vector.broadcast %75 : vector<1x64xf32> to vector<64x64xf32>
    %77 = arith.addf %74, %76 : vector<64x64xf32>
    %cst_76 = arith.constant 0.000000e+00 : f32
    %78 = vector.broadcast %cst_76 : f32 to vector<64x64xf32>
    %79 = arith.maximumf %77, %78 : vector<64x64xf32>
    %80 = vector.shape_cast %79 : vector<64x64xf32> to vector<4x2x8x64xf32>
    %81 = vector.extract_strided_slice %80 {offsets = [0, 0, 0, 0], sizes = [4, 1, 8, 64], strides = [1, 1, 1, 1]} : vector<4x2x8x64xf32> to vector<4x1x8x64xf32>
    %82 = vector.shape_cast %81 : vector<4x1x8x64xf32> to vector<4x8x64xf32>
    %83 = vector.extract_strided_slice %80 {offsets = [0, 1, 0, 0], sizes = [4, 1, 8, 64], strides = [1, 1, 1, 1]} : vector<4x2x8x64xf32> to vector<4x1x8x64xf32>
    %84 = vector.shape_cast %83 : vector<4x1x8x64xf32> to vector<4x8x64xf32>
    %85 = arith.maximumf %82, %84 : vector<4x8x64xf32>
    %c0_77 = arith.constant 0 : index
    %c0_78 = arith.constant 0 : index
    %c0_79 = arith.constant 0 : index
    %86 = vector.load %arg13[%c0_77, %c0_78, %c0_79] : memref<4x8x64xf32, #tpu.memory_space<vmem>>, vector<4x8x64xf32>
    tpu.vector_store %arg13[%c0_77, %c0_78, %c0_79], %85 {strides = array<i32>} : memref<4x8x64xf32, #tpu.memory_space<vmem>>, vector<4x8x64xf32>,
    %c0_80 = arith.constant 0 : index
    %c0_81 = arith.constant 0 : index
    %c0_82 = arith.constant 0 : index
    %87 = tpu.strided_load %arg13[%c0_80, %c0_81, %c0_82] {strides = array<i32: 1, 2, 1>} : memref<4x8x64xf32, #tpu.memory_space<vmem>>, vector<4x4x64xf32>
    %c0_83 = arith.constant 0 : index
    %c1_84 = arith.constant 1 : index
    %c0_85 = arith.constant 0 : index
    %88 = tpu.strided_load %arg13[%c0_83, %c1_84, %c0_85] {strides = array<i32: 1, 2, 1>} : memref<4x8x64xf32, #tpu.memory_space<vmem>>, vector<4x4x64xf32>
    %89 = arith.maximumf %87, %88 : vector<4x4x64xf32>
    %90 = vector.extract_strided_slice %89 {offsets = [0, 0, 0], sizes = [1, 1, 64], strides = [1, 1, 1]} : vector<4x4x64xf32> to vector<1x1x64xf32>
    %91 = vector.shape_cast %90 : vector<1x1x64xf32> to vector<1x64xf32>
    %92 = arith.truncf %91 : vector<1x64xf32> to vector<1x64xbf16>
    %c0_86 = arith.constant 0 : index
    %c0_87 = arith.constant 0 : index
    %93 = vector.load %arg15[%c0_86, %c0_87] : memref<1x1024xbf16, #tpu.memory_space<vmem>>, vector<1x64xbf16>
    tpu.vector_store %arg15[%c0_86, %c0_87], %92 {strides = array<i32>} : memref<1x1024xbf16, #tpu.memory_space<vmem>>, vector<1x64xbf16>,
    %94 = vector.extract_strided_slice %89 {offsets = [0, 1, 0], sizes = [1, 1, 64], strides = [1, 1, 1]} : vector<4x4x64xf32> to vector<1x1x64xf32>
    %95 = vector.shape_cast %94 : vector<1x1x64xf32> to vector<1x64xf32>
    %96 = arith.truncf %95 : vector<1x64xf32> to vector<1x64xbf16>
    %c0_88 = arith.constant 0 : index
    %c64_89 = arith.constant 64 : index
    %97 = vector.load %arg15[%c0_88, %c64_89] : memref<1x1024xbf16, #tpu.memory_space<vmem>>, vector<1x64xbf16>
    tpu.vector_store %arg15[%c0_88, %c64_89], %96 {strides = array<i32>} : memref<1x1024xbf16, #tpu.memory_space<vmem>>, vector<1x64xbf16>,
    %98 = vector.extract_strided_slice %89 {offsets = [0, 2, 0], sizes = [1, 1, 64], strides = [1, 1, 1]} : vector<4x4x64xf32> to vector<1x1x64xf32>
    %99 = vector.shape_cast %98 : vector<1x1x64xf32> to vector<1x64xf32>
    %100 = arith.truncf %99 : vector<1x64xf32> to vector<1x64xbf16>
    %c0_90 = arith.constant 0 : index
    %c128_91 = arith.constant 128 : index
    %101 = vector.load %arg15[%c0_90, %c128_91] : memref<1x1024xbf16, #tpu.memory_space<vmem>>, vector<1x64xbf16>
    tpu.vector_store %arg15[%c0_90, %c128_91], %100 {strides = array<i32>} : memref<1x1024xbf16, #tpu.memory_space<vmem>>, vector<1x64xbf16>,
    %102 = vector.extract_strided_slice %89 {offsets = [0, 3, 0], sizes = [1, 1, 64], strides = [1, 1, 1]} : vector<4x4x64xf32> to vector<1x1x64xf32>
    %103 = vector.shape_cast %102 : vector<1x1x64xf32> to vector<1x64xf32>
    %104 = arith.truncf %103 : vector<1x64xf32> to vector<1x64xbf16>
    %c0_92 = arith.constant 0 : index
    %c192_93 = arith.constant 192 : index
    %105 = vector.load %arg15[%c0_92, %c192_93] : memref<1x1024xbf16, #tpu.memory_space<vmem>>, vector<1x64xbf16>
    tpu.vector_store %arg15[%c0_92, %c192_93], %104 {strides = array<i32>} : memref<1x1024xbf16, #tpu.memory_space<vmem>>, vector<1x64xbf16>,
    %106 = vector.extract_strided_slice %89 {offsets = [1, 0, 0], sizes = [1, 1, 64], strides = [1, 1, 1]} : vector<4x4x64xf32> to vector<1x1x64xf32>
    %107 = vector.shape_cast %106 : vector<1x1x64xf32> to vector<1x64xf32>
    %108 = arith.truncf %107 : vector<1x64xf32> to vector<1x64xbf16>
    %c0_94 = arith.constant 0 : index
    %c256_95 = arith.constant 256 : index
    %109 = vector.load %arg15[%c0_94, %c256_95] : memref<1x1024xbf16, #tpu.memory_space<vmem>>, vector<1x64xbf16>
    tpu.vector_store %arg15[%c0_94, %c256_95], %108 {strides = array<i32>} : memref<1x1024xbf16, #tpu.memory_space<vmem>>, vector<1x64xbf16>,
    %110 = vector.extract_strided_slice %89 {offsets = [1, 1, 0], sizes = [1, 1, 64], strides = [1, 1, 1]} : vector<4x4x64xf32> to vector<1x1x64xf32>
    %111 = vector.shape_cast %110 : vector<1x1x64xf32> to vector<1x64xf32>
    %112 = arith.truncf %111 : vector<1x64xf32> to vector<1x64xbf16>
    %c0_96 = arith.constant 0 : index
    %c320 = arith.constant 320 : index
    %113 = vector.load %arg15[%c0_96, %c320] : memref<1x1024xbf16, #tpu.memory_space<vmem>>, vector<1x64xbf16>
    tpu.vector_store %arg15[%c0_96, %c320], %112 {strides = array<i32>} : memref<1x1024xbf16, #tpu.memory_space<vmem>>, vector<1x64xbf16>,
    %114 = vector.extract_strided_slice %89 {offsets = [1, 2, 0], sizes = [1, 1, 64], strides = [1, 1, 1]} : vector<4x4x64xf32> to vector<1x1x64xf32>
    %115 = vector.shape_cast %114 : vector<1x1x64xf32> to vector<1x64xf32>
    %116 = arith.truncf %115 : vector<1x64xf32> to vector<1x64xbf16>
    %c0_97 = arith.constant 0 : index
    %c384 = arith.constant 384 : index
    %117 = vector.load %arg15[%c0_97, %c384] : memref<1x1024xbf16, #tpu.memory_space<vmem>>, vector<1x64xbf16>
    tpu.vector_store %arg15[%c0_97, %c384], %116 {strides = array<i32>} : memref<1x1024xbf16, #tpu.memory_space<vmem>>, vector<1x64xbf16>,
    %118 = vector.extract_strided_slice %89 {offsets = [1, 3, 0], sizes = [1, 1, 64], strides = [1, 1, 1]} : vector<4x4x64xf32> to vector<1x1x64xf32>
    %119 = vector.shape_cast %118 : vector<1x1x64xf32> to vector<1x64xf32>
    %120 = arith.truncf %119 : vector<1x64xf32> to vector<1x64xbf16>
    %c0_98 = arith.constant 0 : index
    %c448 = arith.constant 448 : index
    %121 = vector.load %arg15[%c0_98, %c448] : memref<1x1024xbf16, #tpu.memory_space<vmem>>, vector<1x64xbf16>
    tpu.vector_store %arg15[%c0_98, %c448], %120 {strides = array<i32>} : memref<1x1024xbf16, #tpu.memory_space<vmem>>, vector<1x64xbf16>,
    %122 = vector.extract_strided_slice %89 {offsets = [2, 0, 0], sizes = [1, 1, 64], strides = [1, 1, 1]} : vector<4x4x64xf32> to vector<1x1x64xf32>
    %123 = vector.shape_cast %122 : vector<1x1x64xf32> to vector<1x64xf32>
    %124 = arith.truncf %123 : vector<1x64xf32> to vector<1x64xbf16>
    %c0_99 = arith.constant 0 : index
    %c512 = arith.constant 512 : index
    %125 = vector.load %arg15[%c0_99, %c512] : memref<1x1024xbf16, #tpu.memory_space<vmem>>, vector<1x64xbf16>
    tpu.vector_store %arg15[%c0_99, %c512], %124 {strides = array<i32>} : memref<1x1024xbf16, #tpu.memory_space<vmem>>, vector<1x64xbf16>,
    %126 = vector.extract_strided_slice %89 {offsets = [2, 1, 0], sizes = [1, 1, 64], strides = [1, 1, 1]} : vector<4x4x64xf32> to vector<1x1x64xf32>
    %127 = vector.shape_cast %126 : vector<1x1x64xf32> to vector<1x64xf32>
    %128 = arith.truncf %127 : vector<1x64xf32> to vector<1x64xbf16>
    %c0_100 = arith.constant 0 : index
    %c576 = arith.constant 576 : index
    %129 = vector.load %arg15[%c0_100, %c576] : memref<1x1024xbf16, #tpu.memory_space<vmem>>, vector<1x64xbf16>
    tpu.vector_store %arg15[%c0_100, %c576], %128 {strides = array<i32>} : memref<1x1024xbf16, #tpu.memory_space<vmem>>, vector<1x64xbf16>,
    %130 = vector.extract_strided_slice %89 {offsets = [2, 2, 0], sizes = [1, 1, 64], strides = [1, 1, 1]} : vector<4x4x64xf32> to vector<1x1x64xf32>
    %131 = vector.shape_cast %130 : vector<1x1x64xf32> to vector<1x64xf32>
    %132 = arith.truncf %131 : vector<1x64xf32> to vector<1x64xbf16>
    %c0_101 = arith.constant 0 : index
    %c640 = arith.constant 640 : index
    %133 = vector.load %arg15[%c0_101, %c640] : memref<1x1024xbf16, #tpu.memory_space<vmem>>, vector<1x64xbf16>
    tpu.vector_store %arg15[%c0_101, %c640], %132 {strides = array<i32>} : memref<1x1024xbf16, #tpu.memory_space<vmem>>, vector<1x64xbf16>,
    %134 = vector.extract_strided_slice %89 {offsets = [2, 3, 0], sizes = [1, 1, 64], strides = [1, 1, 1]} : vector<4x4x64xf32> to vector<1x1x64xf32>
    %135 = vector.shape_cast %134 : vector<1x1x64xf32> to vector<1x64xf32>
    %136 = arith.truncf %135 : vector<1x64xf32> to vector<1x64xbf16>
    %c0_102 = arith.constant 0 : index
    %c704 = arith.constant 704 : index
    %137 = vector.load %arg15[%c0_102, %c704] : memref<1x1024xbf16, #tpu.memory_space<vmem>>, vector<1x64xbf16>
    tpu.vector_store %arg15[%c0_102, %c704], %136 {strides = array<i32>} : memref<1x1024xbf16, #tpu.memory_space<vmem>>, vector<1x64xbf16>,
    %138 = vector.extract_strided_slice %89 {offsets = [3, 0, 0], sizes = [1, 1, 64], strides = [1, 1, 1]} : vector<4x4x64xf32> to vector<1x1x64xf32>
    %139 = vector.shape_cast %138 : vector<1x1x64xf32> to vector<1x64xf32>
    %140 = arith.truncf %139 : vector<1x64xf32> to vector<1x64xbf16>
    %c0_103 = arith.constant 0 : index
    %c768 = arith.constant 768 : index
    %141 = vector.load %arg15[%c0_103, %c768] : memref<1x1024xbf16, #tpu.memory_space<vmem>>, vector<1x64xbf16>
    tpu.vector_store %arg15[%c0_103, %c768], %140 {strides = array<i32>} : memref<1x1024xbf16, #tpu.memory_space<vmem>>, vector<1x64xbf16>,
    %142 = vector.extract_strided_slice %89 {offsets = [3, 1, 0], sizes = [1, 1, 64], strides = [1, 1, 1]} : vector<4x4x64xf32> to vector<1x1x64xf32>
    %143 = vector.shape_cast %142 : vector<1x1x64xf32> to vector<1x64xf32>
    %144 = arith.truncf %143 : vector<1x64xf32> to vector<1x64xbf16>
    %c0_104 = arith.constant 0 : index
    %c832 = arith.constant 832 : index
    %145 = vector.load %arg15[%c0_104, %c832] : memref<1x1024xbf16, #tpu.memory_space<vmem>>, vector<1x64xbf16>
    tpu.vector_store %arg15[%c0_104, %c832], %144 {strides = array<i32>} : memref<1x1024xbf16, #tpu.memory_space<vmem>>, vector<1x64xbf16>,
    %146 = vector.extract_strided_slice %89 {offsets = [3, 2, 0], sizes = [1, 1, 64], strides = [1, 1, 1]} : vector<4x4x64xf32> to vector<1x1x64xf32>
    %147 = vector.shape_cast %146 : vector<1x1x64xf32> to vector<1x64xf32>
    %148 = arith.truncf %147 : vector<1x64xf32> to vector<1x64xbf16>
    %c0_105 = arith.constant 0 : index
    %c896 = arith.constant 896 : index
    %149 = vector.load %arg15[%c0_105, %c896] : memref<1x1024xbf16, #tpu.memory_space<vmem>>, vector<1x64xbf16>
    tpu.vector_store %arg15[%c0_105, %c896], %148 {strides = array<i32>} : memref<1x1024xbf16, #tpu.memory_space<vmem>>, vector<1x64xbf16>,
    %150 = vector.extract_strided_slice %89 {offsets = [3, 3, 0], sizes = [1, 1, 64], strides = [1, 1, 1]} : vector<4x4x64xf32> to vector<1x1x64xf32>
    %151 = vector.shape_cast %150 : vector<1x1x64xf32> to vector<1x64xf32>
    %152 = arith.truncf %151 : vector<1x64xf32> to vector<1x64xbf16>
    %c0_106 = arith.constant 0 : index
    %c960 = arith.constant 960 : index
    %153 = vector.load %arg15[%c0_106, %c960] : memref<1x1024xbf16, #tpu.memory_space<vmem>>, vector<1x64xbf16>
    tpu.vector_store %arg15[%c0_106, %c960], %152 {strides = array<i32>} : memref<1x1024xbf16, #tpu.memory_space<vmem>>, vector<1x64xbf16>,
    %c0_107 = arith.constant 0 : index
    %c0_108 = arith.constant 0 : index
    %154 = vector.load %arg15[%c0_107, %c0_108] : memref<1x1024xbf16, #tpu.memory_space<vmem>>, vector<1x1024xbf16>
    %c0_109 = arith.constant 0 : index
    %c0_110 = arith.constant 0 : index
    %155 = vector.load %arg6[%c0_109, %c0_110] : memref<1024x256xbf16, #tpu.memory_space<vmem>>, vector<1024x256xbf16>
    %cst_111 = arith.constant dense<0.000000e+00> : vector<1x256xf32>
    %156 = tpu.matmul %154, %155, %cst_111 {dimension_numbers = #tpu.dot_dimension_numbers<[1], [0], [0], [1], [0, 0, 1, 1], [], []>} : vector<1x1024xbf16>, vector<1024x256xbf16>, vector<1x256xf32> -> vector<1x256xf32>
    %c0_112 = arith.constant 0 : index
    %c0_113 = arith.constant 0 : index
    %157 = vector.load %arg7[%c0_112, %c0_113] : memref<1x256xf32, #tpu.memory_space<vmem>>, vector<1x256xf32>
    %158 = arith.addf %156, %157 : vector<1x256xf32>
    %cst_114 = arith.constant 0.000000e+00 : f32
    %159 = vector.broadcast %cst_114 : f32 to vector<1x256xf32>
    %160 = arith.maximumf %158, %159 : vector<1x256xf32>
    %161 = arith.truncf %160 : vector<1x256xf32> to vector<1x256xbf16>
    %c0_115 = arith.constant 0 : index
    %c0_116 = arith.constant 0 : index
    %162 = vector.load %arg8[%c0_115, %c0_116] : memref<256x128xbf16, #tpu.memory_space<vmem>>, vector<256x128xbf16>
    %cst_117 = arith.constant dense<0.000000e+00> : vector<1x128xf32>
    %163 = tpu.matmul %161, %162, %cst_117 {dimension_numbers = #tpu.dot_dimension_numbers<[1], [0], [0], [1], [0, 0, 1, 1], [], []>} : vector<1x256xbf16>, vector<256x128xbf16>, vector<1x128xf32> -> vector<1x128xf32>
    %c0_118 = arith.constant 0 : index
    %c0_119 = arith.constant 0 : index
    %164 = vector.load %arg9[%c0_118, %c0_119] : memref<1x128xf32, #tpu.memory_space<vmem>>, vector<1x128xf32>
    %165 = arith.addf %163, %164 : vector<1x128xf32>
    %c0_120 = arith.constant 0 : index
    %c0_121 = arith.constant 0 : index
    %c0_122 = arith.constant 0 : index
    %166 = vector.load %arg10[%c0_120, %c0_121, %c0_122] : memref<1x1x128xf32, #tpu.memory_space<vmem>>, vector<1x1x128xf32>
    %167 = vector.shape_cast %166 : vector<1x1x128xf32> to vector<1x128xf32>
    %168 = vector.shape_cast %165 : vector<1x128xf32> to vector<1x1x128xf32>
    tpu.vector_store %arg10[%c0_120, %c0_121, %c0_122], %168 {strides = array<i32>} : memref<1x1x128xf32, #tpu.memory_space<vmem>>, vector<1x1x128xf32>,
    return
  }
  func.func @transform_0(%arg0: i32) -> (i32, i32, i32) {
    %c0_i32 = arith.constant 0 : i32
    %c0_i32_0 = arith.constant 0 : i32
    %c0_i32_1 = arith.constant 0 : i32
    return %arg0, %c0_i32, %c0_i32_0 : i32, i32, i32
  }
  func.func @transform_1(%arg0: i32) -> (i32, i32) {
    %c0_i32 = arith.constant 0 : i32
    %c0_i32_0 = arith.constant 0 : i32
    %c0_i32_1 = arith.constant 0 : i32
    return %c0_i32, %c0_i32_0 : i32, i32
  }
  func.func @transform_2(%arg0: i32) -> (i32, i32) {
    %c0_i32 = arith.constant 0 : i32
    %c0_i32_0 = arith.constant 0 : i32
    %c0_i32_1 = arith.constant 0 : i32
    return %c0_i32, %c0_i32_0 : i32, i32
  }
  func.func @transform_3(%arg0: i32) -> (i32, i32) {
    %c0_i32 = arith.constant 0 : i32
    %c0_i32_0 = arith.constant 0 : i32
    %c0_i32_1 = arith.constant 0 : i32
    return %c0_i32, %c0_i32_0 : i32, i32
  }
  func.func @transform_4(%arg0: i32) -> (i32, i32) {
    %c0_i32 = arith.constant 0 : i32
    %c0_i32_0 = arith.constant 0 : i32
    %c0_i32_1 = arith.constant 0 : i32
    return %c0_i32, %c0_i32_0 : i32, i32
  }
  func.func @transform_5(%arg0: i32) -> (i32, i32) {
    %c0_i32 = arith.constant 0 : i32
    %c0_i32_0 = arith.constant 0 : i32
    %c0_i32_1 = arith.constant 0 : i32
    return %c0_i32, %c0_i32_0 : i32, i32
  }
  func.func @transform_6(%arg0: i32) -> (i32, i32) {
    %c0_i32 = arith.constant 0 : i32
    %c0_i32_0 = arith.constant 0 : i32
    %c0_i32_1 = arith.constant 0 : i32
    return %c0_i32, %c0_i32_0 : i32, i32
  }
  func.func @transform_7(%arg0: i32) -> (i32, i32) {
    %c0_i32 = arith.constant 0 : i32
    %c0_i32_0 = arith.constant 0 : i32
    %c0_i32_1 = arith.constant 0 : i32
    return %c0_i32, %c0_i32_0 : i32, i32
  }
  func.func @transform_8(%arg0: i32) -> (i32, i32) {
    %c0_i32 = arith.constant 0 : i32
    %c0_i32_0 = arith.constant 0 : i32
    %c0_i32_1 = arith.constant 0 : i32
    return %c0_i32, %c0_i32_0 : i32, i32
  }
  func.func @transform_9(%arg0: i32) -> (i32, i32, i32) {
    %c0_i32 = arith.constant 0 : i32
    %c0_i32_0 = arith.constant 0 : i32
    %c0_i32_1 = arith.constant 0 : i32
    return %arg0, %c0_i32, %c0_i32_0 : i32, i32, i32
  }
}

</mosaic_0001>

<bundles_post_ra>
// kernel: xray_classifier_forward.1
= control target key start
LH: loop header
LB: loop body
LE: loop exit
PB: predicated region body
PF: predicated region fallthrough
CT: control target
= control target key end

     0   :  { %14 = vsyncpa [#allocation8], 0  ;;  %s5340_s0 = inlined_call_operand.vmem [shape: f32[2,256,9], index: 0, kind: input, shape index: {}]   ;;  %s5341_s1 = inlined_call_operand.vmem [shape: f32[9,32], index: 1, kind: input, shape index: {}]   ;;  %s5342_s2 = inlined_call_operand.vmem [shape: f32[1,32], index: 2, kind: input, shape index: {}]   ;;  %s5343_s3 = inlined_call_operand.vmem [shape: bf16[288,64], index: 3, kind: input, shape index: {}]   ;;  %s5344_s4 = inlined_call_operand.vmem [shape: f32[1,64], index: 4, kind: input, shape index: {}]   ;;  %s5345_s5 = inlined_call_operand.vmem [shape: bf16[1024,256], index: 5, kind: input, shape index: {}]   ;;  %s5346_s6 = inlined_call_operand.vmem [shape: f32[1,256], index: 6, kind: input, shape index: {}]   ;;  %s5347_s7 = inlined_call_operand.vmem [shape: bf16[256,128], index: 7, kind: input, shape index: {}]   ;;  %s5348_s8 = inlined_call_operand.vmem [shape: f32[1,128], index: 8, kind: input, shape index: {}]   ;;  %s5349_s9 = inlined_call_operand.hbm [shape: f32[2,1,128], index: 9, kind: output, shape index: {}]  }
   0x1   :  { %16 = vsyncpa [#allocation8 + $0x1], 0  ;;  %s3972_s30 = smov 0   ;;  %s3974_s10 = smov 0  }
   0x2   :  { %s3976_s11 = smov 0   ;;  %s3978_s12 = smov 0  }
   0x3 LB: > { %s3993_s13 = sadd.s32 4294967295, %s3916_s12   ;;  %s2885_s14 = sadd.s32 4294967294, %s3916_s12   ;;  %s3916_s12 = sphi %s3978_s12, %s5359_s12   ;;  %s3912_s11 = sphi %s3976_s11, %s5358_s11   ;;  %s3908_s10 = sphi %s3974_s10, %s5357_s10   ;;  %s3904_s30 = sphi %s3972_s30, %s5356_s30  }
   0x4   : > { %s3997_s15 = sadd.s32 1, %s3916_s12   ;;  %s223_s16 = sadd.s32 1, %s3912_s11 }
   0x5   : > { %s220_s17 = ssub.s32 %s3916_s12, %s3997_s15  ;;  %p233_p0 = scmp.ne.s32.totalorder %s3912_s11, %s3908_s10 }
   0x6   : > { %p221_p1 = scmp.eq.s32.totalorder %s220_s17, 0  ;;  %p234_p2 = scmp.eq.s32.totalorder %s3993_s13, 1 }
   0x7   : > { %p239_p3 = scmp.ne.s32.totalorder %s3908_s10, %s3904_s30  ;;  %p240_p4 = scmp.eq.s32.totalorder %s2885_s14, 1 }
   0x8   : > { %s4008_s18 = scalar_select %p221_p1, %s3912_s11, %s223_s16  }
   0x9   : > { %p4010_p5 = por %p234_p2, %p233_p0  ;;  %p4014_p6 = por %p240_p4, %p239_p3 }
   0xa   : > { %p2888_p7 = scmp.ge.s32.totalorder %s3916_s12, 1  ;;  %p290_p8 = scmp.lt.s32.totalorder %s3916_s12, 3 }
   0xc   : > { %p291_p9 = pnand %p2888_p7, %p290_p8 }
   0xd   : > { %p325_p10 = scmp.lt.s32.totalorder (!%p291_p9), %s3993_s13, 1  ;;  %s3919_s14 = smov (!%p291_p9), 32  }
   0xe   : > { %294 = sbr.rel (%p291_p9) target bundleno = 1279 (0x4ff), region = 56  ;;  %s3920_s21 = smov (!%p291_p9), 64  }
   0xf   : > { %s3921_s22 = smov (!%p291_p9), 96   ;;  %s2826_s17 = scalar_lea.hbm (!%p291_p9), %s5349_s9, %s3993_s13 }
  0x10   : > { %s3874_s16 = scalar_lea.hbm (!%p291_p9), %s5349_s9, 2 }
  0x13   : > { %v364_v0 = vld [vmem:[%s5341_s1 + $0x8] sm:$0x1]  ;;  %vm466_vm0 = vcmask 1040384   ;;  %v363_v1 = vld [vmem:[%s5341_s1] sm:$0xff]  ;;  %s326_s25 = scalar_select %p325_p10, %s3993_s13, 1  ;;  %vm369_vm1 = vcmask 72704  }
  0x14   : > { %2891 = vmatpush.msk.msra.mxu0 %vm466_vm0, %v364_v0  ;;  %vm631_vm2 = vcmask 261120   ;;  %vm688_vm3 = vcmask 254976   ;;  %v3918_v18 = vmov 0.0   ;;  %vm693_vm4 = vcmask 253952   ;;  %v4085_v25 = vld [vmem:[%s5342_s2] ss:$0 sm:$0xff] }
  0x15   : > { %s3634_s26 = sshll.u32 %s326_s25, 8  ;;  %687 = vst.msk [vmem:[#allocation2] sm:$0xff] %vm631_vm2, %v3918_v18  ;;  %vm739_vm5 = vcmask 257024   ;;  %vm796_vm6 = vcmask 519424   ;;  %vm853_vm7 = vcmask 781824   ;;  %vm910_vm8 = vcmask 1044224  }
  0x16   : > { %485 = vmatpush.msra.mxu0 %v363_v1  ;;  %s4032_s29 = scalar_lea.vmem %s5340_s0, %s3634_s26  ;;  %689 = vst.msk [vmem:[#allocation2 + $0x8] sm:$0x3] %vm688_vm3, %v3918_v18  ;;  %vm1471_vm9 = vcmask 523264   ;;  %vm1496_vm10 = vcmask 516096   ;;  %vm1497_vm11 = vsmask.f32 256 }
  0x17   : > { %v331_v2 = vld [vmem:[%s4032_s29] sm:$0xff]  ;;  %v332_v3 = vld [vmem:[%s4032_s29 + $0x8] sm:$0xff]  ;;  %v333_v4 = vld [vmem:[%s4032_s29 + $0x10] sm:$0xff]  ;;  %692 = vst.msk [vmem:[#allocation2 + $0x98] sm:$0x3] %vm688_vm3, %v3918_v18  ;;  %vm1514_vm13 = vcmask 1040896  }
  0x18   : > { %2892 = vmatmul.msk.f32.vlgmr.msra.gmra.mxu0 %vm369_vm1, %v331_v2  ;;  %v334_v5 = vld [vmem:[%s4032_s29 + $0x18] sm:$0xff]  ;;  %v335_v6 = vld [vmem:[%s4032_s29 + $0x20] sm:$0xff]  ;;  %v336_v7 = vld [vmem:[%s4032_s29 + $0x28] sm:$0xff]  ;;  %691 = vst.msk [vmem:[#allocation2 + $0x90] sm:$0xff] %vm631_vm2, %v3918_v18  ;;  %s2830_s25 = sshll.u32 %s2826_s17, 4  ;;  %s2831_s25 = int_to_ptr.hbm [resolvable:$true] %s2830_s25 }
  0x19   : > { %v337_v8 = vld [vmem:[%s4032_s29 + $0x30] sm:$0xff]  ;;  %v338_v9 = vld [vmem:[%s4032_s29 + $0x38] sm:$0xff]  ;;  %v339_v10 = vld [vmem:[%s4032_s29 + $0x40] sm:$0xff]  ;;  %713 = vst.msk [vmem:[#allocation2 + $0x99] sm:$0x1] %vm693_vm4, %v3918_v18  ;;  %s3868_s27 = sshra.s32 %s2831_s25, 4  ;;  %s3869_s27 = int_to_ptr.hbm [resolvable:$true] %s3868_s27 }
  0x1a   : > { %v340_v11 = vld [vmem:[%s4032_s29 + $0x48] sm:$0xff]  ;;  %v341_v12 = vld [vmem:[%s4032_s29 + $0x50] sm:$0xff]  ;;  %v342_v13 = vld [vmem:[%s4032_s29 + $0x58] sm:$0xff]  ;;  %694 = vst.msk [vmem:[#allocation2] sm:$0x1] %vm693_vm4, %v3918_v18  ;;  %s3870_s28 = scalar_lea.hbm %s3869_s27, 1  ;;  %p3875_p0 = scmp.lt.s32.totalorder %s3869_s27, %s5349_s9 }
  0x1b   : > { %v343_v14 = vld [vmem:[%s4032_s29 + $0x60] sm:$0xff]  ;;  %v344_v15 = vld [vmem:[%s4032_s29 + $0x68] sm:$0xff]  ;;  %v345_v16 = vld [vmem:[%s4032_s29 + $0x70] sm:$0xff]  ;;  %695 = vst.msk [vmem:[#allocation2 + $0x10] sm:$0x1] %vm693_vm4, %v3918_v18  ;;  %p3871_p11 = scmp.ne.s32.totalorder %s3869_s27, %s3870_s28  ;;  %p3876_p1 = scmp.lt.s32.totalorder %s3874_s16, %s3870_s28 }
  0x1c   : > { %v346_v17 = vld [vmem:[%s4032_s29 + $0x78] sm:$0xff]  ;;  %v347_v20 = vld [vmem:[%s4032_s29 + $0x80] sm:$0xff]  ;;  %696 = vst.msk [vmem:[#allocation2 + $0x20] sm:$0x1] %vm693_vm4, %v3918_v18  ;;  %v348_v24 = vld [vmem:[%s4032_s29 + $0x88] sm:$0xff] }
  0x1d   : > { %v748_v21 = vld [vmem:[#allocation2 + $0x1] sm:$0xff]  ;;  %697 = vst.msk [vmem:[#allocation2 + $0x30] sm:$0x1] %vm693_vm4, %v3918_v18  ;;  %v350_v35 = vld [vmem:[%s4032_s29 + $0x98] sm:$0xff]  ;;  %v351_v43 = vld [vmem:[%s4032_s29 + $0xa0] sm:$0xff]  ;;  %p3872_p12 = pnand %p3871_p11, %p4010_p5  ;;  %p3877_p2 = por %p3876_p1, %p3875_p0 }
  0x1e   : > { %v756_v22 = vpack.c.bf16 %v748_v21, %v748_v21  ;;  %698 = vst.msk [vmem:[#allocation2 + $0x40] sm:$0x1] %vm693_vm4, %v3918_v18  ;;  %v349_v28 = vld [vmem:[%s4032_s29 + $0x90] sm:$0xff]  ;;  %v352_v50 = vld [vmem:[%s4032_s29 + $0xa8] sm:$0xff]  ;;  %vm4391_vm12 = vmand %vm1496_vm10, %vm1497_vm11 }
  0x1f   : > { %699 = vst.msk [vmem:[#allocation2 + $0x50] sm:$0x1] %vm693_vm4, %v3918_v18  ;;  %v1063_v51 = vld [vmem:[#allocation2 + $0x91] sm:$0xff]  ;;  %v353_v54 = vld [vmem:[%s4032_s29 + $0xb0] sm:$0xff]  ;;  %vm4417_vm14 = vmand %vm1514_vm13, %vm1497_vm11  ;;  %p3873_p13 = pneg %p3872_p12 }
  0x20   : > { %2893 = vmatmul.msk.f32.gmra.mxu0 %vm369_vm1, %v332_v3  ;;  %772 = vrot.lane.b32.xlu0 %v756_v22, %s3919_s14  ;;  %700 = vst.msk [vmem:[#allocation2 + $0x60] sm:$0x1] %vm693_vm4, %v3918_v18  ;;  %v1071_v52 = vpack.c.bf16 %v1063_v51, %v1063_v51 }
  0x21   : > { %701 = vst.msk [vmem:[#allocation2 + $0x70] sm:$0x1] %vm693_vm4, %v3918_v18  ;;  %p3878_p3 = pnand %p3877_p2, %p3873_p13 }
  0x22   : > { %702 = vst.msk [vmem:[#allocation2 + $0x80] sm:$0x1] %vm693_vm4, %v3918_v18 }
  0x23   : > { %704 = vst.msk [vmem:[#allocation2 + $0x9] sm:$0x1] %vm693_vm4, %v3918_v18 }
  0x24   : > { %705 = vst.msk [vmem:[#allocation2 + $0x19] sm:$0x1] %vm693_vm4, %v3918_v18 }
  0x25   : > { %706 = vst.msk [vmem:[#allocation2 + $0x29] sm:$0x1] %vm693_vm4, %v3918_v18 }
  0x26   : > { %707 = vst.msk [vmem:[#allocation2 + $0x39] sm:$0x1] %vm693_vm4, %v3918_v18 }
  0x27   : > { %708 = vst.msk [vmem:[#allocation2 + $0x49] sm:$0x1] %vm693_vm4, %v3918_v18 }
  0x28   : > { %2894 = vmatmul.msk.f32.gmra.mxu0 %vm369_vm1, %v333_v4  ;;  %709 = vst.msk [vmem:[#allocation2 + $0x59] sm:$0x1] %vm693_vm4, %v3918_v18  ;;  %v354_v4 = vld [vmem:[%s4032_s29 + $0xb8] sm:$0xff] }
  0x29   : > { %710 = vst.msk [vmem:[#allocation2 + $0x69] sm:$0x1] %vm693_vm4, %v3918_v18 }
  0x2a   : > { %711 = vst.msk [vmem:[#allocation2 + $0x79] sm:$0x1] %vm693_vm4, %v3918_v18  ;;  %v805_v44 = vld [vmem:[#allocation2 + $0x2] sm:$0xff] }
  0x2b   : > { %712 = vst.msk [vmem:[#allocation2 + $0x89] sm:$0x1] %vm693_vm4, %v3918_v18  ;;  %v813_v45 = vpack.c.bf16 %v805_v44, %v805_v44 }
  0x2c   : > { %703 = vst.msk [vmem:[#allocation2 + $0x90] sm:$0x1] %vm693_vm4, %v3918_v18 }
  0x2d   : > { %829 = vrot.lane.b32.xlu2 %v813_v45, %s3920_s21  ;;  %v360_v45 = vld [vmem:[%s4032_s29 + $0xe8] sm:$0xff] }
  0x30   : > { %2895 = vmatmul.msk.f32.gmra.mxu0 %vm369_vm1, %v334_v5 }
  0x33   : > { %v1007_v39 = vld [vmem:[#allocation2 + $0x90] sm:$0xff] }
  0x34   : > { %v1015_v40 = vpack.c.bf16 %v1007_v39, %v1007_v39 }
  0x35   : > { %1094 = vrot.lane.b32.xlu2 %v1071_v52, %s3921_s22 }
  0x36   : > { %1038 = vrot.lane.b32.xlu0 %v1015_v40, %s3920_s21  ;;  %v359_v40 = vld [vmem:[%s4032_s29 + $0xe0] sm:$0xff] }
  0x38   : > { %2896 = vmatmul.msk.f32.gmra.mxu0 %vm369_vm1, %v335_v6 }
  0x40   : > { %2897 = vmatmul.msk.f32.gmra.mxu0 %vm369_vm1, %v336_v7 }
  0x48   : > { %2898 = vmatmul.msk.f32.gmra.mxu0 %vm369_vm1, %v337_v8 }
  0x50   : > { %2899 = vmatmul.msk.f32.gmra.mxu0 %vm369_vm1, %v338_v9 }
  0x58   : > { %2900 = vmatmul.msk.f32.gmra.mxu0 %vm369_vm1, %v339_v10  ;;  %v355_v10 = vld [vmem:[%s4032_s29 + $0xc0] sm:$0xff] }
  0x60   : > { %2901 = vmatmul.msk.f32.gmra.mxu0 %vm369_vm1, %v340_v11 }
  0x68   : > { %2902 = vmatmul.msk.f32.gmra.mxu0 %vm369_vm1, %v341_v12 }
  0x70   : > { %2903 = vmatmul.msk.f32.gmra.mxu0 %vm369_vm1, %v342_v13 }
  0x78   : > { %2904 = vmatmul.msk.f32.gmra.mxu0 %vm369_vm1, %v343_v14 }
  0x80   : > { %2905 = vmatmul.msk.f32.gmra.mxu0 %vm369_vm1, %v344_v15  ;;  %v356_v15 = vld [vmem:[%s4032_s29 + $0xc8] sm:$0xff] }
  0x88   : > { %2906 = vmatmul.msk.f32.gmra.mxu0 %vm369_vm1, %v345_v16 }
  0x90   : > { %2907 = vmatmul.msk.f32.gmra.mxu0 %vm369_vm1, %v346_v17  ;;  %v357_v17 = vld [vmem:[%s4032_s29 + $0xd0] sm:$0xff] }
  0x95   : > { %v487_v19 = vpop.f32.mrf.mxu0 }
  0x96   : > { %v488_v26 = vadd.f32 %v4085_v25, %v487_v19 }
  0x98   : > { %2908 = vmatmul.msk.f32.gmra.mxu0 %vm369_vm1, %v347_v20  ;;  %v583_v30 = vmax.f32 %v488_v26, 0.0 }
  0x9d   : > { %v490_v23 = vpop.f32.mrf.mxu0 }
  0x9e   : > { %v491_v33 = vadd.f32 %v4085_v25, %v490_v23 }
  0xa0   : > { %2909 = vmatmul.msk.f32.gmra.mxu0 %vm369_vm1, %v348_v24  ;;  %v584_v37 = vmax.f32 %v491_v33, 0.0  ;;  %v358_v33 = vld [vmem:[%s4032_s29 + $0xd8] sm:$0xff] }
  0xa5   : > { %v493_v27 = vpop.f32.mrf.mxu0 }
  0xa6   : > { %v494_v29 = vadd.f32 %v4085_v25, %v493_v27 }
  0xa8   : > { %v585_v31 = vmax.f32 %v494_v29, 0.0  ;;  %2910 = vmatmul.msk.f32.gmra.mxu0 %vm369_vm1, %v349_v28 }
  0xaa   : > { %v615_v32 = vmax.f32 %v583_v30, %v585_v31  ;;  %v3664_v30 = vld [vmem:[%s5343_s3 + $0x88] sm:$0xff] }
  0xab   : > { %1436 = vmatpush.bf16.msra.mxu3 %v3664_v30 }
  0xac   : > { %632 = vst.msk [vmem:[#allocation3] sm:$0xff] %vm631_vm2, %v615_v32 }
  0xad   : > { %v496_v34 = vpop.f32.mrf.mxu0 }
  0xae   : > { %v497_v36 = vadd.f32 %v4085_v25, %v496_v34 }
  0xb0   : > { %v586_v38 = vmax.f32 %v497_v36, 0.0  ;;  %2911 = vmatmul.msk.f32.gmra.mxu0 %vm369_vm1, %v350_v35  ;;  %v3663_v35 = vld [vmem:[%s5343_s3 + $0x80] sm:$0xff] }
  0xb1   : > { %1437 = vmatpush.bf16.msra.mxu3 %v3663_v35  ;;  %v3648_v35 = vld [vmem:[%s5343_s3 + $0x8] sm:$0xff] }
  0xb2   : > { %v616_v41 = vmax.f32 %v584_v37, %v586_v38 }
  0xb4   : > { %633 = vst.msk [vmem:[#allocation3 + $0x8] sm:$0xff] %vm631_vm2, %v616_v41 }
  0xb5   : > { %v499_v42 = vpop.f32.mrf.mxu0 }
  0xb6   : > { %v500_v53 = vadd.f32 %v4085_v25, %v499_v42 }
  0xb8   : > { %2912 = vmatmul.msk.f32.gmra.mxu0 %vm369_vm1, %v351_v43  ;;  %v587_v63 = vmax.f32 %v500_v53, 0.0 }
  0xbb   : > { %v648_v46 = vld [vmem:[#allocation3] ss:$2 sm:$0xff]  ;;  %v664_v47 = vld [vmem:[#allocation3 + $0x1] ss:$2 sm:$0xff] }
  0xbc   : > { %v679_v48 = vmax.f32 %v648_v46, %v664_v47  ;;  %v361_v47 = vld [vmem:[%s4032_s29 + $0xf0] sm:$0xff] }
  0xbd   : > { %v502_v49 = vpop.f32.mrf.mxu0 }
  0xbe   : > { %715 = vst.msk [vmem:[#allocation2 + $0x11] sm:$0xff] %vm631_vm2, %v679_v48  ;;  %v503_v2 = vadd.f32 %v4085_v25, %v502_v49 }
  0xc0   : > { %2913 = vmatmul.msk.f32.gmra.mxu0 %vm369_vm1, %v352_v50  ;;  %v588_v6 = vmax.f32 %v503_v2, 0.0 }
  0xc5   : > { %v505_v55 = vpop.f32.mrf.mxu0  ;;  %v943_v56 = vld [vmem:[#allocation2 + $0x12] sm:$0xff] }
  0xc6   : > { %v749_v57 = vld [vmem:[#allocation2 + $0x11] sm:$0xff]  ;;  %v506_v59 = vadd.f32 %v4085_v25, %v505_v55  ;;  %v951_v60 = vpack.c.bf16 %v943_v56, %v943_v56 }
  0xc7   : > { %v862_v58 = vld [vmem:[#allocation2 + $0x10] sm:$0xff]  ;;  %v757_v61 = vpack.c.bf16 %v749_v57, %v749_v57 }
  0xc8   : > { %v870_v62 = vpack.c.bf16 %v862_v58, %v862_v58  ;;  %v589_v0 = vmax.f32 %v506_v59, 0.0  ;;  %2914 = vmatmul.msk.f32.gmra.mxu0 %vm369_vm1, %v353_v54  ;;  %967 = vrot.lane.b32.xlu0 %v951_v60, %s3919_s14 }
  0xc9   : > { %935 = vst.msk [vmem:[#allocation5 + $0x4] sm:$0xf] %vm739_vm5, %v757_v61  ;;  %774 = vrot.lane.b32.xlu1 %v757_v61, %s3919_s14 }
  0xca   : > { %741 = vst.msk [vmem:[#allocation5 + $0xc] sm:$0xf] %vm739_vm5, %v870_v62  ;;  %v617_v1 = vmax.f32 %v587_v63, %v589_v0 }
  0xcc   : > { %634 = vst.msk [vmem:[#allocation3 + $0x10] sm:$0xff] %vm631_vm2, %v617_v1 }
  0xcd   : > { %v508_v3 = vpop.f32.mrf.mxu0 }
  0xce   : > { %v509_v5 = vadd.f32 %v4085_v25, %v508_v3  ;;  %v773_v3 = vpop.permute.xlu0 %772 }
  0xd0   : > { %v590_v7 = vmax.f32 %v509_v5, 0.0  ;;  %2915 = vmatmul.msk.f32.gmra.mxu0 %vm369_vm1, %v354_v4  ;;  %831 = vrot.lane.b32.xlu0 %v951_v60, %s3920_s21  ;;  %v723_v60 = vld [vmem:[#allocation2] sm:$0xff] }
  0xd1   : > { %886 = vrot.lane.b32.xlu1 %v870_v62, %s3921_s22  ;;  %v362_v62 = vld [vmem:[%s4032_s29 + $0xf8] sm:$0xff]  ;;  %v731_v63 = vpack.c.bf16 %v723_v60, %v723_v60 }
  0xd2   : > { %v618_v8 = vmax.f32 %v588_v6, %v590_v7 }
  0xd3   : > { %740 = vst.msk [vmem:[#allocation5] sm:$0xf] %vm739_vm5, %v731_v63 }
  0xd4   : > { %635 = vst.msk [vmem:[#allocation3 + $0x18] sm:$0xff] %vm631_vm2, %v618_v8 }
  0xd5   : > { %v511_v9 = vpop.f32.mrf.mxu0  ;;  %797 = vst.msk [vmem:[#allocation5] sm:$0xf] %vm796_vm6, %v773_v3 }
  0xd6   : > { %v512_v16 = vadd.f32 %v4085_v25, %v511_v9  ;;  %v3654_v9 = vld [vmem:[%s5343_s3 + $0x38] sm:$0xff] }
  0xd7   : > { %1372 = vmatpush.bf16.msra.mxu1 %v3654_v9 }
  0xd8   : > { %2916 = vmatmul.msk.f32.gmra.mxu0 %vm369_vm1, %v355_v10  ;;  %v591_v27 = vmax.f32 %v512_v16, 0.0  ;;  %v3653_v10 = vld [vmem:[%s5343_s3 + $0x30] sm:$0xff]  ;;  %v830_v16 = vpop.permute.xlu2 %829 }
  0xd9   : > { %854 = vst.msk [vmem:[#allocation5] sm:$0xf] %vm853_vm7, %v830_v16 }
  0xdb   : > { %v650_v11 = vld [vmem:[#allocation3 + $0x10] ss:$2 sm:$0xff]  ;;  %v666_v12 = vld [vmem:[#allocation3 + $0x11] ss:$2 sm:$0xff]  ;;  %1373 = vmatpush.bf16.msra.mxu1 %v3653_v10 }
  0xdc   : > { %v680_v13 = vmax.f32 %v650_v11, %v666_v12 }
  0xdd   : > { %v514_v14 = vpop.f32.mrf.mxu0 }
  0xde   : > { %716 = vst.msk [vmem:[#allocation2 + $0x21] sm:$0xff] %vm631_vm2, %v680_v13  ;;  %v515_v31 = vadd.f32 %v4085_v25, %v514_v14 }
  0xe0   : > { %2917 = vmatmul.msk.f32.gmra.mxu0 %vm369_vm1, %v356_v15  ;;  %v592_v36 = vmax.f32 %v515_v31, 0.0  ;;  %v3652_v15 = vld [vmem:[%s5343_s3 + $0x28] sm:$0xff]  ;;  %v3649_v31 = vld [vmem:[%s5343_s3 + $0x10] sm:$0xff] }
  0xe1   : > { %1374 = vmatpush.bf16.msra.mxu1 %v3652_v15 }
  0xe5   : > { %v517_v18 = vpop.f32.mrf.mxu0  ;;  %v1056_v19 = vld [vmem:[#allocation2 + $0x21] sm:$0xff] }
  0xe6   : > { %v944_v20 = vld [vmem:[#allocation2 + $0x22] sm:$0xff]  ;;  %v518_v22 = vadd.f32 %v4085_v25, %v517_v18  ;;  %v1064_v23 = vpack.c.bf16 %v1056_v19, %v1056_v19 }
  0xe7   : > { %v1000_v21 = vld [vmem:[#allocation2 + $0x20] sm:$0xff]  ;;  %v952_v24 = vpack.c.bf16 %v944_v20, %v944_v20 }
  0xe8   : > { %v1008_v26 = vpack.c.bf16 %v1000_v21, %v1000_v21  ;;  %v593_v28 = vmax.f32 %v518_v22, 0.0  ;;  %2918 = vmatmul.msk.f32.gmra.mxu0 %vm369_vm1, %v357_v17  ;;  %1080 = vrot.lane.b32.xlu2 %v1064_v23, %s3921_s22  ;;  %936 = vst.msk [vmem:[#allocation5 + $0x10] sm:$0xf] %vm739_vm5, %v1064_v23  ;;  %v3651_v17 = vld [vmem:[%s5343_s3 + $0x20] sm:$0xff] }
  0xe9   : > { %1128 = vst.msk [vmem:[#allocation5 + $0x8] sm:$0xf] %vm739_vm5, %v952_v24  ;;  %969 = vrot.lane.b32.xlu0 %v952_v24, %s3919_s14  ;;  %1375 = vmatpush.bf16.msra.mxu1 %v3651_v17  ;;  %v3659_v17 = vld [vmem:[%s5343_s3 + $0x60] sm:$0xff] }
  0xea   : > { %1024 = vrot.lane.b32.xlu1 %v1008_v26, %s3920_s21  ;;  %v619_v29 = vmax.f32 %v591_v27, %v593_v28  ;;  %742 = vst.msk [vmem:[#allocation5 + $0x18] sm:$0xf] %vm739_vm5, %v1008_v26  ;;  %v3650_v28 = vld [vmem:[%s5343_s3 + $0x18] sm:$0xff] }
  0xec   : > { %636 = vst.msk [vmem:[#allocation3 + $0x20] sm:$0xff] %vm631_vm2, %v619_v29 }
  0xed   : > { %v520_v32 = vpop.f32.mrf.mxu0  ;;  %1376 = vmatpush.bf16.msra.mxu1 %v3650_v28  ;;  %v3656_v28 = vld [vmem:[%s5343_s3 + $0x48] sm:$0xff] }
  0xee   : > { %v521_v34 = vadd.f32 %v4085_v25, %v520_v32 }
  0xf0   : > { %v594_v37 = vmax.f32 %v521_v34, 0.0  ;;  %2919 = vmatmul.msk.f32.gmra.mxu0 %vm369_vm1, %v358_v33  ;;  %888 = vrot.lane.b32.xlu2 %v1008_v26, %s3921_s22  ;;  %v2934_v1 = vld [vmem:[#allocation5 + $0x8] sm:$0xf] }
  0xf1   : > { %776 = vrot.lane.b32.xlu0 %v1064_v23, %s3919_s14  ;;  %1377 = vmatpush.bf16.msra.mxu1 %v3649_v31 }
  0xf2   : > { %v620_v38 = vmax.f32 %v592_v36, %v594_v37 }
  0xf4   : > { %637 = vst.msk [vmem:[#allocation3 + $0x28] sm:$0xff] %vm631_vm2, %v620_v38 }
  0xf5   : > { %v523_v39 = vpop.f32.mrf.mxu0  ;;  %1378 = vmatpush.bf16.msra.mxu1 %v3648_v35 }
  0xf6   : > { %v524_v46 = vadd.f32 %v4085_v25, %v523_v39  ;;  %v4224_v39 = vpop.permute.xlu0 %1038 }
  0xf8   : > { %2920 = vmatmul.msk.f32.gmra.mxu0 %vm369_vm1, %v359_v40  ;;  %833 = vrot.lane.b32.xlu2 %v952_v24, %s3920_s21  ;;  %v595_v56 = vmax.f32 %v524_v46, 0.0  ;;  %v3647_v40 = vld [vmem:[%s5343_s3] sm:$0xff] }
  0xf9   : > { %1379 = vmatpush.bf16.msra.mxu1 %v3647_v40 }
  0xfb   : > { %v652_v41 = vld [vmem:[#allocation3 + $0x20] ss:$2 sm:$0xff]  ;;  %v668_v42 = vld [vmem:[#allocation3 + $0x21] ss:$2 sm:$0xff] }
  0xfc   : > { %v681_v43 = vmax.f32 %v652_v41, %v668_v42 }
  0xfd   : > { %v526_v44 = vpop.f32.mrf.mxu0 }
  0xfe   : > { %717 = vst.msk [vmem:[#allocation2 + $0x31] sm:$0xff] %vm631_vm2, %v681_v43  ;;  %v527_v59 = vadd.f32 %v4085_v25, %v526_v44  ;;  %v4232_v43 = vpop.permute.xlu2 %1094 }
 0x100   : > { %2921 = vmatmul.msk.f32.gmra.mxu0 %vm369_vm1, %v360_v45  ;;  %v596_v4 = vmax.f32 %v527_v59, 0.0 }
 0x105   : > { %v529_v48 = vpop.f32.mrf.mxu0  ;;  %v1057_v49 = vld [vmem:[#allocation2 + $0x31] sm:$0xff] }
 0x106   : > { %v945_v50 = vld [vmem:[#allocation2 + $0x32] sm:$0xff]  ;;  %v530_v52 = vadd.f32 %v4085_v25, %v529_v48  ;;  %v1065_v53 = vpack.c.bf16 %v1057_v49, %v1057_v49 }
 0x107   : > { %v1001_v51 = vld [vmem:[#allocation2 + $0x30] sm:$0xff]  ;;  %v953_v54 = vpack.c.bf16 %v945_v50, %v945_v50 }
 0x108   : > { %v1009_v55 = vpack.c.bf16 %v1001_v51, %v1001_v51  ;;  %v597_v57 = vmax.f32 %v530_v52, 0.0  ;;  %2922 = vmatmul.msk.f32.gmra.mxu0 %vm369_vm1, %v361_v47  ;;  %1082 = vrot.lane.b32.xlu2 %v1065_v53, %s3921_s22  ;;  %937 = vst.msk [vmem:[#allocation5 + $0x1c] sm:$0xf] %vm739_vm5, %v1065_v53 }
 0x109   : > { %1129 = vst.msk [vmem:[#allocation5 + $0x14] sm:$0xf] %vm739_vm5, %v953_v54  ;;  %971 = vrot.lane.b32.xlu0 %v953_v54, %s3919_s14 }
 0x10a   : > { %1026 = vrot.lane.b32.xlu1 %v1009_v55, %s3920_s21  ;;  %v621_v58 = vmax.f32 %v595_v56, %v597_v57  ;;  %743 = vst.msk [vmem:[#allocation5 + $0x24] sm:$0xf] %vm739_vm5, %v1009_v55 }
 0x10c   : > { %638 = vst.msk [vmem:[#allocation3 + $0x30] sm:$0xff] %vm631_vm2, %v621_v58 }
 0x10d   : > { %v532_v61 = vpop.f32.mrf.mxu0 }
 0x10e   : > { %v533_v0 = vadd.f32 %v4085_v25, %v532_v61 }
 0x110   : > { %v3637_v2 = vld [vmem:[#allocation5 + $0x10] sm:$0xf0]  ;;  %v598_v5 = vmax.f32 %v533_v0, 0.0  ;;  %2923 = vmatmul.msk.f32.gmra.mxu0 %vm369_vm1, %v362_v62 }
 0x111   : > { %v2935_v6 = vor.u32 %v3637_v2, %v2934_v1  ;;  %835 = vrot.lane.b32.xlu0 %v953_v54, %s3920_s21  ;;  %v3662_v0 = vld [vmem:[%s5343_s3 + $0x78] sm:$0xff] }
 0x112   : > { %778 = vrot.lane.b32.xlu1 %v1065_v53, %s3919_s14  ;;  %v622_v7 = vmax.f32 %v596_v4, %v598_v5  ;;  %1401 = vmatpush.bf16.msra.mxu2 %v3662_v0  ;;  %v3661_v4 = vld [vmem:[%s5343_s3 + $0x70] sm:$0xff] }
 0x113   : > { %3044 = vmatmul.msk.bf16.vlgmr.msra.gmra.mxu3 %vm631_vm2, %v2935_v6 }
 0x114   : > { %639 = vst.msk [vmem:[#allocation3 + $0x38] sm:$0xff] %vm631_vm2, %v622_v7 }
 0x115   : > { %v535_v8 = vpop.f32.mrf.mxu0 }
 0x116   : > { %v536_v18 = vadd.f32 %v4085_v25, %v535_v8  ;;  %1402 = vmatpush.bf16.msra.mxu2 %v3661_v4 }
 0x118   : > { %v599_v29 = vmax.f32 %v536_v18, 0.0 }
 0x11a   : > { %890 = vrot.lane.b32.xlu1 %v1009_v55, %s3921_s22 }
 0x11b   : > { %v654_v11 = vld [vmem:[#allocation3 + $0x30] ss:$2 sm:$0xff]  ;;  %v670_v12 = vld [vmem:[#allocation3 + $0x31] ss:$2 sm:$0xff] }
 0x11c   : > { %v682_v13 = vmax.f32 %v654_v11, %v670_v12  ;;  %v3660_v12 = vld [vmem:[%s5343_s3 + $0x68] sm:$0xff] }
 0x11d   : > { %v538_v14 = vpop.f32.mrf.mxu0  ;;  %1403 = vmatpush.bf16.msra.mxu2 %v3660_v12 }
 0x11e   : > { %718 = vst.msk [vmem:[#allocation2 + $0x41] sm:$0xff] %vm631_vm2, %v682_v13  ;;  %v539_v33 = vadd.f32 %v4085_v25, %v538_v14 }
 0x120   : > { %v600_v37 = vmax.f32 %v539_v33, 0.0 }
 0x121   : > { %1404 = vmatpush.bf16.msra.mxu2 %v3659_v17 }
 0x125   : > { %v541_v19 = vpop.f32.mrf.mxu0  ;;  %v1002_v20 = vld [vmem:[#allocation2 + $0x40] sm:$0xff] }
 0x126   : > { %v752_v21 = vld [vmem:[#allocation2 + $0x41] sm:$0xff]  ;;  %v542_v23 = vadd.f32 %v4085_v25, %v541_v19  ;;  %v1010_v24 = vpack.c.bf16 %v1002_v20, %v1002_v20  ;;  %v3658_v19 = vld [vmem:[%s5343_s3 + $0x58] sm:$0xff] }
 0x127   : > { %v946_v22 = vld [vmem:[#allocation2 + $0x42] sm:$0xff]  ;;  %v760_v26 = vpack.c.bf16 %v752_v21, %v752_v21  ;;  %1405 = vmatpush.bf16.msra.mxu2 %v3658_v19 }
 0x128   : > { %v954_v27 = vpack.c.bf16 %v946_v22, %v946_v22  ;;  %v601_v30 = vmax.f32 %v542_v23, 0.0  ;;  %1028 = vrot.lane.b32.xlu2 %v1010_v24, %s3920_s21  ;;  %744 = vst.msk [vmem:[#allocation5 + $0x30] sm:$0xf] %vm739_vm5, %v1010_v24 }
 0x129   : > { %780 = vrot.lane.b32.xlu0 %v760_v26, %s3919_s14  ;;  %938 = vst.msk [vmem:[#allocation5 + $0x28] sm:$0xf] %vm739_vm5, %v760_v26 }
 0x12a   : > { %1130 = vst.msk [vmem:[#allocation5 + $0x20] sm:$0xf] %vm739_vm5, %v954_v27  ;;  %973 = vrot.lane.b32.xlu1 %v954_v27, %s3919_s14  ;;  %v623_v32 = vmax.f32 %v599_v29, %v601_v30 }
 0x12c   : > { %640 = vst.msk [vmem:[#allocation3 + $0x40] sm:$0xff] %vm631_vm2, %v623_v32  ;;  %v3655_v32 = vld [vmem:[%s5343_s3 + $0x40] sm:$0xff] }
 0x12d   : > { %v544_v34 = vpop.f32.mrf.mxu0 }
 0x12e   : > { %v545_v36 = vadd.f32 %v4085_v25, %v544_v34 }
 0x130   : > { %v602_v38 = vmax.f32 %v545_v36, 0.0  ;;  %892 = vrot.lane.b32.xlu2 %v1010_v24, %s3921_s22 }
 0x131   : > { %v2946_v7 = vld [vmem:[#allocation5 + $0x20] sm:$0xf] }
 0x132   : > { %1084 = vrot.lane.b32.xlu1 %v760_v26, %s3921_s22  ;;  %v624_v41 = vmax.f32 %v600_v37, %v602_v38  ;;  %v3657_v26 = vld [vmem:[%s5343_s3 + $0x50] sm:$0xff] }
 0x133   : > { %1406 = vmatpush.bf16.msra.mxu2 %v3657_v26 }
 0x134   : > { %641 = vst.msk [vmem:[#allocation3 + $0x48] sm:$0xff] %vm631_vm2, %v624_v41 }
 0x135   : > { %v547_v42 = vpop.f32.mrf.mxu0 }
 0x136   : > { %v548_v53 = vadd.f32 %v4085_v25, %v547_v42 }
 0x137   : > { %1407 = vmatpush.bf16.msra.mxu2 %v3656_v28 }
 0x138   : > { %837 = vrot.lane.b32.xlu2 %v954_v27, %s3920_s21  ;;  %v603_v62 = vmax.f32 %v548_v53, 0.0 }
 0x13a   : > { %v968_v44 = vpop.permute.xlu0 %967 }
 0x13b   : > { %v656_v45 = vld [vmem:[#allocation3 + $0x40] ss:$2 sm:$0xff]  ;;  %v672_v46 = vld [vmem:[#allocation3 + $0x41] ss:$2 sm:$0xff]  ;;  %991 = vst.msk [vmem:[#allocation5 + $0x4] sm:$0xf] %vm796_vm6, %v968_v44  ;;  %v775_v47 = vpop.permute.xlu1 %774  ;;  %1408 = vmatpush.bf16.msra.mxu2 %v3655_v32 }
 0x13c   : > { %v683_v48 = vmax.f32 %v656_v45, %v672_v46  ;;  %798 = vst.msk [vmem:[#allocation5 + $0xc] sm:$0xf] %vm796_vm6, %v775_v47 }
 0x13d   : > { %v550_v49 = vpop.f32.mrf.mxu0 }
 0x13e   : > { %719 = vst.msk [vmem:[#allocation2 + $0x51] sm:$0xff] %vm631_vm2, %v683_v48  ;;  %v551_v3 = vadd.f32 %v4085_v25, %v550_v49 }
 0x140   : > { %v604_v9 = vmax.f32 %v551_v3, 0.0 }
 0x142   : > { %v4237_v50 = vpop.permute.xlu2 %1080  ;;  %v832_v51 = vpop.permute.xlu0 %831 }
 0x143   : > { %855 = vst.msk [vmem:[#allocation5 + $0xc] sm:$0xf] %vm853_vm7, %v832_v51  ;;  %v887_v52 = vpop.permute.xlu1 %886 }
 0x144   : > { %911 = vst.msk [vmem:[#allocation5] sm:$0xf] %vm910_vm8, %v887_v52 }
 0x145   : > { %v553_v54 = vpop.f32.mrf.mxu0  ;;  %v1059_v55 = vld [vmem:[#allocation2 + $0x51] sm:$0xff] }
 0x146   : > { %v1003_v56 = vld [vmem:[#allocation2 + $0x50] sm:$0xff]  ;;  %v554_v58 = vadd.f32 %v4085_v25, %v553_v54  ;;  %v1067_v59 = vpack.c.bf16 %v1059_v55, %v1059_v55 }
 0x147   : > { %v947_v57 = vld [vmem:[#allocation2 + $0x52] sm:$0xff]  ;;  %v1011_v60 = vpack.c.bf16 %v1003_v56, %v1003_v56 }
 0x148   : > { %v955_v61 = vpack.c.bf16 %v947_v57, %v947_v57  ;;  %v605_v63 = vmax.f32 %v554_v58, 0.0  ;;  %1086 = vrot.lane.b32.xlu2 %v1067_v59, %s3921_s22  ;;  %782 = vrot.lane.b32.xlu1 %v1067_v59, %s3919_s14  ;;  %939 = vst.msk [vmem:[#allocation5 + $0x34] sm:$0xf] %vm739_vm5, %v1067_v59 }
 0x149   : > { %1030 = vrot.lane.b32.xlu0 %v1011_v60, %s3920_s21  ;;  %745 = vst.msk [vmem:[#allocation5 + $0x3c] sm:$0xf] %vm739_vm5, %v1011_v60 }
 0x14a   : > { %1131 = vst.msk [vmem:[#allocation5 + $0x2c] sm:$0xf] %vm739_vm5, %v955_v61  ;;  %v625_v1 = vmax.f32 %v603_v62, %v605_v63  ;;  %v889_v2 = vpop.permute.xlu2 %888 }
 0x14b   : > { %912 = vst.msk [vmem:[#allocation5 + $0xc] sm:$0xf] %vm910_vm8, %v889_v2  ;;  %v2926_v14 = vld [vmem:[#allocation5] sm:$0xf] }
 0x14c   : > { %642 = vst.msk [vmem:[#allocation3 + $0x50] sm:$0xff] %vm631_vm2, %v625_v1 }
 0x14d   : > { %v556_v5 = vpop.f32.mrf.mxu0 }
 0x14e   : > { %v557_v6 = vadd.f32 %v4085_v25, %v556_v5 }
 0x150   : > { %v606_v10 = vmax.f32 %v557_v6, 0.0  ;;  %894 = vrot.lane.b32.xlu1 %v1011_v60, %s3921_s22 }
 0x151   : > { %v3640_v8 = vld [vmem:[#allocation5 + $0x28] sm:$0xf0]  ;;  %975 = vrot.lane.b32.xlu0 %v955_v61, %s3919_s14 }
 0x152   : > { %v2947_v11 = vor.u32 %v3640_v8, %v2946_v7  ;;  %v626_v13 = vmax.f32 %v604_v9, %v606_v10  ;;  %v3636_v15 = vld [vmem:[#allocation5 + $0x8] sm:$0xf0]  ;;  %v834_v30 = vpop.permute.xlu2 %833 }
 0x153   : > { %v2927_v16 = vor.u32 %v3636_v15, %v2926_v14 }
 0x154   : > { %3045 = vmatmul.msk.bf16.gmra.mxu3 %vm631_vm2, %v2947_v11  ;;  %643 = vst.msk [vmem:[#allocation3 + $0x58] sm:$0xff] %vm631_vm2, %v626_v13  ;;  %v1119_v13 = vld [vmem:[#allocation2 + $0x92] sm:$0xff] }
 0x155   : > { %v559_v18 = vpop.f32.mrf.mxu0  ;;  %1380 = vmatmul.bf16.vlgmr.msra.gmra.mxu1 %v2927_v16  ;;  %v1127_v16 = vpack.c.bf16 %v1119_v13, %v1119_v13 }
 0x156   : > { %v560_v31 = vadd.f32 %v4085_v25, %v559_v18 }
 0x157   : > { %1135 = vst.msk [vmem:[#allocation5 + $0x5c] sm:$0xf] %vm739_vm5, %v1127_v16 }
 0x158   : > { %v607_v42 = vmax.f32 %v560_v31, 0.0 }
 0x159   : > { %839 = vrot.lane.b32.xlu0 %v955_v61, %s3920_s21 }
 0x15b   : > { %v658_v20 = vld [vmem:[#allocation3 + $0x50] ss:$2 sm:$0xff]  ;;  %v674_v21 = vld [vmem:[#allocation3 + $0x51] ss:$2 sm:$0xff]  ;;  %v970_v22 = vpop.permute.xlu0 %969 }
 0x15c   : > { %v1025_v23 = vpop.permute.xlu1 %1024  ;;  %v684_v24 = vmax.f32 %v658_v20, %v674_v21  ;;  %992 = vst.msk [vmem:[#allocation5 + $0x10] sm:$0xf] %vm796_vm6, %v970_v22 }
 0x15d   : > { %1048 = vst.msk [vmem:[#allocation5 + $0x4] sm:$0xf] %vm853_vm7, %v1025_v23  ;;  %v562_v27 = vpop.f32.mrf.mxu0 }
 0x15e   : > { %720 = vst.msk [vmem:[#allocation2 + $0x61] sm:$0xff] %vm631_vm2, %v684_v24  ;;  %v563_v46 = vadd.f32 %v4085_v25, %v562_v27 }
 0x15f   : > { %1104 = vst.msk [vmem:[#allocation5 + $0x4] sm:$0xf] %vm910_vm8, %v4237_v50 }
 0x160   : > { %v608_v49 = vmax.f32 %v563_v46, 0.0 }
 0x162   : > { %v1083_v53 = vpop.permute.xlu2 %1082 }
 0x163   : > { %v777_v29 = vpop.permute.xlu0 %776 }
 0x164   : > { %799 = vst.msk [vmem:[#allocation5 + $0x18] sm:$0xf] %vm796_vm6, %v777_v29 }
 0x165   : > { %856 = vst.msk [vmem:[#allocation5 + $0x18] sm:$0xf] %vm853_vm7, %v834_v30  ;;  %v565_v33 = vpop.f32.mrf.mxu0  ;;  %v1004_v34 = vld [vmem:[#allocation2 + $0x60] sm:$0xff] }
 0x166   : > { %v948_v35 = vld [vmem:[#allocation2 + $0x62] sm:$0xff]  ;;  %v566_v37 = vadd.f32 %v4085_v25, %v565_v33  ;;  %v1012_v38 = vpack.c.bf16 %v1004_v34, %v1004_v34 }
 0x167   : > { %v1060_v36 = vld [vmem:[#allocation2 + $0x61] sm:$0xff]  ;;  %v4291_v40 = vpack.c.bf16 %v948_v35, %v948_v35 }
 0x168   : > { %v4293_v41 = vpack.c.bf16 %v1060_v36, %v1060_v36  ;;  %v609_v44 = vmax.f32 %v566_v37, 0.0  ;;  %1032 = vrot.lane.b32.xlu2 %v1012_v38, %s3920_s21  ;;  %746 = vst.msk [vmem:[#allocation5 + $0x48] sm:$0xf] %vm739_vm5, %v1012_v38  ;;  %v3635_v5 = vld [vmem:[#allocation5 + $0x4] sm:$0xf] }
 0x169   : > { %977 = vrot.lane.b32.xlu1 %v4291_v40, %s3919_s14  ;;  %1132 = vst.msk [vmem:[#allocation5 + $0x38] sm:$0xf] %vm739_vm5, %v4291_v40 }
 0x16a   : > { %940 = vst.msk [vmem:[#allocation5 + $0x40] sm:$0xf] %vm739_vm5, %v4293_v41  ;;  %v627_v45 = vmax.f32 %v607_v42, %v609_v44 }
 0x16c   : > { %644 = vst.msk [vmem:[#allocation3 + $0x60] sm:$0xff] %vm631_vm2, %v627_v45  ;;  %v3646_v45 = vld [vmem:[#allocation5 + $0x58] sm:$0xf0] }
 0x16d   : > { %v568_v47 = vpop.f32.mrf.mxu0 }
 0x16e   : > { %v569_v48 = vadd.f32 %v4085_v25, %v568_v47 }
 0x170   : > { %v610_v50 = vmax.f32 %v569_v48, 0.0  ;;  %896 = vrot.lane.b32.xlu2 %v1012_v38, %s3921_s22  ;;  %v2958_v21 = vld [vmem:[#allocation5 + $0x38] sm:$0xf] }
 0x171   : > { %1088 = vrot.lane.b32.xlu1 %v4293_v41, %s3921_s22 }
 0x172   : > { %v628_v51 = vmax.f32 %v608_v49, %v610_v50 }
 0x174   : > { %645 = vst.msk [vmem:[#allocation3 + $0x68] sm:$0xff] %vm631_vm2, %v628_v51 }
 0x175   : > { %v571_v52 = vpop.f32.mrf.mxu0 }
 0x176   : > { %v572_v63 = vadd.f32 %v4085_v25, %v571_v52 }
 0x178   : > { %v611_v11 = vmax.f32 %v572_v63, 0.0 }
 0x17b   : > { %v660_v54 = vld [vmem:[#allocation3 + $0x60] ss:$2 sm:$0xff]  ;;  %v676_v55 = vld [vmem:[#allocation3 + $0x61] ss:$2 sm:$0xff]  ;;  %v972_v56 = vpop.permute.xlu0 %971 }
 0x17c   : > { %v1027_v57 = vpop.permute.xlu1 %1026  ;;  %v685_v58 = vmax.f32 %v660_v54, %v676_v55  ;;  %993 = vst.msk [vmem:[#allocation5 + $0x1c] sm:$0xf] %vm796_vm6, %v972_v56 }
 0x17d   : > { %1049 = vst.msk [vmem:[#allocation5 + $0x10] sm:$0xf] %vm853_vm7, %v1027_v57  ;;  %v574_v59 = vpop.f32.mrf.mxu0 }
 0x17e   : > { %721 = vst.msk [vmem:[#allocation2 + $0x71] sm:$0xff] %vm631_vm2, %v685_v58  ;;  %v575_v18 = vadd.f32 %v4085_v25, %v574_v59 }
 0x17f   : > { %1105 = vst.msk [vmem:[#allocation5 + $0x10] sm:$0xf] %vm910_vm8, %v1083_v53 }
 0x180   : > { %v612_v23 = vmax.f32 %v575_v18, 0.0 }
 0x182   : > { %v1029_v60 = vpop.permute.xlu2 %1028 }
 0x183   : > { %1050 = vst.msk [vmem:[#allocation5 + $0x1c] sm:$0xf] %vm853_vm7, %v1029_v60  ;;  %v836_v61 = vpop.permute.xlu0 %835 }
 0x184   : > { %v779_v62 = vpop.permute.xlu1 %778 }
 0x185   : > { %800 = vst.msk [vmem:[#allocation5 + $0x24] sm:$0xf] %vm796_vm6, %v779_v62  ;;  %v577_v0 = vpop.f32.mrf.mxu0  ;;  %v1061_v1 = vld [vmem:[#allocation2 + $0x71] sm:$0xff] }
 0x186   : > { %857 = vst.msk [vmem:[#allocation5 + $0x24] sm:$0xf] %vm853_vm7, %v836_v61  ;;  %v1005_v2 = vld [vmem:[#allocation2 + $0x70] sm:$0xff]  ;;  %v578_v4 = vadd.f32 %v4085_v25, %v577_v0  ;;  %v1069_v7 = vpack.c.bf16 %v1061_v1, %v1061_v1 }
 0x187   : > { %v1117_v3 = vld [vmem:[#allocation2 + $0x72] sm:$0xff]  ;;  %v4319_v8 = vpack.c.bf16 %v1005_v2, %v1005_v2 }
 0x188   : > { %v2928_v6 = vld [vmem:[#allocation5 + $0xc] sm:$0xf0]  ;;  %v1125_v9 = vpack.c.bf16 %v1117_v3, %v1117_v3  ;;  %v613_v12 = vmax.f32 %v578_v4, 0.0  ;;  %1090 = vrot.lane.b32.xlu2 %v1069_v7, %s3921_s22  ;;  %786 = vrot.lane.b32.xlu1 %v1069_v7, %s3919_s14  ;;  %941 = vst.msk [vmem:[#allocation5 + $0x4c] sm:$0xf] %vm739_vm5, %v1069_v7 }
 0x189   : > { %v2931_v10 = vor.u32 %v3635_v5, %v2928_v6  ;;  %1034 = vrot.lane.b32.xlu0 %v4319_v8, %s3920_s21  ;;  %747 = vst.msk [vmem:[#allocation5 + $0x54] sm:$0xf] %vm739_vm5, %v4319_v8 }
 0x18a   : > { %1133 = vst.msk [vmem:[#allocation5 + $0x44] sm:$0xf] %vm739_vm5, %v1125_v9  ;;  %v629_v14 = vmax.f32 %v611_v11, %v613_v12  ;;  %v893_v15 = vpop.permute.xlu2 %892  ;;  %v4375_v11 = vld [vmem:[%s5344_s4] ss:$0 sm:$0xff] }
 0x18b   : > { %1409 = vmatmul.bf16.vlgmr.msra.gmra.mxu2 %v2931_v10  ;;  %914 = vst.msk [vmem:[#allocation5 + $0x24] sm:$0xf] %vm910_vm8, %v893_v15 }
 0x18c   : > { %v891_v17 = vpop.permute.xlu1 %890  ;;  %646 = vst.msk [vmem:[#allocation3 + $0x70] sm:$0xff] %vm631_vm2, %v629_v14 }
 0x18d   : > { %913 = vst.msk [vmem:[#allocation5 + $0x18] sm:$0xf] %vm910_vm8, %v891_v17  ;;  %v580_v19 = vpop.f32.mrf.mxu0 }
 0x18e   : > { %v581_v20 = vadd.f32 %v4085_v25, %v580_v19 }
 0x190   : > { %v614_v24 = vmax.f32 %v581_v20, 0.0  ;;  %841 = vrot.lane.b32.xlu2 %v4291_v40, %s3920_s21 }
 0x191   : > { %v3643_v22 = vld [vmem:[#allocation5 + $0x40] sm:$0xf0]  ;;  %784 = vrot.lane.b32.xlu0 %v4293_v41, %s3919_s14 }
 0x192   : > { %v2959_v26 = vor.u32 %v3643_v22, %v2958_v21  ;;  %v630_v27 = vmax.f32 %v612_v23, %v614_v24  ;;  %v3639_v28 = vld [vmem:[#allocation5 + $0x20] sm:$0xf0]  ;;  %v838_v33 = vpop.permute.xlu2 %837 }
 0x194   : > { %3046 = vmatmul.msk.bf16.gmra.mxu3 %vm631_vm2, %v2959_v26  ;;  %647 = vst.msk [vmem:[#allocation3 + $0x78] sm:$0xff] %vm631_vm2, %v630_v27  ;;  %v2938_v25 = vld [vmem:[#allocation5 + $0x18] sm:$0xf] }
 0x195   : > { %v2939_v29 = vor.u32 %v3639_v28, %v2938_v25 }
 0x196   : > { %v1439_v12 = vpop.f32.mrf.mxu3 }
 0x197   : > { %1385 = vmatmul.bf16.gmra.mxu1 %v2939_v29 }
 0x199   : > { %979 = vrot.lane.b32.xlu0 %v1125_v9, %s3919_s14 }
 0x19b   : > { %v781_v30 = vpop.permute.xlu0 %780  ;;  %v662_v31 = vld [vmem:[#allocation3 + $0x70] ss:$2 sm:$0xff]  ;;  %v678_v32 = vld [vmem:[#allocation3 + $0x71] ss:$2 sm:$0xff] }
 0x19c   : > { %801 = vst.msk [vmem:[#allocation5 + $0x30] sm:$0xf] %vm796_vm6, %v781_v30  ;;  %v974_v34 = vpop.permute.xlu1 %973  ;;  %v686_v35 = vmax.f32 %v662_v31, %v678_v32 }
 0x19d   : > { %858 = vst.msk [vmem:[#allocation5 + $0x30] sm:$0xf] %vm853_vm7, %v838_v33  ;;  %v3680_v33 = vld [vmem:[%s5345_s5 + $0x74] sm:$0xf0] }
 0x19e   : > { %994 = vst.msk [vmem:[#allocation5 + $0x28] sm:$0xf] %vm796_vm6, %v974_v34  ;;  %v1441_v23 = vpop.f32.mrf.mxu3  ;;  %v1499_v34 = vld [vmem:[#allocation6] sm:$0x1] }
 0x19f   : > { %722 = vst.msk [vmem:[#allocation2 + $0x81] sm:$0xff] %vm631_vm2, %v686_v35 }
 0x1a1   : > { %843 = vrot.lane.b32.xlu0 %v1125_v9, %s3920_s21 }
 0x1a2   : > { %v1087_v48 = vpop.permute.xlu2 %1086 }
 0x1a4   : > { %v1085_v36 = vpop.permute.xlu1 %1084 }
 0x1a5   : > { %1106 = vst.msk [vmem:[#allocation5 + $0x1c] sm:$0xf] %vm910_vm8, %v1085_v36 }
 0x1a6   : > { %v1006_v37 = vld [vmem:[#allocation2 + $0x80] sm:$0xff] }
 0x1a7   : > { %v950_v38 = vld [vmem:[#allocation2 + $0x82] sm:$0xff]  ;;  %v1014_v41 = vpack.c.bf16 %v1006_v37, %v1006_v37 }
 0x1a8   : > { %v1062_v40 = vld [vmem:[#allocation2 + $0x81] sm:$0xff]  ;;  %v958_v42 = vpack.c.bf16 %v950_v38, %v950_v38 }
 0x1a9   : > { %v1070_v44 = vpack.c.bf16 %v1062_v40, %v1062_v40  ;;  %1036 = vrot.lane.b32.xlu2 %v1014_v41, %s3920_s21 }
 0x1aa   : > { %981 = vrot.lane.b32.xlu1 %v958_v42, %s3919_s14  ;;  %1134 = vst.msk [vmem:[#allocation5 + $0x50] sm:$0xf] %vm739_vm5, %v958_v42 }
 0x1ab   : > { %942 = vst.msk [vmem:[#allocation5 + $0x58] sm:$0xf] %vm739_vm5, %v1070_v44 }
 0x1ac   : > { %v3638_v54 = vld [vmem:[#allocation5 + $0x1c] sm:$0xf] }
 0x1b1   : > { %v2970_v46 = vld [vmem:[#allocation5 + $0x50] sm:$0xf]  ;;  %900 = vrot.lane.b32.xlu2 %v1014_v41, %s3921_s22 }
 0x1b2   : > { %1092 = vrot.lane.b32.xlu1 %v1070_v44, %s3921_s22  ;;  %v2971_v47 = vor.u32 %v3646_v45, %v2970_v46  ;;  %v1523_v44 = vld [vmem:[#allocation6 + $0x1] sm:$0x1] }
 0x1b4   : > { %3047 = vmatmul.msk.bf16.gmra.mxu3 %vm631_vm2, %v2971_v47 }
 0x1ba   : > { %898 = vrot.lane.b32.xlu1 %v4319_v8, %s3921_s22  ;;  %v783_v50 = vpop.permute.xlu1 %782 }
 0x1bb   : > { %v1031_v49 = vpop.permute.xlu0 %1030  ;;  %802 = vst.msk [vmem:[#allocation5 + $0x3c] sm:$0xf] %vm796_vm6, %v783_v50 }
 0x1bc   : > { %1051 = vst.msk [vmem:[#allocation5 + $0x28] sm:$0xf] %vm853_vm7, %v1031_v49 }
 0x1bd   : > { %1107 = vst.msk [vmem:[#allocation5 + $0x28] sm:$0xf] %vm910_vm8, %v1087_v48 }
 0x1c2   : > { %v1033_v51 = vpop.permute.xlu2 %1032  ;;  %v895_v53 = vpop.permute.xlu1 %894 }
 0x1c3   : > { %v976_v52 = vpop.permute.xlu0 %975  ;;  %915 = vst.msk [vmem:[#allocation5 + $0x30] sm:$0xf] %vm910_vm8, %v895_v53 }
 0x1c4   : > { %995 = vst.msk [vmem:[#allocation5 + $0x34] sm:$0xf] %vm796_vm6, %v976_v52  ;;  %v2940_v55 = vld [vmem:[#allocation5 + $0x24] sm:$0xf0] }
 0x1c5   : > { %1052 = vst.msk [vmem:[#allocation5 + $0x34] sm:$0xf] %vm853_vm7, %v1033_v51  ;;  %v2943_v56 = vor.u32 %v3638_v54, %v2940_v55 }
 0x1c7   : > { %1414 = vmatmul.bf16.gmra.mxu2 %v2943_v56 }
 0x1ca   : > { %v897_v57 = vpop.permute.xlu2 %896  ;;  %v2950_v59 = vld [vmem:[#allocation5 + $0x30] sm:$0xf] }
 0x1cb   : > { %v840_v58 = vpop.permute.xlu0 %839 }
 0x1cc   : > { %859 = vst.msk [vmem:[#allocation5 + $0x3c] sm:$0xf] %vm853_vm7, %v840_v58 }
 0x1cd   : > { %916 = vst.msk [vmem:[#allocation5 + $0x3c] sm:$0xf] %vm910_vm8, %v897_v57 }
 0x1d2   : > { %v1381_v8 = vpop.f32.mrf.mxu1 }
 0x1d3   : > { %v1382_v14 = vadd.f32 %v4375_v11, %v1381_v8 }
 0x1d4   : > { %v3642_v60 = vld [vmem:[#allocation5 + $0x38] sm:$0xf0] }
 0x1d5   : > { %v2951_v61 = vor.u32 %v3642_v60, %v2950_v59 }
 0x1d7   : > { %1390 = vmatmul.bf16.gmra.mxu1 %v2951_v61  ;;  %v1444_v53 = vpop.f32.mrf.mxu3 }
 0x1da   : > { %v1383_v15 = vpop.f32.mrf.mxu1 }
 0x1db   : > { %v978_v62 = vpop.permute.xlu1 %977  ;;  %v1384_v18 = vadd.f32 %v4375_v11, %v1383_v15 }
 0x1dc   : > { %996 = vst.msk [vmem:[#allocation5 + $0x40] sm:$0xf] %vm796_vm6, %v978_v62 }
 0x1df   : > { %v1446_v62 = vpop.f32.mrf.mxu3 }
 0x1e2   : > { %v1091_v0 = vpop.permute.xlu2 %1090 }
 0x1e3   : > { %v1089_v63 = vpop.permute.xlu1 %1088 }
 0x1e4   : > { %1108 = vst.msk [vmem:[#allocation5 + $0x34] sm:$0xf] %vm910_vm8, %v1089_v63 }
 0x1ea   : > { %v842_v3 = vpop.permute.xlu2 %841 }
 0x1eb   : > { %v3641_v5 = vld [vmem:[#allocation5 + $0x34] sm:$0xf] }
 0x1fa   : > { %v787_v2 = vpop.permute.xlu1 %786 }
 0x1fb   : > { %v1035_v1 = vpop.permute.xlu0 %1034  ;;  %804 = vst.msk [vmem:[#allocation5 + $0x54] sm:$0xf] %vm796_vm6, %v787_v2 }
 0x1fc   : > { %1053 = vst.msk [vmem:[#allocation5 + $0x40] sm:$0xf] %vm853_vm7, %v1035_v1 }
 0x1fd   : > { %1109 = vst.msk [vmem:[#allocation5 + $0x40] sm:$0xf] %vm910_vm8, %v1091_v0 }
 0x203   : > { %v785_v4 = vpop.permute.xlu0 %784  ;;  %v1037_v9 = vpop.permute.xlu2 %1036 }
 0x204   : > { %803 = vst.msk [vmem:[#allocation5 + $0x48] sm:$0xf] %vm796_vm6, %v785_v4  ;;  %v2952_v6 = vld [vmem:[#allocation5 + $0x3c] sm:$0xf0] }
 0x205   : > { %860 = vst.msk [vmem:[#allocation5 + $0x48] sm:$0xf] %vm853_vm7, %v842_v3  ;;  %v2955_v7 = vor.u32 %v3641_v5, %v2952_v6  ;;  %v1540_v6 = vld [vmem:[#allocation6 + $0x2] sm:$0x1] }
 0x207   : > { %1419 = vmatmul.bf16.gmra.mxu2 %v2955_v7 }
 0x20b   : > { %v980_v10 = vpop.permute.xlu0 %979  ;;  %v901_v19 = vpop.permute.xlu2 %900 }
 0x20c   : > { %997 = vst.msk [vmem:[#allocation5 + $0x4c] sm:$0xf] %vm796_vm6, %v980_v10 }
 0x20d   : > { %1054 = vst.msk [vmem:[#allocation5 + $0x4c] sm:$0xf] %vm853_vm7, %v1037_v9 }
 0x20e   : > { %v1410_v13 = vpop.f32.mrf.mxu2 }
 0x20f   : > { %v1411_v16 = vadd.f32 %v1410_v13, %v1382_v14  ;;  %v1562_v13 = vld [vmem:[#allocation6 + $0x3] sm:$0x1] }
 0x211   : > { %v1440_v21 = vadd.f32 %v1439_v12, %v1411_v16 }
 0x213   : > { %v844_v17 = vpop.permute.xlu0 %843  ;;  %v1459_v26 = vmax.f32 %v1440_v21, 0.0 }
 0x214   : > { %861 = vst.msk [vmem:[#allocation5 + $0x54] sm:$0xf] %vm853_vm7, %v844_v17  ;;  %v1386_v52 = vpop.f32.mrf.mxu1 }
 0x215   : > { %918 = vst.msk [vmem:[#allocation5 + $0x54] sm:$0xf] %vm910_vm8, %v901_v19  ;;  %v1387_v55 = vadd.f32 %v4375_v11, %v1386_v52 }
 0x216   : > { %v1412_v20 = vpop.f32.mrf.mxu2 }
 0x217   : > { %v1413_v22 = vadd.f32 %v1412_v20, %v1384_v18  ;;  %v1449_v19 = vpop.f32.mrf.mxu3 }
 0x219   : > { %v1442_v24 = vadd.f32 %v1441_v23, %v1413_v22 }
 0x21b   : > { %v1460_v27 = vmax.f32 %v1442_v24, 0.0 }
 0x21c   : > { %v982_v28 = vpop.permute.xlu1 %981  ;;  %v3645_v48 = vld [vmem:[#allocation5 + $0x50] sm:$0xf0]  ;;  %v1388_v56 = vpop.f32.mrf.mxu1 }
 0x21d   : > { %v1467_v25 = vmax.f32 %v1459_v26, %v1460_v27  ;;  %998 = vst.msk [vmem:[#allocation5 + $0x58] sm:$0xf] %vm796_vm6, %v982_v28  ;;  %v1389_v58 = vadd.f32 %v4375_v11, %v1388_v56 }
 0x21e   : > { %1055 = vst.msk [vmem:[#allocation5 + $0x58] sm:$0xf] %vm853_vm7, %v4224_v39 }
 0x21f   : > { %1472 = vst.msk [vmem:[#allocation4] sm:$0xff] %vm1471_vm9, %v1467_v25  ;;  %v1451_v25 = vpop.f32.mrf.mxu3 }
 0x220   : > { %1111 = vst.msk [vmem:[#allocation5 + $0x58] sm:$0xf] %vm910_vm8, %v4232_v43 }
 0x224   : > { %v1093_v29 = vpop.permute.xlu1 %1092 }
 0x225   : > { %1110 = vst.msk [vmem:[#allocation5 + $0x4c] sm:$0xf] %vm910_vm8, %v1093_v29 }
 0x226   : > { %v1476_v30 = vld [vmem:[#allocation4] ss:$2 sm:$0xf]  ;;  %v1484_v31 = vld [vmem:[#allocation4 + $0x1] ss:$2 sm:$0xf] }
 0x227   : > { %v1491_v32 = vmax.f32 %v1476_v30, %v1484_v31  ;;  %v2964_v38 = vld [vmem:[#allocation5 + $0x54] sm:$0xf0] }
 0x229   : > { %v1495_v39 = vpack.c.bf16 %v1491_v32, %v1491_v32 }
 0x22b   : > { %v1503_v35 = vrot.slane %v1495_v39, 3  ;;  %1519 = vst [vmem:[#allocation1] sm:$0xff] %v1495_v39  ;;  %v1500_v43 = vsel %vm4391_vm12, %v1495_v39, %v1499_v34  ;;  %v3792_v34 = vld [vmem:[%s5345_s5 + $0x3f4] sm:$0xf0] }
 0x22c   : > { %v899_v36 = vpop.permute.xlu1 %898  ;;  %v3644_v37 = vld [vmem:[#allocation5 + $0x4c] sm:$0xf]  ;;  %1501 = vst [vmem:[#allocation6] sm:$0x1] %v1500_v43 }
 0x22d   : > { %917 = vst.msk [vmem:[#allocation5 + $0x48] sm:$0xf] %vm910_vm8, %v899_v36  ;;  %v1506_v40 = vsel %vm466_vm0, %v1495_v39, %v1503_v35  ;;  %v2967_v41 = vor.u32 %v3644_v37, %v2964_v38 }
 0x22e   : > { %v1507_v42 = vshrl.u32 %v1506_v40, 16  ;;  %v1579_v40 = vld [vmem:[#allocation6 + $0x4] sm:$0x1] }
 0x22f   : > { %1424 = vmatmul.bf16.gmra.mxu2 %v2967_v41 }
 0x230   : > { %1511 = vrot.lane.b32.xlu0 %v1507_v42, %s3920_s21 }
 0x232   : > { %v1521_v45 = vld [vmem:[#allocation1 + $0x1] ss:$4 sm:$0xff] }
 0x233   : > { %1526 = vst [vmem:[#allocation1] sm:$0xff] %v1495_v39  ;;  %v1524_v46 = vsel %vm4391_vm12, %v1521_v45, %v1523_v44  ;;  %v1516_v35 = vld [vmem:[#allocation6] sm:$0x1] }
 0x234   : > { %v2962_v47 = vld [vmem:[#allocation5 + $0x48] sm:$0xf]  ;;  %1525 = vst [vmem:[#allocation6 + $0x1] sm:$0x1] %v1524_v46 }
 0x235   : > { %v2963_v49 = vor.u32 %v3645_v48, %v2962_v47  ;;  %v1601_v47 = vld [vmem:[#allocation6 + $0x5] sm:$0x1] }
 0x237   : > { %1395 = vmatmul.bf16.gmra.mxu1 %v2963_v49 }
 0x23a   : > { %v1528_v50 = vld [vmem:[#allocation1 + $0x1] ss:$4 sm:$0xff] }
 0x23b   : > { %v1529_v51 = vshrl.u32 %v1528_v50, 16  ;;  %v1536_v49 = vld [vmem:[#allocation6 + $0x1] sm:$0x1] }
 0x23d   : > { %1533 = vrot.lane.b32.xlu1 %v1529_v51, %s3920_s21 }
 0x24a   : > { %v1415_v54 = vpop.f32.mrf.mxu2 }
 0x24b   : > { %v1416_v57 = vadd.f32 %v1415_v54, %v1387_v55  ;;  %v1454_v55 = vpop.f32.mrf.mxu3 }
 0x24d   : > { %v1445_v60 = vadd.f32 %v1444_v53, %v1416_v57 }
 0x24f   : > { %v1461_v0 = vmax.f32 %v1445_v60, 0.0 }
 0x252   : > { %v1417_v59 = vpop.f32.mrf.mxu2 }
 0x253   : > { %v1418_v61 = vadd.f32 %v1417_v59, %v1389_v58 }
 0x254   : > { %v1391_v18 = vpop.f32.mrf.mxu1 }
 0x255   : > { %v1447_v63 = vadd.f32 %v1446_v62, %v1418_v61  ;;  %v1392_v21 = vadd.f32 %v4375_v11, %v1391_v18  ;;  %v1640_v18 = vld [vmem:[#allocation6 + $0x7] sm:$0x1] }
 0x257   : > { %v1462_v1 = vmax.f32 %v1447_v63, 0.0 }
 0x259   : > { %v1468_v2 = vmax.f32 %v1461_v0, %v1462_v1  ;;  %v1456_v1 = vpop.f32.mrf.mxu3 }
 0x25b   : > { %1473 = vst.msk [vmem:[#allocation4 + $0x8] sm:$0xff] %vm1471_vm9, %v1468_v2 }
 0x25c   : > { %v1393_v22 = vpop.f32.mrf.mxu1 }
 0x25d   : > { %v1394_v24 = vadd.f32 %v4375_v11, %v1393_v22 }
 0x262   : > { %v1478_v3 = vld [vmem:[#allocation4 + $0x8] ss:$2 sm:$0xf]  ;;  %v1486_v4 = vld [vmem:[#allocation4 + $0x9] ss:$2 sm:$0xf] }
 0x263   : > { %v1492_v5 = vmax.f32 %v1478_v3, %v1486_v4 }
 0x265   : > { %v1539_v7 = vpack.c.bf16 %v1492_v5, %v1492_v5 }
 0x267   : > { %v1544_v8 = vrot.slane %v1539_v7, 3  ;;  %1558 = vst [vmem:[#allocation1] sm:$0xff] %v1539_v7  ;;  %v1541_v9 = vsel %vm4391_vm12, %v1539_v7, %v1540_v6 }
 0x268   : > { %1542 = vst [vmem:[#allocation6 + $0x2] sm:$0x1] %v1541_v9 }
 0x269   : > { %v1547_v10 = vsel %vm466_vm0, %v1539_v7, %v1544_v8 }
 0x26a   : > { %v1548_v12 = vshrl.u32 %v1547_v10, 16 }
 0x26c   : > { %1552 = vrot.lane.b32.xlu2 %v1548_v12, %s3920_s21 }
 0x26e   : > { %v1560_v14 = vld [vmem:[#allocation1 + $0x1] ss:$4 sm:$0xff] }
 0x26f   : > { %1565 = vst [vmem:[#allocation1] sm:$0xff] %v1539_v7  ;;  %v1563_v15 = vsel %vm4391_vm12, %v1560_v14, %v1562_v13  ;;  %v1555_v7 = vld [vmem:[#allocation6 + $0x2] sm:$0x1] }
 0x270   : > { %1564 = vst [vmem:[#allocation6 + $0x3] sm:$0x1] %v1563_v15 }
 0x276   : > { %v1567_v16 = vld [vmem:[#allocation1 + $0x1] ss:$4 sm:$0xff] }
 0x277   : > { %v1568_v17 = vshrl.u32 %v1567_v16, 16 }
 0x279   : > { %1572 = vrot.lane.b32.xlu0 %v1568_v17, %s3920_s21 }
 0x28a   : > { %v1420_v20 = vpop.f32.mrf.mxu2 }
 0x28b   : > { %v1421_v23 = vadd.f32 %v1420_v20, %v1392_v21 }
 0x28d   : > { %v1450_v27 = vadd.f32 %v1449_v19, %v1421_v23  ;;  %v1575_v23 = vld [vmem:[#allocation6 + $0x3] sm:$0x1] }
 0x28f   : > { %v1463_v30 = vmax.f32 %v1450_v27, 0.0  ;;  %v3114_v27 = vld [vmem:[%s5345_s5 + $0x70] sm:$0xf] }
 0x292   : > { %v1422_v26 = vpop.f32.mrf.mxu2 }
 0x293   : > { %v1423_v28 = vadd.f32 %v1422_v26, %v1394_v24 }
 0x295   : > { %v1452_v29 = vadd.f32 %v1451_v25, %v1423_v28  ;;  %v3178_v28 = vld [vmem:[%s5345_s5 + $0xf0] sm:$0xf]  ;;  %v3115_v25 = vor.u32 %v3680_v33, %v3114_v27 }
 0x297   : > { %v1464_v31 = vmax.f32 %v1452_v29, 0.0  ;;  %v3696_v29 = vld [vmem:[%s5345_s5 + $0xf4] sm:$0xf0]  ;;  %2449 = vmatpush.bf16.msrb.mxu3 %v3115_v25 }
 0x299   : > { %v1469_v32 = vmax.f32 %v1463_v30, %v1464_v31  ;;  %v3242_v30 = vld [vmem:[%s5345_s5 + $0x170] sm:$0xf]  ;;  %v3712_v31 = vld [vmem:[%s5345_s5 + $0x174] sm:$0xf0] }
 0x29b   : > { %1474 = vst.msk [vmem:[#allocation4 + $0x10] sm:$0xff] %vm1471_vm9, %v1469_v32  ;;  %v3179_v32 = vor.u32 %v3696_v29, %v3178_v28 }
 0x29d   : > { %2462 = vmatpush.bf16.msrb.mxu1 %v3179_v32  ;;  %v3666_v32 = vld [vmem:[%s5345_s5 + $0x4] sm:$0xf0] }
 0x2a2   : > { %v1512_v39 = vpop.permute.xlu0 %1511  ;;  %v1480_v36 = vld [vmem:[#allocation4 + $0x10] ss:$2 sm:$0xf]  ;;  %v1488_v37 = vld [vmem:[#allocation4 + $0x11] ss:$2 sm:$0xf] }
 0x2a3   : > { %v1517_v43 = vsel %vm4417_vm14, %v1512_v39, %v1516_v35  ;;  %v1493_v38 = vmax.f32 %v1480_v36, %v1488_v37  ;;  %v3243_v39 = vor.u32 %v3712_v31, %v3242_v30  ;;  %v3106_v35 = vld [vmem:[%s5345_s5 + $0x60] sm:$0xf] }
 0x2a4   : > { %1518 = vst [vmem:[#allocation6] sm:$0x1] %v1517_v43  ;;  %v3678_v43 = vld [vmem:[%s5345_s5 + $0x64] sm:$0xf0]  ;;  %v3170_v36 = vld [vmem:[%s5345_s5 + $0xe0] sm:$0xf] }
 0x2a5   : > { %v1578_v41 = vpack.c.bf16 %v1493_v38, %v1493_v38  ;;  %v3107_v37 = vor.u32 %v3678_v43, %v3106_v35  ;;  %v3694_v38 = vld [vmem:[%s5345_s5 + $0xe4] sm:$0xf0]  ;;  %2475 = vmatpush.bf16.msrb.mxu2 %v3243_v39  ;;  %v3058_v31 = vld [vmem:[%s5345_s5] sm:$0xf] }
 0x2a6   : > { %v3122_v39 = vld [vmem:[%s5345_s5 + $0x80] sm:$0xf]  ;;  %v3059_v35 = vor.u32 %v3666_v32, %v3058_v31  ;;  %v3682_v43 = vld [vmem:[%s5345_s5 + $0x84] sm:$0xf0]  ;;  %v3258_v31 = vld [vmem:[%s5345_s5 + $0x190] sm:$0xf] }
 0x2a7   : > { %v1583_v42 = vrot.slane %v1578_v41, 3  ;;  %1597 = vst [vmem:[#allocation1] sm:$0xff] %v1578_v41  ;;  %v1580_v44 = vsel %vm4391_vm12, %v1578_v41, %v1579_v40  ;;  %v3234_v40 = vld [vmem:[%s5345_s5 + $0x160] sm:$0xf]  ;;  %2450 = vmatpush.bf16.msrb.mxu3 %v3107_v37  ;;  %v3698_v37 = vld [vmem:[%s5345_s5 + $0x104] sm:$0xf0] }
 0x2a8   : > { %1581 = vst [vmem:[#allocation6 + $0x4] sm:$0x1] %v1580_v44  ;;  %v3716_v32 = vld [vmem:[%s5345_s5 + $0x194] sm:$0xf0] }
 0x2a9   : > { %v1586_v45 = vsel %vm466_vm0, %v1578_v41, %v1583_v42  ;;  %v3171_v42 = vor.u32 %v3694_v38, %v3170_v36  ;;  %v3186_v36 = vld [vmem:[%s5345_s5 + $0x100] sm:$0xf]  ;;  %v3123_v38 = vor.u32 %v3682_v43, %v3122_v39  ;;  %v3322_v39 = vld [vmem:[%s5345_s5 + $0x210] sm:$0xf] }
 0x2aa   : > { %v1587_v46 = vshrl.u32 %v1586_v45, 16  ;;  %v3098_v45 = vld [vmem:[%s5345_s5 + $0x50] sm:$0xf] }
 0x2ab   : > { %2463 = vmatpush.bf16.msrb.mxu1 %v3171_v42  ;;  %v3728_v42 = vld [vmem:[%s5345_s5 + $0x1f4] sm:$0xf0]  ;;  %v3386_v43 = vld [vmem:[%s5345_s5 + $0x290] sm:$0xf] }
 0x2ac   : > { %1591 = vrot.lane.b32.xlu1 %v1587_v46, %s3920_s21  ;;  %v3676_v46 = vld [vmem:[%s5345_s5 + $0x54] sm:$0xf0] }
 0x2ae   : > { %v1599_v50 = vld [vmem:[#allocation1 + $0x1] ss:$4 sm:$0xff] }
 0x2af   : > { %v1534_v48 = vpop.permute.xlu1 %1533  ;;  %1604 = vst [vmem:[#allocation1] sm:$0xff] %v1578_v41  ;;  %v1602_v52 = vsel %vm4391_vm12, %v1599_v50, %v1601_v47  ;;  %v3710_v41 = vld [vmem:[%s5345_s5 + $0x164] sm:$0xf0]  ;;  %v3162_v47 = vld [vmem:[%s5345_s5 + $0xd0] sm:$0xf] }
 0x2b0   : > { %v1537_v51 = vsel %vm4417_vm14, %v1534_v48, %v1536_v49  ;;  %1603 = vst [vmem:[#allocation6 + $0x5] sm:$0x1] %v1602_v52  ;;  %v3235_v44 = vor.u32 %v3710_v41, %v3234_v40  ;;  %v3692_v48 = vld [vmem:[%s5345_s5 + $0xd4] sm:$0xf0]  ;;  %v3226_v49 = vld [vmem:[%s5345_s5 + $0x150] sm:$0xf]  ;;  %v3187_v40 = vor.u32 %v3698_v37, %v3186_v36  ;;  %v3259_v37 = vor.u32 %v3716_v32, %v3258_v31 }
 0x2b1   : > { %1538 = vst [vmem:[#allocation6 + $0x1] sm:$0x1] %v1537_v51  ;;  %v3708_v50 = vld [vmem:[%s5345_s5 + $0x154] sm:$0xf0]  ;;  %v3099_v51 = vor.u32 %v3676_v46, %v3098_v45  ;;  %v3163_v52 = vor.u32 %v3692_v48, %v3162_v47  ;;  %v1594_v25 = vld [vmem:[#allocation6 + $0x4] sm:$0x1] }
 0x2b2   : > { %v1425_v53 = vpop.f32.mrf.mxu2  ;;  %2476 = vmatpush.bf16.msrb.mxu2 %v3235_v44  ;;  %v3306_v41 = vld [vmem:[%s5345_s5 + $0x1f0] sm:$0xf]  ;;  %v3744_v46 = vld [vmem:[%s5345_s5 + $0x274] sm:$0xf0] }
 0x2b3   : > { %2451 = vmatpush.bf16.msrb.mxu3 %v3099_v51  ;;  %2464 = vmatpush.bf16.msrb.mxu1 %v3163_v52  ;;  %v3370_v44 = vld [vmem:[%s5345_s5 + $0x270] sm:$0xf]  ;;  %v3307_v45 = vor.u32 %v3728_v42, %v3306_v41  ;;  %v3760_v48 = vld [vmem:[%s5345_s5 + $0x2f4] sm:$0xf0]  ;;  %v3298_v51 = vld [vmem:[%s5345_s5 + $0x1e0] sm:$0xf] }
 0x2b4   : > { %v1396_v54 = vpop.f32.mrf.mxu1  ;;  %v3434_v47 = vld [vmem:[%s5345_s5 + $0x2f0] sm:$0xf]  ;;  %v3726_v52 = vld [vmem:[%s5345_s5 + $0x1e4] sm:$0xf0]  ;;  %v3748_v36 = vld [vmem:[%s5345_s5 + $0x294] sm:$0xf0] }
 0x2b5   : > { %v1397_v56 = vadd.f32 %v4375_v11, %v1396_v54  ;;  %v3090_v54 = vld [vmem:[%s5345_s5 + $0x40] sm:$0xf]  ;;  %v3714_v42 = vld [vmem:[%s5345_s5 + $0x184] sm:$0xf0]  ;;  %v3466_v31 = vld [vmem:[%s5345_s5 + $0x330] sm:$0xf] }
 0x2b6   : > { %v1606_v57 = vld [vmem:[#allocation1 + $0x1] ss:$4 sm:$0xff] }
 0x2b7   : > { %v1607_v58 = vshrl.u32 %v1606_v57, 16  ;;  %v1426_v59 = vadd.f32 %v1425_v53, %v1397_v56  ;;  %v3227_v53 = vor.u32 %v3708_v50, %v3226_v49  ;;  %v3154_v56 = vld [vmem:[%s5345_s5 + $0xc0] sm:$0xf]  ;;  %v3690_v57 = vld [vmem:[%s5345_s5 + $0xc4] sm:$0xf0]  ;;  %v3371_v49 = vor.u32 %v3744_v46, %v3370_v44 }
 0x2b8   : > { %v3435_v50 = vor.u32 %v3760_v48, %v3434_v47  ;;  %v3250_v41 = vld [vmem:[%s5345_s5 + $0x180] sm:$0xf]  ;;  %v3746_v47 = vld [vmem:[%s5345_s5 + $0x284] sm:$0xf0]  ;;  %v3768_v32 = vld [vmem:[%s5345_s5 + $0x334] sm:$0xf0] }
 0x2b9   : > { %1611 = vrot.lane.b32.xlu2 %v1607_v58, %s3920_s21  ;;  %v1455_v63 = vadd.f32 %v1454_v55, %v1426_v59  ;;  %v3674_v55 = vld [vmem:[%s5345_s5 + $0x44] sm:$0xf0]  ;;  %v3218_v58 = vld [vmem:[%s5345_s5 + $0x140] sm:$0xf]  ;;  %2477 = vmatpush.bf16.msrb.mxu2 %v3227_v53  ;;  %v3251_v48 = vor.u32 %v3714_v42, %v3250_v41 }
 0x2ba   : > { %v1427_v62 = vpop.f32.mrf.mxu2  ;;  %v3706_v59 = vld [vmem:[%s5345_s5 + $0x144] sm:$0xf0]  ;;  %v3362_v53 = vld [vmem:[%s5345_s5 + $0x260] sm:$0xf] }
 0x2bb   : > { %v1465_v3 = vmax.f32 %v1455_v63, 0.0  ;;  %v3082_v63 = vld [vmem:[%s5345_s5 + $0x30] sm:$0xf]  ;;  %v3314_v44 = vld [vmem:[%s5345_s5 + $0x200] sm:$0xf] }
 0x2bc   : > { %v1398_v60 = vpop.f32.mrf.mxu1  ;;  %v3378_v46 = vld [vmem:[%s5345_s5 + $0x280] sm:$0xf] }
 0x2bd   : > { %v1399_v61 = vadd.f32 %v4375_v11, %v1398_v60  ;;  %v1618_v11 = vld [vmem:[#allocation6 + $0x6] sm:$0x1]  ;;  %v3091_v60 = vor.u32 %v3674_v55, %v3090_v54  ;;  %v3299_v54 = vor.u32 %v3726_v52, %v3298_v51  ;;  %v3742_v55 = vld [vmem:[%s5345_s5 + $0x264] sm:$0xf0] }
 0x2bf   : > { %v1428_v0 = vadd.f32 %v1427_v62, %v1399_v61  ;;  %v3155_v61 = vor.u32 %v3690_v57, %v3154_v56  ;;  %v3219_v62 = vor.u32 %v3706_v59, %v3218_v58  ;;  %2452 = vmatpush.bf16.msrb.mxu3 %v3091_v60  ;;  %v3426_v56 = vld [vmem:[%s5345_s5 + $0x2e0] sm:$0xf]  ;;  %v3758_v57 = vld [vmem:[%s5345_s5 + $0x2e4] sm:$0xf0]  ;;  %v3363_v58 = vor.u32 %v3742_v55, %v3362_v53  ;;  %v3290_v60 = vld [vmem:[%s5345_s5 + $0x1d0] sm:$0xf] }
 0x2c0   : > { %v3427_v59 = vor.u32 %v3758_v57, %v3426_v56 }
 0x2c1   : > { %v1457_v2 = vadd.f32 %v1456_v1, %v1428_v0  ;;  %v3672_v0 = vld [vmem:[%s5345_s5 + $0x34] sm:$0xf0]  ;;  %v3146_v1 = vld [vmem:[%s5345_s5 + $0xb0] sm:$0xf]  ;;  %2465 = vmatpush.bf16.msrb.mxu1 %v3155_v61  ;;  %2478 = vmatpush.bf16.msrb.mxu2 %v3219_v62 }
 0x2c2   : > { %v3724_v61 = vld [vmem:[%s5345_s5 + $0x1d4] sm:$0xf0]  ;;  %v3354_v62 = vld [vmem:[%s5345_s5 + $0x250] sm:$0xf] }
 0x2c3   : > { %v1466_v4 = vmax.f32 %v1457_v2, 0.0  ;;  %v3688_v2 = vld [vmem:[%s5345_s5 + $0xb4] sm:$0xf0] }
 0x2c5   : > { %v1470_v5 = vmax.f32 %v1465_v3, %v1466_v4  ;;  %v3210_v3 = vld [vmem:[%s5345_s5 + $0x130] sm:$0xf]  ;;  %v3704_v4 = vld [vmem:[%s5345_s5 + $0x134] sm:$0xf0] }
 0x2c6   : > { %v1553_v6 = vpop.permute.xlu2 %1552 }
 0x2c7   : > { %1475 = vst.msk [vmem:[#allocation4 + $0x18] sm:$0xff] %vm1471_vm9, %v1470_v5  ;;  %v1556_v8 = vsel %vm4417_vm14, %v1553_v6, %v1555_v7  ;;  %v3083_v5 = vor.u32 %v3672_v0, %v3082_v63  ;;  %v3147_v6 = vor.u32 %v3688_v2, %v3146_v1  ;;  %v3211_v7 = vor.u32 %v3704_v4, %v3210_v3  ;;  %v3740_v63 = vld [vmem:[%s5345_s5 + $0x254] sm:$0xf0]  ;;  %v3418_v0 = vld [vmem:[%s5345_s5 + $0x2d0] sm:$0xf] }
 0x2c8   : > { %1557 = vst [vmem:[#allocation6 + $0x2] sm:$0x1] %v1556_v8  ;;  %v3074_v8 = vld [vmem:[%s5345_s5 + $0x20] sm:$0xf]  ;;  %v3756_v1 = vld [vmem:[%s5345_s5 + $0x2d4] sm:$0xf0]  ;;  %v3291_v2 = vor.u32 %v3724_v61, %v3290_v60  ;;  %v3355_v3 = vor.u32 %v3740_v63, %v3354_v62 }
 0x2c9   : > { %2453 = vmatpush.bf16.msrb.mxu3 %v3083_v5  ;;  %2466 = vmatpush.bf16.msrb.mxu1 %v3147_v6  ;;  %v3419_v4 = vor.u32 %v3756_v1, %v3418_v0  ;;  %v3282_v5 = vld [vmem:[%s5345_s5 + $0x1c0] sm:$0xf]  ;;  %v3722_v6 = vld [vmem:[%s5345_s5 + $0x1c4] sm:$0xf0]  ;;  %v3562_v60 = vld [vmem:[%s5345_s5 + $0x3f0] sm:$0xf] }
 0x2ca   : > { %2479 = vmatpush.bf16.msrb.mxu2 %v3211_v7  ;;  %v3346_v7 = vld [vmem:[%s5345_s5 + $0x240] sm:$0xf]  ;;  %v3679_v61 = vld [vmem:[%s5345_s5 + $0x74] sm:$0xf]  ;;  %v3116_v62 = vld [vmem:[%s5345_s5 + $0x78] sm:$0xf0] }
 0x2cb   : > { %v3490_v0 = vld [vmem:[%s5345_s5 + $0x360] sm:$0xf]  ;;  %v3774_v1 = vld [vmem:[%s5345_s5 + $0x364] sm:$0xf0] }
 0x2ce   : > { %v1482_v9 = vld [vmem:[#allocation4 + $0x18] ss:$2 sm:$0xf]  ;;  %v1490_v10 = vld [vmem:[#allocation4 + $0x19] ss:$2 sm:$0xf] }
 0x2cf   : > { %v1494_v12 = vmax.f32 %v1482_v9, %v1490_v10  ;;  %v3670_v9 = vld [vmem:[%s5345_s5 + $0x24] sm:$0xf0]  ;;  %v3138_v10 = vld [vmem:[%s5345_s5 + $0xa0] sm:$0xf] }
 0x2d1   : > { %v1617_v13 = vpack.c.bf16 %v1494_v12, %v1494_v12  ;;  %v3686_v12 = vld [vmem:[%s5345_s5 + $0xa4] sm:$0xf0] }
 0x2d3   : > { %v1622_v14 = vrot.slane %v1617_v13, 3  ;;  %1636 = vst [vmem:[#allocation1] sm:$0xff] %v1617_v13  ;;  %v1619_v15 = vsel %vm4391_vm12, %v1617_v13, %v1618_v11  ;;  %v3202_v11 = vld [vmem:[%s5345_s5 + $0x120] sm:$0xf] }
 0x2d4   : > { %1620 = vst [vmem:[#allocation6 + $0x6] sm:$0x1] %v1619_v15  ;;  %v1614_v15 = vld [vmem:[#allocation6 + $0x5] sm:$0x1] }
 0x2d5   : > { %v1625_v16 = vsel %vm466_vm0, %v1617_v13, %v1622_v14 }
 0x2d6   : > { %v1626_v17 = vshrl.u32 %v1625_v16, 16  ;;  %v3075_v16 = vor.u32 %v3670_v9, %v3074_v8  ;;  %v3283_v8 = vor.u32 %v3722_v6, %v3282_v5  ;;  %v3738_v9 = vld [vmem:[%s5345_s5 + $0x244] sm:$0xf0]  ;;  %v3677_v6 = vld [vmem:[%s5345_s5 + $0x64] sm:$0xf] }
 0x2d7   : > { %v3790_v5 = vld [vmem:[%s5345_s5 + $0x3e4] sm:$0xf0] }
 0x2d8   : > { %1630 = vrot.lane.b32.xlu0 %v1626_v17, %s3920_s21  ;;  %v3066_v17 = vld [vmem:[%s5345_s5 + $0x10] sm:$0xf]  ;;  %2454 = vmatpush.bf16.msrb.mxu3 %v3075_v16 }
 0x2d9   : > { %v3338_v16 = vld [vmem:[%s5345_s5 + $0x230] sm:$0xf] }
 0x2da   : > { %v1638_v19 = vld [vmem:[#allocation1 + $0x1] ss:$4 sm:$0xff] }
 0x2db   : > { %1643 = vst [vmem:[#allocation1] sm:$0xff] %v1617_v13  ;;  %v1641_v20 = vsel %vm4391_vm12, %v1638_v19, %v1640_v18  ;;  %v3702_v13 = vld [vmem:[%s5345_s5 + $0x124] sm:$0xf0]  ;;  %v3139_v19 = vor.u32 %v3686_v12, %v3138_v10  ;;  %v3410_v10 = vld [vmem:[%s5345_s5 + $0x2c0] sm:$0xf] }
 0x2dc   : > { %1642 = vst [vmem:[#allocation6 + $0x7] sm:$0x1] %v1641_v20  ;;  %v3203_v20 = vor.u32 %v3702_v13, %v3202_v11  ;;  %v3754_v12 = vld [vmem:[%s5345_s5 + $0x2c4] sm:$0xf0]  ;;  %v3347_v11 = vor.u32 %v3738_v9, %v3346_v7  ;;  %v1633_v51 = vld [vmem:[#allocation6 + $0x6] sm:$0x1] }
 0x2dd   : > { %2467 = vmatpush.bf16.msrb.mxu1 %v3139_v19  ;;  %v3411_v13 = vor.u32 %v3754_v12, %v3410_v10  ;;  %v3402_v19 = vld [vmem:[%s5345_s5 + $0x2b0] sm:$0xf]  ;;  %v3108_v7 = vld [vmem:[%s5345_s5 + $0x68] sm:$0xf0]  ;;  %v3491_v12 = vor.u32 %v3774_v1, %v3490_v0  ;;  %v3506_v0 = vld [vmem:[%s5345_s5 + $0x380] sm:$0xf] }
 0x2de   : > { %2480 = vmatpush.bf16.msrb.mxu2 %v3203_v20  ;;  %v3752_v20 = vld [vmem:[%s5345_s5 + $0x2b4] sm:$0xf0]  ;;  %v3778_v1 = vld [vmem:[%s5345_s5 + $0x384] sm:$0xf0] }
 0x2e2   : > { %v1645_v21 = vld [vmem:[#allocation1 + $0x1] ss:$4 sm:$0xff] }
 0x2e3   : > { %v1646_v22 = vshrl.u32 %v1645_v21, 16  ;;  %v3668_v21 = vld [vmem:[%s5345_s5 + $0x14] sm:$0xf0] }
 0x2e4   : > { %v3067_v27 = vor.u32 %v3668_v21, %v3066_v17 }
 0x2e5   : > { %1650 = vrot.lane.b32.xlu1 %v1646_v22, %s3920_s21  ;;  %v3130_v22 = vld [vmem:[%s5345_s5 + $0x90] sm:$0xf]  ;;  %s323_s21 = sand.u32 1, %s3908_s10  }
 0x2e6   : > { %2455 = vmatpush.bf16.msrb.mxu3 %v3067_v27  ;;  %s324_s23 = scalar_lea.vmem [#allocation7], %s323_s21  ;;  %s2818_s26 = scalar_lea.sflag [#allocation8], %s323_s21 }
 0x2e7   : > { %s2828_s24 = sshll.u32 %s324_s23, 4  ;;  %s2829_s24 = int_to_ptr.vmem [resolvable:$true] %s2828_s24 }
 0x2ea   : > { %2456 = vmatpush.bf16.msrb.mxu3 %v3059_v35  ;;  %v3732_v35 = vld [vmem:[%s5345_s5 + $0x214] sm:$0xf0] }
 0x2eb   : > { %v1573_v24 = vpop.permute.xlu0 %1572 }
 0x2ec   : > { %v1576_v26 = vsel %vm4417_vm14, %v1573_v24, %v1575_v23  ;;  %v3684_v23 = vld [vmem:[%s5345_s5 + $0x94] sm:$0xf0]  ;;  %v3194_v24 = vld [vmem:[%s5345_s5 + $0x110] sm:$0xf] }
 0x2ed   : > { %1577 = vst [vmem:[#allocation6 + $0x3] sm:$0x1] %v1576_v26  ;;  %v3700_v26 = vld [vmem:[%s5345_s5 + $0x114] sm:$0xf0]  ;;  %v3131_v33 = vor.u32 %v3684_v23, %v3130_v22  ;;  %v3403_v22 = vor.u32 %v3752_v20, %v3402_v19  ;;  %v3266_v23 = vld [vmem:[%s5345_s5 + $0x1a0] sm:$0xf] }
 0x2ee   : > { %v3195_v28 = vor.u32 %v3700_v26, %v3194_v24  ;;  %2488 = vmatpush.bf16.msra.mxu3 %v3307_v45  ;;  %v3718_v24 = vld [vmem:[%s5345_s5 + $0x1a4] sm:$0xf0]  ;;  %v3330_v26 = vld [vmem:[%s5345_s5 + $0x220] sm:$0xf]  ;;  %v3100_v19 = vld [vmem:[%s5345_s5 + $0x58] sm:$0xf0] }
 0x2ef   : > { %2468 = vmatpush.bf16.msrb.mxu1 %v3131_v33  ;;  %v3267_v27 = vor.u32 %v3718_v24, %v3266_v23  ;;  %v3734_v33 = vld [vmem:[%s5345_s5 + $0x224] sm:$0xf0]  ;;  %v3474_v23 = vld [vmem:[%s5345_s5 + $0x340] sm:$0xf] }
 0x2f0   : > { %2481 = vmatpush.bf16.msrb.mxu2 %v3195_v28  ;;  %v3394_v28 = vld [vmem:[%s5345_s5 + $0x2a0] sm:$0xf]  ;;  %v3730_v45 = vld [vmem:[%s5345_s5 + $0x204] sm:$0xf0] }
 0x2f1   : > { %v3770_v24 = vld [vmem:[%s5345_s5 + $0x344] sm:$0xf0] }
 0x2f2   : > { %2489 = vmatpush.bf16.msra.mxu3 %v3299_v54  ;;  %v1653_v54 = vld [vmem:[#allocation6 + $0x7] sm:$0x1] }
 0x2f3   : > { %2469 = vmatpush.bf16.msrb.mxu1 %v3123_v38  ;;  %v3323_v38 = vor.u32 %v3732_v35, %v3322_v39  ;;  %v3530_v39 = vld [vmem:[%s5345_s5 + $0x3b0] sm:$0xf]  ;;  %v3784_v35 = vld [vmem:[%s5345_s5 + $0x3b4] sm:$0xf0] }
 0x2f4   : > { %2482 = vmatpush.bf16.msrb.mxu2 %v3187_v40  ;;  %v3387_v40 = vor.u32 %v3748_v36, %v3386_v43  ;;  %v3671_v43 = vld [vmem:[%s5345_s5 + $0x34] sm:$0xf]  ;;  %v3084_v36 = vld [vmem:[%s5345_s5 + $0x38] sm:$0xf0]  ;;  %v3531_v41 = vor.u32 %v3784_v35, %v3530_v39 }
 0x2f5   : > { %v3087_v42 = vor.u32 %v3671_v43, %v3084_v36  ;;  %v3723_v39 = vld [vmem:[%s5345_s5 + $0x1d4] sm:$0xf]  ;;  %v3292_v35 = vld [vmem:[%s5345_s5 + $0x1d8] sm:$0xf0] }
 0x2f6   : > { %2490 = vmatpush.bf16.msra.mxu3 %v3291_v2  ;;  %v3554_v2 = vld [vmem:[%s5345_s5 + $0x3e0] sm:$0xf] }
 0x2f7   : > { %2501 = vmatpush.bf16.msra.mxu1 %v3371_v49  ;;  %v3315_v49 = vor.u32 %v3730_v45, %v3314_v44  ;;  %v3522_v44 = vld [vmem:[%s5345_s5 + $0x3a0] sm:$0xf]  ;;  %v3782_v45 = vld [vmem:[%s5345_s5 + $0x3a4] sm:$0xf0] }
 0x2f8   : > { %2514 = vmatpush.bf16.msra.mxu2 %v3435_v50  ;;  %v3379_v50 = vor.u32 %v3746_v47, %v3378_v46  ;;  %v3669_v46 = vld [vmem:[%s5345_s5 + $0x24] sm:$0xf] }
 0x2fa   : > { %2491 = vmatpush.bf16.msra.mxu3 %v3283_v8 }
 0x2fb   : > { %2502 = vmatpush.bf16.msra.mxu1 %v3363_v58  ;;  %v3498_v58 = vld [vmem:[%s5345_s5 + $0x370] sm:$0xf] }
 0x2fc   : > { %2515 = vmatpush.bf16.msra.mxu2 %v3427_v59  ;;  %v3776_v59 = vld [vmem:[%s5345_s5 + $0x374] sm:$0xf0] }
 0x2fd   : > { %v3499_v63 = vor.u32 %v3776_v59, %v3498_v58  ;;  %v3667_v58 = vld [vmem:[%s5345_s5 + $0x14] sm:$0xf]  ;;  %v3068_v59 = vld [vmem:[%s5345_s5 + $0x18] sm:$0xf0] }
 0x2ff   : > { %2503 = vmatpush.bf16.msra.mxu1 %v3355_v3  ;;  %v3563_v3 = vor.u32 %v3792_v34, %v3562_v60  ;;  %v3442_v34 = vld [vmem:[%s5345_s5 + $0x300] sm:$0xf] }
 0x300   : > { %2516 = vmatpush.bf16.msra.mxu2 %v3419_v4  ;;  %v3119_v4 = vor.u32 %v3679_v61, %v3116_v62  ;;  %v3071_v62 = vor.u32 %v3667_v58, %v3068_v59  ;;  %v3685_v59 = vld [vmem:[%s5345_s5 + $0xa4] sm:$0xf] }
 0x303   : > { %2504 = vmatpush.bf16.msra.mxu1 %v3347_v11  ;;  %v3555_v11 = vor.u32 %v3790_v5, %v3554_v2  ;;  %v3665_v2 = vld [vmem:[%s5345_s5 + $0x4] sm:$0xf]  ;;  %v3180_v5 = vld [vmem:[%s5345_s5 + $0xf8] sm:$0xf0] }
 0x304   : > { %2517 = vmatpush.bf16.msra.mxu2 %v3411_v13  ;;  %v3111_v13 = vor.u32 %v3677_v6, %v3108_v7  ;;  %v3711_v6 = vld [vmem:[%s5345_s5 + $0x174] sm:$0xf]  ;;  %v3244_v7 = vld [vmem:[%s5345_s5 + $0x178] sm:$0xf0] }
 0x308   : > { %2518 = vmatpush.bf16.msra.mxu2 %v3403_v22 }
 0x313   : > { %v1612_v14 = vpop.permute.xlu2 %1611 }
 0x314   : > { %v1615_v18 = vsel %vm4417_vm14, %v1612_v14, %v1614_v15  ;;  %v3274_v14 = vld [vmem:[%s5345_s5 + $0x1b0] sm:$0xf]  ;;  %v3720_v15 = vld [vmem:[%s5345_s5 + $0x1b4] sm:$0xf0] }
 0x315   : > { %1616 = vst [vmem:[#allocation6 + $0x5] sm:$0x1] %v1615_v18  ;;  %v3275_v17 = vor.u32 %v3720_v15, %v3274_v14  ;;  %v3736_v18 = vld [vmem:[%s5345_s5 + $0x234] sm:$0xf0]  ;;  %v3482_v14 = vld [vmem:[%s5345_s5 + $0x350] sm:$0xf] }
 0x316   : > { %v3339_v21 = vor.u32 %v3736_v18, %v3338_v16  ;;  %v3772_v15 = vld [vmem:[%s5345_s5 + $0x354] sm:$0xf0]  ;;  %v3546_v16 = vld [vmem:[%s5345_s5 + $0x3d0] sm:$0xf]  ;;  %v3675_v18 = vld [vmem:[%s5345_s5 + $0x54] sm:$0xf] }
 0x317   : > { %2492 = vmatpush.bf16.msra.mxu3 %v3275_v17  ;;  %v3788_v17 = vld [vmem:[%s5345_s5 + $0x3d4] sm:$0xf0]  ;;  %v3483_v20 = vor.u32 %v3772_v15, %v3482_v14  ;;  %v3103_v22 = vor.u32 %v3675_v18, %v3100_v19  ;;  %v3507_v14 = vor.u32 %v3778_v1, %v3506_v0  ;;  %v3693_v18 = vld [vmem:[%s5345_s5 + $0xe4] sm:$0xf]  ;;  %v3268_v0 = vld [vmem:[%s5345_s5 + $0x1a8] sm:$0xf0] }
 0x318   : > { %2505 = vmatpush.bf16.msra.mxu1 %v3339_v21  ;;  %v3547_v21 = vor.u32 %v3788_v17, %v3546_v16  ;;  %v3247_v17 = vor.u32 %v3711_v6, %v3244_v7  ;;  %v3699_v6 = vld [vmem:[%s5345_s5 + $0x114] sm:$0xf]  ;;  %v3196_v7 = vld [vmem:[%s5345_s5 + $0x118] sm:$0xf0] }
 0x31b   : > { %2493 = vmatpush.bf16.msra.mxu3 %v3267_v27  ;;  %v3786_v27 = vld [vmem:[%s5345_s5 + $0x3c4] sm:$0xf0] }
 0x31e   : > { %v1592_v29 = vpop.permute.xlu1 %1591 }
 0x31f   : > { %v1595_v30 = vsel %vm4417_vm14, %v1592_v29, %v1594_v25  ;;  %v3750_v25 = vld [vmem:[%s5345_s5 + $0x2a4] sm:$0xf0]  ;;  %v3331_v29 = vor.u32 %v3734_v33, %v3330_v26  ;;  %2494 = vmatpush.bf16.msra.mxu3 %v3259_v37  ;;  %v3538_v26 = vld [vmem:[%s5345_s5 + $0x3c0] sm:$0xf]  ;;  %v3673_v33 = vld [vmem:[%s5345_s5 + $0x44] sm:$0xf]  ;;  %v3467_v37 = vor.u32 %v3768_v32, %v3466_v31 }
 0x320   : > { %1596 = vst [vmem:[#allocation6 + $0x4] sm:$0x1] %v1595_v30  ;;  %v3395_v30 = vor.u32 %v3750_v25, %v3394_v28  ;;  %v3092_v28 = vld [vmem:[%s5345_s5 + $0x48] sm:$0xf0]  ;;  %v3475_v25 = vor.u32 %v3770_v24, %v3474_v23  ;;  %v3725_v23 = vld [vmem:[%s5345_s5 + $0x1e4] sm:$0xf] }
 0x321   : > { %2506 = vmatpush.bf16.msra.mxu1 %v3331_v29  ;;  %v3539_v29 = vor.u32 %v3786_v27, %v3538_v26  ;;  %v3300_v24 = vld [vmem:[%s5345_s5 + $0x1e8] sm:$0xf0]  ;;  %v3707_v31 = vld [vmem:[%s5345_s5 + $0x154] sm:$0xf]  ;;  %v3228_v32 = vld [vmem:[%s5345_s5 + $0x158] sm:$0xf0] }
 0x322   : > { %2519 = vmatpush.bf16.msra.mxu2 %v3395_v30  ;;  %v3095_v30 = vor.u32 %v3673_v33, %v3092_v28  ;;  %v3231_v36 = vor.u32 %v3707_v31, %v3228_v32 }
 0x323   : > { %2495 = vmatpush.bf16.msra.mxu3 %v3251_v48 }
 0x325   : > { %2507 = vmatpush.bf16.msra.mxu1 %v3323_v38  ;;  %v3458_v38 = vld [vmem:[%s5345_s5 + $0x320] sm:$0xf] }
 0x326   : > { %2520 = vmatpush.bf16.msra.mxu2 %v3387_v40  ;;  %v3766_v40 = vld [vmem:[%s5345_s5 + $0x324] sm:$0xf0] }
 0x329   : > { %2508 = vmatpush.bf16.msra.mxu1 %v3315_v49  ;;  %v3076_v49 = vld [vmem:[%s5345_s5 + $0x28] sm:$0xf0] }
 0x32a   : > { %2521 = vmatpush.bf16.msra.mxu2 %v3379_v50 }
 0x34a   : > { %v1631_v52 = vpop.permute.xlu0 %1630 }
 0x34b   : > { %v1634_v53 = vsel %vm4417_vm14, %v1631_v52, %v1633_v51  ;;  %v3459_v51 = vor.u32 %v3766_v40, %v3458_v38  ;;  %v3523_v52 = vor.u32 %v3782_v45, %v3522_v44  ;;  %v3295_v38 = vor.u32 %v3723_v39, %v3292_v35  ;;  %v3705_v40 = vld [vmem:[%s5345_s5 + $0x144] sm:$0xf]  ;;  %v3284_v44 = vld [vmem:[%s5345_s5 + $0x1c8] sm:$0xf0] }
 0x34c   : > { %1635 = vst [vmem:[#allocation6 + $0x6] sm:$0x1] %v1634_v53  ;;  %v3079_v53 = vor.u32 %v3669_v46, %v3076_v49  ;;  %v3687_v49 = vld [vmem:[%s5345_s5 + $0xb4] sm:$0xf] }
 0x357   : > { %v1651_v55 = vpop.permute.xlu1 %1650 }
 0x358   : > { %v1654_v56 = vsel %vm4417_vm14, %v1651_v55, %v1653_v54  ;;  %v3450_v54 = vld [vmem:[%s5345_s5 + $0x310] sm:$0xf]  ;;  %v3764_v55 = vld [vmem:[%s5345_s5 + $0x314] sm:$0xf0] }
 0x359   : > { %1655 = vst [vmem:[#allocation6 + $0x7] sm:$0x1] %v1654_v56  ;;  %v3514_v56 = vld [vmem:[%s5345_s5 + $0x390] sm:$0xf]  ;;  %v3451_v60 = vor.u32 %v3764_v55, %v3450_v54  ;;  %v3212_v54 = vld [vmem:[%s5345_s5 + $0x138] sm:$0xf0] }
 0x35a   : > { %v3719_v55 = vld [vmem:[%s5345_s5 + $0x1b4] sm:$0xf] }
 0x360   : > { %v1656_v57 = vld [vmem:[#allocation6] sm:$0xff] }
 0x361   : > { %1787 = vst [vmem:[#allocation1] ss:$9 sm:$0xff] %v1656_v57  ;;  %v3780_v57 = vld [vmem:[%s5345_s5 + $0x394] sm:$0xf0] }
 0x362   : > { %v3515_v61 = vor.u32 %v3780_v57, %v3514_v56  ;;  %v3276_v56 = vld [vmem:[%s5345_s5 + $0x1b8] sm:$0xf0] }
 0x368   : > { %v4778_v8 = vld [vmem:[#allocation1] sm:$0xff]  ;;  %v4780_v9 = vld [vmem:[#allocation1 + $0x9] sm:$0xff]  ;;  %v4782_v10 = vld [vmem:[#allocation1 + $0x12] sm:$0xff] }
 0x369   : > { %2457 = vmatmul.bf16.vlgmr.msrb.gmra.mxu3 %v4778_v8  ;;  %2470 = vmatmul.bf16.vlgmr.msrb.gmra.mxu1 %v4780_v9  ;;  %v4856_v47 = vld [vmem:[#allocation1 + $0x1b] sm:$0xff]  ;;  %v4858_v48 = vld [vmem:[#allocation1 + $0x24] sm:$0xff]  ;;  %v4865_v50 = vld [vmem:[#allocation1 + $0x2d] sm:$0xff] }
 0x36a   : > { %2483 = vmatmul.bf16.vlgmr.msrb.gmra.mxu2 %v4782_v10  ;;  %2527 = vmatpush.bf16.msrb.mxu3 %v3499_v63  ;;  %v3762_v63 = vld [vmem:[%s5345_s5 + $0x304] sm:$0xf0]  ;;  %v4940_v26 = vld [vmem:[#allocation1 + $0x36] sm:$0xff]  ;;  %v4942_v27 = vld [vmem:[#allocation1 + $0x3f] sm:$0xff] }
 0x36b   : > { %2540 = vmatpush.bf16.msrb.mxu1 %v3563_v3  ;;  %2553 = vmatpush.bf16.msrb.mxu2 %v3119_v4  ;;  %v3060_v3 = vld [vmem:[%s5345_s5 + $0x8] sm:$0xf0]  ;;  %v3695_v4 = vld [vmem:[%s5345_s5 + $0xf4] sm:$0xf] }
 0x36c   : > { %v3063_v15 = vor.u32 %v3665_v2, %v3060_v3  ;;  %v3183_v16 = vor.u32 %v3695_v4, %v3180_v5  ;;  %v3683_v3 = vld [vmem:[%s5345_s5 + $0x94] sm:$0xf]  ;;  %v3132_v5 = vld [vmem:[%s5345_s5 + $0x98] sm:$0xf0] }
 0x36e   : > { %2528 = vmatpush.bf16.msrb.mxu3 %v3491_v12  ;;  %v3443_v12 = vor.u32 %v3762_v63, %v3442_v34  ;;  %v3140_v34 = vld [vmem:[%s5345_s5 + $0xa8] sm:$0xf0]  ;;  %v3717_v63 = vld [vmem:[%s5345_s5 + $0x1a4] sm:$0xf] }
 0x36f   : > { %2541 = vmatpush.bf16.msrb.mxu1 %v3555_v11  ;;  %2554 = vmatpush.bf16.msrb.mxu2 %v3111_v13  ;;  %v3727_v11 = vld [vmem:[%s5345_s5 + $0x1f4] sm:$0xf]  ;;  %v3308_v13 = vld [vmem:[%s5345_s5 + $0x1f8] sm:$0xf0]  ;;  %v3143_v1 = vor.u32 %v3685_v59, %v3140_v34  ;;  %v3271_v4 = vor.u32 %v3717_v63, %v3268_v0  ;;  %v3476_v59 = vld [vmem:[%s5345_s5 + $0x348] sm:$0xf0] }
 0x370   : > { %v3311_v19 = vor.u32 %v3727_v11, %v3308_v13  ;;  %v3260_v11 = vld [vmem:[%s5345_s5 + $0x198] sm:$0xf0]  ;;  %v3135_v13 = vor.u32 %v3683_v3, %v3132_v5  ;;  %v3751_v0 = vld [vmem:[%s5345_s5 + $0x2b4] sm:$0xf] }
 0x371   : > { %v3340_v63 = vld [vmem:[%s5345_s5 + $0x238] sm:$0xf0] }
 0x372   : > { %2529 = vmatpush.bf16.msrb.mxu3 %v3483_v20  ;;  %v3172_v20 = vld [vmem:[%s5345_s5 + $0xe8] sm:$0xf0]  ;;  %v3468_v3 = vld [vmem:[%s5345_s5 + $0x338] sm:$0xf0] }
 0x373   : > { %2542 = vmatpush.bf16.msrb.mxu1 %v3547_v21  ;;  %2555 = vmatpush.bf16.msrb.mxu2 %v3103_v22  ;;  %v3709_v21 = vld [vmem:[%s5345_s5 + $0x164] sm:$0xf]  ;;  %v3236_v22 = vld [vmem:[%s5345_s5 + $0x168] sm:$0xf0]  ;;  %v3175_v33 = vor.u32 %v3693_v18, %v3172_v20 }
 0x374   : > { %v3239_v28 = vor.u32 %v3709_v21, %v3236_v22  ;;  %v3713_v20 = vld [vmem:[%s5345_s5 + $0x184] sm:$0xf]  ;;  %v3252_v21 = vld [vmem:[%s5345_s5 + $0x188] sm:$0xf0]  ;;  %v3743_v22 = vld [vmem:[%s5345_s5 + $0x274] sm:$0xf] }
 0x375   : > { %v3255_v31 = vor.u32 %v3713_v20, %v3252_v21  ;;  %v3324_v20 = vld [vmem:[%s5345_s5 + $0x218] sm:$0xf0]  ;;  %v3747_v21 = vld [vmem:[%s5345_s5 + $0x294] sm:$0xf] }
 0x376   : > { %2530 = vmatpush.bf16.msrb.mxu3 %v3475_v25  ;;  %v3691_v25 = vld [vmem:[%s5345_s5 + $0xd4] sm:$0xf] }
 0x377   : > { %2543 = vmatpush.bf16.msrb.mxu1 %v3539_v29  ;;  %2556 = vmatpush.bf16.msrb.mxu2 %v3095_v30  ;;  %v3303_v29 = vor.u32 %v3725_v23, %v3300_v24  ;;  %v3164_v30 = vld [vmem:[%s5345_s5 + $0xd8] sm:$0xf0]  ;;  %v3759_v24 = vld [vmem:[%s5345_s5 + $0x2f4] sm:$0xf] }
 0x378   : > { %v3167_v43 = vor.u32 %v3691_v25, %v3164_v30  ;;  %v3372_v23 = vld [vmem:[%s5345_s5 + $0x278] sm:$0xf0] }
 0x379   : > { %2496 = vmatmul.bf16.vlgmr.msra.gmra.mxu3 %v4856_v47  ;;  %2509 = vmatmul.bf16.vlgmr.msra.gmra.mxu1 %v4858_v48  ;;  %v3500_v25 = vld [vmem:[%s5345_s5 + $0x378] sm:$0xf0]  ;;  %v3375_v32 = vor.u32 %v3743_v22, %v3372_v23  ;;  %v3763_v23 = vld [vmem:[%s5345_s5 + $0x314] sm:$0xf] }
 0x37a   : > { %2522 = vmatmul.bf16.vlgmr.msra.gmra.mxu2 %v4865_v50  ;;  %2531 = vmatpush.bf16.msrb.mxu3 %v3467_v37  ;;  %v3689_v37 = vld [vmem:[%s5345_s5 + $0xc4] sm:$0xf]  ;;  %v3388_v22 = vld [vmem:[%s5345_s5 + $0x298] sm:$0xf0] }
 0x37b   : > { %2544 = vmatpush.bf16.msrb.mxu1 %v3531_v41  ;;  %2557 = vmatpush.bf16.msrb.mxu2 %v3087_v42  ;;  %v3220_v41 = vld [vmem:[%s5345_s5 + $0x148] sm:$0xf0]  ;;  %v3721_v42 = vld [vmem:[%s5345_s5 + $0x1c4] sm:$0xf] }
 0x37c   : > { %v3223_v46 = vor.u32 %v3705_v40, %v3220_v41  ;;  %v3492_v40 = vld [vmem:[%s5345_s5 + $0x368] sm:$0xf0] }
 0x37e   : > { %2532 = vmatpush.bf16.msrb.mxu3 %v3459_v51  ;;  %v3287_v51 = vor.u32 %v3721_v42, %v3284_v44 }
 0x37f   : > { %2545 = vmatpush.bf16.msrb.mxu1 %v3523_v52  ;;  %2558 = vmatpush.bf16.msrb.mxu2 %v3079_v53  ;;  %v3148_v52 = vld [vmem:[%s5345_s5 + $0xb8] sm:$0xf0]  ;;  %v3703_v53 = vld [vmem:[%s5345_s5 + $0x134] sm:$0xf] }
 0x380   : > { %v3151_v57 = vor.u32 %v3687_v49, %v3148_v52  ;;  %v3215_v58 = vor.u32 %v3703_v53, %v3212_v54  ;;  %v3755_v49 = vld [vmem:[%s5345_s5 + $0x2d4] sm:$0xf]  ;;  %v3484_v53 = vld [vmem:[%s5345_s5 + $0x358] sm:$0xf0] }
 0x381   : > { %v3771_v52 = vld [vmem:[%s5345_s5 + $0x354] sm:$0xf] }
 0x382   : > { %2533 = vmatpush.bf16.msrb.mxu3 %v3451_v60  ;;  %v3279_v60 = vor.u32 %v3719_v55, %v3276_v56  ;;  %v3737_v55 = vld [vmem:[%s5345_s5 + $0x244] sm:$0xf]  ;;  %v3348_v56 = vld [vmem:[%s5345_s5 + $0x248] sm:$0xf0] }
 0x383   : > { %2546 = vmatpush.bf16.msrb.mxu1 %v3515_v61  ;;  %2559 = vmatpush.bf16.msrb.mxu2 %v3071_v62  ;;  %v3701_v61 = vld [vmem:[%s5345_s5 + $0x124] sm:$0xf]  ;;  %v3204_v62 = vld [vmem:[%s5345_s5 + $0x128] sm:$0xf0] }
 0x384   : > { %v3207_v2 = vor.u32 %v3701_v61, %v3204_v62  ;;  %v3735_v62 = vld [vmem:[%s5345_s5 + $0x234] sm:$0xf] }
 0x386   : > { %2534 = vmatpush.bf16.msrb.mxu3 %v3443_v12  ;;  %v3715_v12 = vld [vmem:[%s5345_s5 + $0x194] sm:$0xf] }
 0x387   : > { %2547 = vmatpush.bf16.msrb.mxu1 %v3507_v14  ;;  %2560 = vmatpush.bf16.msrb.mxu2 %v3063_v15  ;;  %v3199_v14 = vor.u32 %v3699_v6, %v3196_v7  ;;  %v3681_v15 = vld [vmem:[%s5345_s5 + $0x84] sm:$0xf]  ;;  %v3263_v18 = vor.u32 %v3715_v12, %v3260_v11  ;;  %v3332_v12 = vld [vmem:[%s5345_s5 + $0x228] sm:$0xf0] }
 0x388   : > { %v3733_v7 = vld [vmem:[%s5345_s5 + $0x224] sm:$0xf] }
 0x389   : > { %2535 = vmatmul.bf16.vlgmr.msrb.gmra.mxu3 %v4940_v26  ;;  %v3749_v11 = vld [vmem:[%s5345_s5 + $0x2a4] sm:$0xf] }
 0x38a   : > { %2566 = vmatpush.bf16.msra.mxu3 %v3183_v16  ;;  %2548 = vmatmul.bf16.vlgmr.msrb.gmra.mxu1 %v4942_v27  ;;  %v3124_v16 = vld [vmem:[%s5345_s5 + $0x88] sm:$0xf0] }
 0x38b   : > { %2579 = vmatpush.bf16.msra.mxu1 %v3247_v17  ;;  %2592 = vmatpush.bf16.msra.mxu2 %v3311_v19  ;;  %v3697_v17 = vld [vmem:[%s5345_s5 + $0x104] sm:$0xf]  ;;  %v3188_v19 = vld [vmem:[%s5345_s5 + $0x108] sm:$0xf0] }
 0x38c   : > { %2561 = vmatmul.bf16.vlgmr.msrb.gmra.mxu2 %v4778_v8  ;;  %v3156_v8 = vld [vmem:[%s5345_s5 + $0xc8] sm:$0xf0]  ;;  %v3191_v30 = vor.u32 %v3697_v17, %v3188_v19  ;;  %v3731_v19 = vld [vmem:[%s5345_s5 + $0x214] sm:$0xf] }
 0x38d   : > { %v3159_v45 = vor.u32 %v3689_v37, %v3156_v8  ;;  %v3757_v37 = vld [vmem:[%s5345_s5 + $0x2e4] sm:$0xf] }
 0x38e   : > { %2567 = vmatpush.bf16.msra.mxu3 %v3175_v33  ;;  %v3436_v33 = vld [vmem:[%s5345_s5 + $0x2f8] sm:$0xf0]  ;;  %v3773_v8 = vld [vmem:[%s5345_s5 + $0x364] sm:$0xf] }
 0x38f   : > { %2580 = vmatpush.bf16.msra.mxu1 %v3239_v28  ;;  %2593 = vmatpush.bf16.msra.mxu2 %v3303_v29  ;;  %v3775_v28 = vld [vmem:[%s5345_s5 + $0x374] sm:$0xf]  ;;  %v3127_v29 = vor.u32 %v3681_v15, %v3124_v16  ;;  %v3439_v39 = vor.u32 %v3759_v24, %v3436_v33  ;;  %v3495_v44 = vor.u32 %v3773_v8, %v3492_v40  ;;  %v3460_v15 = vld [vmem:[%s5345_s5 + $0x328] sm:$0xf0]  ;;  %v3452_v24 = vld [vmem:[%s5345_s5 + $0x318] sm:$0xf0] }
 0x390   : > { %v3503_v35 = vor.u32 %v3775_v28, %v3500_v25  ;;  %v3335_v16 = vor.u32 %v3733_v7, %v3332_v12  ;;  %v3327_v33 = vor.u32 %v3731_v19, %v3324_v20  ;;  %v3391_v28 = vor.u32 %v3747_v21, %v3388_v22 }
 0x391   : > { %v3455_v25 = vor.u32 %v3763_v23, %v3452_v24 }
 0x392   : > { %2568 = vmatpush.bf16.msra.mxu3 %v3167_v43  ;;  %v3741_v43 = vld [vmem:[%s5345_s5 + $0x264] sm:$0xf] }
 0x393   : > { %2581 = vmatpush.bf16.msra.mxu1 %v3231_v36  ;;  %2594 = vmatpush.bf16.msra.mxu2 %v3295_v38  ;;  %v3364_v36 = vld [vmem:[%s5345_s5 + $0x268] sm:$0xf0] }
 0x394   : > { %v3428_v38 = vld [vmem:[%s5345_s5 + $0x2e8] sm:$0xf0]  ;;  %v3367_v41 = vor.u32 %v3741_v43, %v3364_v36  ;;  %v3791_v43 = vld [vmem:[%s5345_s5 + $0x3f4] sm:$0xf]  ;;  %v3564_v36 = vld [vmem:[%s5345_s5 + $0x3f8] sm:$0xf0] }
 0x395   : > { %v3431_v42 = vor.u32 %v3757_v37, %v3428_v38  ;;  %v3567_v40 = vor.u32 %v3791_v43, %v3564_v36 }
 0x396   : > { %2569 = vmatpush.bf16.msra.mxu3 %v3159_v45  ;;  %v3739_v45 = vld [vmem:[%s5345_s5 + $0x254] sm:$0xf] }
 0x397   : > { %2582 = vmatpush.bf16.msra.mxu1 %v3223_v46  ;;  %2595 = vmatpush.bf16.msra.mxu2 %v3287_v51  ;;  %v3356_v46 = vld [vmem:[%s5345_s5 + $0x258] sm:$0xf0] }
 0x398   : > { %v3420_v51 = vld [vmem:[%s5345_s5 + $0x2d8] sm:$0xf0]  ;;  %v3359_v54 = vor.u32 %v3739_v45, %v3356_v46  ;;  %v3787_v45 = vld [vmem:[%s5345_s5 + $0x3d4] sm:$0xf] }
 0x399   : > { %v3548_v46 = vld [vmem:[%s5345_s5 + $0x3d8] sm:$0xf0] }
 0x39a   : > { %2570 = vmatpush.bf16.msra.mxu3 %v3151_v57  ;;  %v3753_v57 = vld [vmem:[%s5345_s5 + $0x2c4] sm:$0xf] }
 0x39b   : > { %2583 = vmatpush.bf16.msra.mxu1 %v3215_v58  ;;  %2596 = vmatpush.bf16.msra.mxu2 %v3279_v60  ;;  %v3769_v58 = vld [vmem:[%s5345_s5 + $0x344] sm:$0xf]  ;;  %v3351_v60 = vor.u32 %v3737_v55, %v3348_v56  ;;  %v3779_v55 = vld [vmem:[%s5345_s5 + $0x394] sm:$0xf]  ;;  %v3516_v56 = vld [vmem:[%s5345_s5 + $0x398] sm:$0xf0] }
 0x39c   : > { %v3479_v61 = vor.u32 %v3769_v58, %v3476_v59  ;;  %v3777_v58 = vld [vmem:[%s5345_s5 + $0x384] sm:$0xf]  ;;  %v3508_v59 = vld [vmem:[%s5345_s5 + $0x388] sm:$0xf0] }
 0x39e   : > { %2571 = vmatpush.bf16.msra.mxu3 %v3143_v1  ;;  %v3404_v1 = vld [vmem:[%s5345_s5 + $0x2b8] sm:$0xf0] }
 0x39f   : > { %2584 = vmatpush.bf16.msra.mxu1 %v3207_v2  ;;  %2597 = vmatpush.bf16.msra.mxu2 %v3271_v4  ;;  %v3767_v2 = vld [vmem:[%s5345_s5 + $0x334] sm:$0xf]  ;;  %v3343_v4 = vor.u32 %v3735_v62, %v3340_v63  ;;  %v3407_v5 = vor.u32 %v3751_v0, %v3404_v1  ;;  %v3797_v62 = vld [vmem:[%s5347_s7 + $0x20] sm:$0xff]  ;;  %v3796_v0 = vld [vmem:[%s5347_s7 + $0x18] sm:$0xff] }
 0x3a0   : > { %v3471_v6 = vor.u32 %v3767_v2, %v3468_v3  ;;  %v3795_v1 = vld [vmem:[%s5347_s7 + $0x10] sm:$0xff] }
 0x3a2   : > { %2572 = vmatpush.bf16.msra.mxu3 %v3135_v13  ;;  %v3396_v13 = vld [vmem:[%s5345_s5 + $0x2a8] sm:$0xf0] }
 0x3a3   : > { %2585 = vmatpush.bf16.msra.mxu1 %v3199_v14  ;;  %2598 = vmatpush.bf16.msra.mxu2 %v3263_v18  ;;  %v3765_v14 = vld [vmem:[%s5345_s5 + $0x324] sm:$0xf]  ;;  %v3399_v17 = vor.u32 %v3749_v11, %v3396_v13 }
 0x3a4   : > { %v3463_v18 = vor.u32 %v3765_v14, %v3460_v15 }
 0x3a6   : > { %2573 = vmatpush.bf16.msra.mxu3 %v3127_v29  ;;  %v3729_v29 = vld [vmem:[%s5345_s5 + $0x204] sm:$0xf] }
 0x3a7   : > { %2586 = vmatpush.bf16.msra.mxu1 %v3191_v30  ;;  %2599 = vmatpush.bf16.msra.mxu2 %v3255_v31  ;;  %v3316_v30 = vld [vmem:[%s5345_s5 + $0x208] sm:$0xf0]  ;;  %v3745_v31 = vld [vmem:[%s5345_s5 + $0x284] sm:$0xf] }
 0x3a8   : > { %v3319_v37 = vor.u32 %v3729_v29, %v3316_v30 }
 0x3a9   : > { %2574 = vmatmul.bf16.vlgmr.msra.gmra.mxu3 %v4780_v9  ;;  %v3423_v9 = vor.u32 %v3755_v49, %v3420_v51  ;;  %v3551_v49 = vor.u32 %v3787_v45, %v3548_v46  ;;  %v3785_v51 = vld [vmem:[%s5345_s5 + $0x3c4] sm:$0xf]  ;;  %v3806_v45 = vld [vmem:[%s5347_s7 + $0x68] sm:$0xff] }
 0x3aa   : > { %2605 = vmatpush.bf16.msrb.mxu3 %v3375_v32  ;;  %2587 = vmatmul.bf16.vlgmr.msra.gmra.mxu1 %v4782_v10  ;;  %v3487_v10 = vor.u32 %v3771_v52, %v3484_v53  ;;  %v3380_v32 = vld [vmem:[%s5345_s5 + $0x288] sm:$0xf0]  ;;  %v3783_v53 = vld [vmem:[%s5345_s5 + $0x3b4] sm:$0xf] }
 0x3ab   : > { %2618 = vmatpush.bf16.msrb.mxu1 %v3439_v39  ;;  %2631 = vmatpush.bf16.msrb.mxu2 %v3503_v35  ;;  %v3761_v39 = vld [vmem:[%s5345_s5 + $0x304] sm:$0xf]  ;;  %v3444_v35 = vld [vmem:[%s5345_s5 + $0x308] sm:$0xf0]  ;;  %v3383_v38 = vor.u32 %v3745_v31, %v3380_v32 }
 0x3ac   : > { %2600 = vmatmul.bf16.vlgmr.msra.gmra.mxu2 %v4856_v47  ;;  %v3412_v47 = vld [vmem:[%s5345_s5 + $0x2c8] sm:$0xf0]  ;;  %v3447_v8 = vor.u32 %v3761_v39, %v3444_v35 }
 0x3ad   : > { %v3415_v34 = vor.u32 %v3753_v57, %v3412_v47  ;;  %v3800_v57 = vld [vmem:[%s5347_s7 + $0x38] sm:$0xff]  ;;  %v3519_v47 = vor.u32 %v3779_v55, %v3516_v56 }
 0x3ae   : > { %2606 = vmatpush.bf16.msrb.mxu3 %v3367_v41  ;;  %v3789_v41 = vld [vmem:[%s5345_s5 + $0x3e4] sm:$0xf] }
 0x3af   : > { %2619 = vmatpush.bf16.msrb.mxu1 %v3431_v42  ;;  %2632 = vmatpush.bf16.msrb.mxu2 %v3495_v44  ;;  %v3556_v42 = vld [vmem:[%s5345_s5 + $0x3e8] sm:$0xf0] }
 0x3b0   : > { %v3559_v44 = vor.u32 %v3789_v41, %v3556_v42  ;;  %v3808_v41 = vld [vmem:[%s5347_s7 + $0x78] sm:$0xff] }
 0x3b2   : > { %2607 = vmatpush.bf16.msrb.mxu3 %v3359_v54  ;;  %v3781_v54 = vld [vmem:[%s5345_s5 + $0x3a4] sm:$0xf] }
 0x3b3   : > { %2620 = vmatpush.bf16.msrb.mxu1 %v3423_v9  ;;  %2633 = vmatpush.bf16.msrb.mxu2 %v3487_v10  ;;  %v3524_v9 = vld [vmem:[%s5345_s5 + $0x3a8] sm:$0xf0] }
 0x3b4   : > { %v3527_v10 = vor.u32 %v3781_v54, %v3524_v9  ;;  %v3801_v54 = vld [vmem:[%s5347_s7 + $0x40] sm:$0xff] }
 0x3b6   : > { %2608 = vmatpush.bf16.msrb.mxu3 %v3351_v60  ;;  %v3799_v60 = vld [vmem:[%s5347_s7 + $0x30] sm:$0xff] }
 0x3b7   : > { %2621 = vmatpush.bf16.msrb.mxu1 %v3415_v34  ;;  %2634 = vmatpush.bf16.msrb.mxu2 %v3479_v61  ;;  %v3511_v34 = vor.u32 %v3777_v58, %v3508_v59  ;;  %v3798_v61 = vld [vmem:[%s5347_s7 + $0x28] sm:$0xff] }
 0x3ba   : > { %2609 = vmatpush.bf16.msrb.mxu3 %v3343_v4 }
 0x3bb   : > { %2622 = vmatpush.bf16.msrb.mxu1 %v3407_v5  ;;  %2635 = vmatpush.bf16.msrb.mxu2 %v3471_v6  ;;  %v3794_v5 = vld [vmem:[%s5347_s7 + $0x8] sm:$0xff]  ;;  %v3793_v6 = vld [vmem:[%s5347_s7] sm:$0xff] }
 0x3be   : > { %2610 = vmatpush.bf16.msrb.mxu3 %v3335_v16 }
 0x3bf   : > { %2623 = vmatpush.bf16.msrb.mxu1 %v3399_v17  ;;  %2636 = vmatpush.bf16.msrb.mxu2 %v3463_v18 }
 0x3c2   : > { %2611 = vmatpush.bf16.msrb.mxu3 %v3327_v33 }
 0x3c3   : > { %2624 = vmatpush.bf16.msrb.mxu1 %v3391_v28  ;;  %2637 = vmatpush.bf16.msrb.mxu2 %v3455_v25 }
 0x3c6   : > { %2612 = vmatpush.bf16.msrb.mxu3 %v3319_v37 }
 0x3c7   : > { %2625 = vmatpush.bf16.msrb.mxu1 %v3383_v38  ;;  %2638 = vmatpush.bf16.msrb.mxu2 %v3447_v8 }
 0x3c9   : > { %2613 = vmatmul.bf16.vlgmr.msrb.gmra.mxu3 %v4858_v48  ;;  %v3540_v48 = vld [vmem:[%s5345_s5 + $0x3c8] sm:$0xf0] }
 0x3ca   : > { %2644 = vmatpush.bf16.msra.mxu3 %v3567_v40  ;;  %2626 = vmatmul.bf16.vlgmr.msrb.gmra.mxu1 %v4865_v50  ;;  %v3543_v52 = vor.u32 %v3785_v51, %v3540_v48  ;;  %v3532_v50 = vld [vmem:[%s5345_s5 + $0x3b8] sm:$0xf0]  ;;  %v3805_v51 = vld [vmem:[%s5347_s7 + $0x60] sm:$0xff] }
 0x3cb   : > { %2639 = vmatmul.bf16.vlgmr.msrb.gmra.mxu2 %v4940_v26  ;;  %v3535_v26 = vor.u32 %v3783_v53, %v3532_v50  ;;  %2790 = vmatpush.bf16.msra.mxu1 %v3800_v57  ;;  %v3804_v48 = vld [vmem:[%s5347_s7 + $0x58] sm:$0xff]  ;;  %v3802_v50 = vld [vmem:[%s5347_s7 + $0x48] sm:$0xff] }
 0x3cc   : > { %2803 = vmatpush.bf16.msra.mxu2 %v3808_v41 }
 0x3ce   : > { %2645 = vmatpush.bf16.msra.mxu3 %v3559_v44  ;;  %v3807_v44 = vld [vmem:[%s5347_s7 + $0x70] sm:$0xff] }
 0x3cf   : > { %2791 = vmatpush.bf16.msra.mxu1 %v3799_v60 }
 0x3d0   : > { %2804 = vmatpush.bf16.msra.mxu2 %v3807_v44 }
 0x3d2   : > { %2646 = vmatpush.bf16.msra.mxu3 %v3551_v49 }
 0x3d3   : > { %2792 = vmatpush.bf16.msra.mxu1 %v3798_v61 }
 0x3d4   : > { %2805 = vmatpush.bf16.msra.mxu2 %v3806_v45 }
 0x3d6   : > { %2647 = vmatpush.bf16.msra.mxu3 %v3543_v52  ;;  %v3803_v52 = vld [vmem:[%s5347_s7 + $0x50] sm:$0xff] }
 0x3d7   : > { %2793 = vmatpush.bf16.msra.mxu1 %v3797_v62 }
 0x3d8   : > { %2806 = vmatpush.bf16.msra.mxu2 %v3805_v51 }
 0x3da   : > { %2648 = vmatpush.bf16.msra.mxu3 %v3535_v26 }
 0x3db   : > { %2794 = vmatpush.bf16.msra.mxu1 %v3796_v0 }
 0x3dc   : > { %2807 = vmatpush.bf16.msra.mxu2 %v3804_v48 }
 0x3de   : > { %2649 = vmatpush.bf16.msra.mxu3 %v3527_v10 }
 0x3df   : > { %2795 = vmatpush.bf16.msra.mxu1 %v3795_v1 }
 0x3e0   : > { %2808 = vmatpush.bf16.msra.mxu2 %v3803_v52 }
 0x3e2   : > { %2650 = vmatpush.bf16.msra.mxu3 %v3519_v47 }
 0x3e3   : > { %2796 = vmatpush.bf16.msra.mxu1 %v3794_v5 }
 0x3e4   : > { %2809 = vmatpush.bf16.msra.mxu2 %v3802_v50 }
 0x3e6   : > { %2651 = vmatpush.bf16.msra.mxu3 %v3511_v34  ;;  %v2471_v63 = vpop.f32.mrf.mxu1 }
 0x3e7   : > { %2797 = vmatpush.bf16.msra.mxu1 %v3793_v6 }
 0x3e8   : > { %2810 = vmatpush.bf16.msra.mxu2 %v3801_v54 }
 0x3e9   : > { %2652 = vmatmul.bf16.vlgmr.msra.gmra.mxu3 %v4942_v27  ;;  %v1785_v27 = vld [vmem:[%s5346_s6] sm:$0x3] }
 0x3ea   : > { %v2445_v12 = vperm.slane %v1785_v27, 0  ;;  %v2446_v33 = vperm.slane %v1785_v27, 1 }
 0x3ec   : > { %v2458_v2 = vpop.f32.mrf.mxu3 }
 0x3ed   : > { %v2484_v3 = vpop.f32.mrf.mxu2  ;;  %v2459_v14 = vadd.f32 %v2458_v2, %v2445_v12 }
 0x3ee   : > { %v2473_v4 = vpop.f32.mrf.mxu1 }
 0x3ef   : > { %v2472_v16 = vadd.f32 %v2471_v63, %v2459_v14  ;;  %v2693_v4 = vld [vmem:[%s5348_s8] sm:$0x1] }
 0x3f1   : > { %v2485_v19 = vadd.f32 %v2484_v3, %v2472_v16 }
 0x3f4   : > { %v2460_v7 = vpop.f32.mrf.mxu3 }
 0x3f5   : > { %v2486_v11 = vpop.f32.mrf.mxu2 }
 0x3f6   : > { %v2510_v13 = vpop.f32.mrf.mxu1 }
 0x3fc   : > { %v2497_v15 = vpop.f32.mrf.mxu3 }
 0x3fd   : > { %v2523_v17 = vpop.f32.mrf.mxu2  ;;  %v2498_v20 = vadd.f32 %v2497_v15, %v2485_v19 }
 0x3fe   : > { %v2512_v18 = vpop.f32.mrf.mxu1 }
 0x3ff   : > { %v2511_v23 = vadd.f32 %v2510_v13, %v2498_v20 }
 0x401   : > { %v2524_v28 = vadd.f32 %v2523_v17, %v2511_v23 }
 0x404   : > { %v2499_v21 = vpop.f32.mrf.mxu3 }
 0x405   : > { %v2525_v22 = vpop.f32.mrf.mxu2 }
 0x407   : > { %v2549_v24 = vpop.f32.mrf.mxu1 }
 0x40c   : > { %v2536_v25 = vpop.f32.mrf.mxu3 }
 0x40d   : > { %v2537_v29 = vadd.f32 %v2536_v25, %v2524_v28 }
 0x40f   : > { %v2562_v30 = vpop.f32.mrf.mxu2  ;;  %v2550_v32 = vadd.f32 %v2549_v24, %v2537_v29  ;;  %v2551_v39 = vpop.f32.mrf.mxu1 }
 0x410   : > { %v2563_v31 = vadd.f32 %v2562_v30, %v2446_v33 }
 0x411   : > { %v2657_v35 = vmax.f32 %v2550_v32, 0.0 }
 0x413   : > { %v2659_v43 = vpack.c.bf16 %v2657_v35, %v2657_v35 }
 0x414   : > { %v2538_v36 = vpop.f32.mrf.mxu3 }
 0x415   : > { %2798 = vmatmul.bf16.vlgmr.msra.gmra.mxu1 %v2659_v43 }
 0x417   : > { %v2564_v37 = vpop.f32.mrf.mxu2 }
 0x427   : > { %v2588_v38 = vpop.f32.mrf.mxu1 }
 0x42c   : > { %v2575_v8 = vpop.f32.mrf.mxu3 }
 0x42d   : > { %v2576_v57 = vadd.f32 %v2575_v8, %v2563_v31 }
 0x42f   : > { %v2601_v40 = vpop.f32.mrf.mxu2  ;;  %v2590_v42 = vpop.f32.mrf.mxu1  ;;  %v2589_v47 = vadd.f32 %v2588_v38, %v2576_v57 }
 0x431   : > { %v2602_v58 = vadd.f32 %v2601_v40, %v2589_v47 }
 0x434   : > { %v2577_v46 = vpop.f32.mrf.mxu3 }
 0x437   : > { %v2603_v49 = vpop.f32.mrf.mxu2 }
 0x447   : > { %v2627_v53 = vpop.f32.mrf.mxu1 }
 0x44c   : > { %v2614_v26 = vpop.f32.mrf.mxu3 }
 0x44d   : > { %v2615_v59 = vadd.f32 %v2614_v26, %v2602_v58 }
 0x44e   : > { %v2640_v9 = vpop.f32.mrf.mxu2 }
 0x44f   : > { %v2629_v10 = vpop.f32.mrf.mxu1  ;;  %v2628_v60 = vadd.f32 %v2627_v53, %v2615_v59 }
 0x451   : > { %v2641_v34 = vadd.f32 %v2640_v9, %v2628_v60 }
 0x454   : > { %v2616_v55 = vpop.f32.mrf.mxu3 }
 0x456   : > { %v2642_v56 = vpop.f32.mrf.mxu2 }
 0x46c   : > { %v2653_v61 = vpop.f32.mrf.mxu3 }
 0x46d   : > { %v2654_v62 = vadd.f32 %v2653_v61, %v2641_v34 }
 0x46f   : > { %v2658_v63 = vmax.f32 %v2654_v62, 0.0 }
 0x471   : > { %v2660_v0 = vpack.c.bf16 %v2658_v63, %v2658_v63 }
 0x473   : > { %2811 = vmatmul.bf16.vlgmr.msra.gmra.mxu2 %v2660_v0 }
 0x474   : > { %v2655_v1 = vpop.f32.mrf.mxu3 }
 0x492   : > { %v2799_v2 = vpop.f32.mrf.mxu1 }
 0x493   : > { %v2800_v5 = vadd.f32 %v2799_v2, %v2693_v4 }
 0x49a   : > { %v2801_v3 = vpop.f32.mrf.mxu1 }
 0x4f6   : > { %v2812_v27 = vpop.f32.mrf.mxu2 }
 0x4f7   : > { %v2813_v6 = vadd.f32 %v2812_v27, %v2800_v5 }
 0x4f9   : > { %2816 = vst [vmem:[%s324_s23] sm:$0x1] %v2813_v6 }
 0x4fa   : > { %3881 = shalt.err (!%p3878_p3)
}
 0x4fb   : > { %3809 = dma.vmem_to_hbm [thread:$0]  (%p4010_p5), %s2829_s24, 16, %s2831_s25, %s2818_s26  }
 0x4fe   : > { %v2814_v7 = vpop.f32.mrf.mxu2 }
 0x4ff PF: > { %p3815_p4 = scmp.ge.s32.totalorder %s3916_s12, 2  ;;  %s2842_s21 = sand.u32 1, %s3904_s30  }
 0x500   : > { %s2843_s22 = scalar_lea.sflag [#allocation8], %s2842_s21 }
 0x501   : > { %p3812_p7 = pnand %p3815_p4, %p4014_p6 }
 0x503   : > { %p3813_p8 = pneg %p3812_p7 }
 0x505   : > { %3899 = dma.done.wait (%p3813_p8), %s2843_s22, 16  }
 0x506   : > { %3901 = vsyncadd (%p3813_p8), %s2843_s22, 4294967280  ;;  %p19_p9 = scmp.ge.s32.totalorder %s3997_s15, 4   ;;  %s5356_s30 = smov %s3908_s10 }
 0x507   : > { %s5357_s10 = smov %s3912_s11  ;;  %s5358_s11 = smov %s4008_s18 }
 0x508   : > { %s5359_s12 = smov %s3997_s15  ;;  %21 = sbr.rel (!%p19_p9) target bundleno = 3 (0x3), region = 124 }
 0x50d   :  { %2848 = vsyncpa [#allocation8], 1 }
 0x50e   :  { %2850 = vsyncpa [#allocation8 + $0x1], 1 }

</bundles_post_ra>
